<compile_context>
chip_gen: v7x
topology: tpu7x:2x2x1
jax: 0.10.0
libtpu: 0.0.40
codegen_flags: <defaults>
</compile_context>

<pallas_src>
import functools

import jax
import jax.numpy as jnp
from jax.experimental import pallas as pl
from jax.experimental.pallas import tpu as pltpu


# ----------------------------------------------------------------------------
# Fused kernel: conv3x3(+bias,ReLU) -> (flatten folded into w1 layout) -> MLP
# ----------------------------------------------------------------------------
def _fused_forward_kernel(patches_ref, wc_ref, w1_ref, b1_ref, w2_ref, b2_ref,
                          w3_ref, b3_ref, out_ref):
    tile_m, k_pad, hw = patches_ref.shape
    cout = wc_ref.shape[0]

    # Conv2d(3->8, k=3, pad=1) + bias + ReLU as one batched MXU matmul.
    # Conv bias is folded in: the patches carry a constant-1 row at k = K_raw
    # and wc carries the bias in that column (K padded 27 -> 32, so it's free).
    wc_b = jnp.broadcast_to(wc_ref[...], (tile_m, cout, k_pad))
    feat = jnp.einsum('bck,bkp->bcp', wc_b, patches_ref[...],
                      preferred_element_type=jnp.float32)       # (TM, Cout, HW)
    feat = jnp.maximum(feat, 0.0).astype(jnp.bfloat16)

    # Linear(num_ftrs = Cout*HW, 512).  The PyTorch NCHW flatten
    #     flat[b, c*HW + p] = feat[b, c, p]
    # is realized by contracting channel-by-channel against w1 stored as
    # (Cout, HW, 512): same MXU FLOPs, but no flatten relayout, no flat
    # scratch, no masked per-row stores.
    acc = jnp.dot(feat[:, 0, :], w1_ref[0], preferred_element_type=jnp.float32)
    for c in range(1, cout):
        acc = acc + jnp.dot(feat[:, c, :], w1_ref[c],
                            preferred_element_type=jnp.float32)
    h1 = jnp.maximum(acc + b1_ref[...], 0.0).astype(jnp.bfloat16)   # f32 bias/ReLU

    # TODO(synk): Dropout(0.2) is identity at inference; not modeled in-kernel.
    h2 = jnp.dot(h1, w2_ref[...], preferred_element_type=jnp.float32) + b2_ref[...]
    h2 = jnp.maximum(h2, 0.0).astype(jnp.bfloat16)

    out_ref[...] = (jnp.dot(h2, w3_ref[...], preferred_element_type=jnp.float32)
                    + b3_ref[...])                              # (TM, N_pad) f32


def fused_forward(patches3T, wc, w1, b1, w2, b2, w3, b3, *, tile_m):
    m_total, k_pad, hw = patches3T.shape
    cout, _, d1 = w1.shape
    d2 = w2.shape[1]
    n_pad = w3.shape[1]
    n_tiles = m_total // tile_m

    flops = 2 * m_total * (cout * k_pad * hw + cout * hw * d1 + d1 * d2 + d2 * n_pad)
    bytes_accessed = (patches3T.size * 2 + wc.size * 2 + w1.size * 2
                      + w2.size * 2 + w3.size * 2
                      + 4 * (b1.size + b2.size + b3.size)
                      + 4 * m_total * n_pad)

    return pl.pallas_call(
        _fused_forward_kernel,
        out_shape=jax.ShapeDtypeStruct((m_total, n_pad), jnp.float32),
        grid=(n_tiles,),
        in_specs=[
            # activations: tiled over M, auto double-buffered
            pl.BlockSpec((tile_m, k_pad, hw), lambda i: (i, 0, 0)),
            # weights/biases: constant index_maps -> DMA'd once, VMEM-resident
            pl.BlockSpec((cout, k_pad), lambda i: (0, 0)),
            pl.BlockSpec((cout, hw, d1), lambda i: (0, 0, 0)),
            pl.BlockSpec((1, d1), lambda i: (0, 0)),
            pl.BlockSpec((d1, d2), lambda i: (0, 0)),
            pl.BlockSpec((1, d2), lambda i: (0, 0)),
            pl.BlockSpec((d2, n_pad), lambda i: (0, 0)),
            pl.BlockSpec((1, n_pad), lambda i: (0, 0)),
        ],
        out_specs=pl.BlockSpec((tile_m, n_pad), lambda i: (i, 0)),
        compiler_params=pltpu.CompilerParams(
            dimension_semantics=("parallel",)),   # v7x: shard M tiles across 2 TCs
        cost_estimate=pl.CostEstimate(flops=flops, transcendentals=0,
                                      bytes_accessed=bytes_accessed),
    )(patches3T, wc, w1, b1, w2, b2, w3, b3)


# ----------------------------------------------------------------------------
# Wrapper glue (tiny XLA ops): im2col for the 3x3 "same" conv, per-sample
# ----------------------------------------------------------------------------
# TODO(synk): at real backbone resolutions, move im2col inside the kernel
# (shifted pl.ds views) and re-derive the VMEM budget (v7x has 64 MiB).
def _im2col_patches3T(x_nchw, kh, kw, k_pad):
    """(B, K_pad, HW) bf16; k=(di*kw+dj)*Cin+ci, k=kh*kw*Cin is a constant-1
    row (folded conv bias); column p = i*W + j."""
    B, C, H, W = x_nchw.shape
    x_nhwc = jnp.transpose(x_nchw, (0, 2, 3, 1))
    ph, pw = kh // 2, kw // 2
    xp = jnp.pad(x_nhwc, ((0, 0), (ph, ph), (pw, pw), (0, 0)))
    cols = [xp[:, di:di + H, dj:dj + W, :] for di in range(kh) for dj in range(kw)]
    patches = jnp.concatenate(cols, axis=-1).reshape(B, H * W, kh * kw * C)
    ones = jnp.ones((B, H * W, 1), patches.dtype)          # folded conv-bias row
    patches = jnp.concatenate([patches, ones], axis=-1)
    k = kh * kw * C + 1
    if k_pad > k:
        patches = jnp.pad(patches, ((0, 0), (0, 0), (0, k_pad - k)))
    return jnp.transpose(patches, (0, 2, 1)).astype(jnp.bfloat16)   # (B, K_pad, HW)


def _forward(x_nchw, params, *, kh, kw, k_pad, hw, num_classes):
    B, C, H, W = x_nchw.shape
    assert H * W == hw, "spatial size must match the size the head was built for"
    patches3T = _im2col_patches3T(x_nchw, kh, kw, k_pad)       # (B, K_pad, HW)
    # Batch rows padded to >=16 (bf16 packs 16 sublanes/vreg); once the batch
    # is big enough, tile at 128 rows so weights amortize across M tiles.
    m16 = max(16, -(-B // 16) * 16)
    tile_m = 128 if m16 >= 128 else m16
    m_total = -(-m16 // tile_m) * tile_m
    if m_total > B:
        patches3T = jnp.pad(patches3T, ((0, m_total - B), (0, 0), (0, 0)))
    out = fused_forward(patches3T, params["wc"], params["w1"], params["b1"],
                        params["w2"], params["b2"], params["w3"], params["b3"],
                        tile_m=tile_m)
    return out[:B, :num_classes]


# ----------------------------------------------------------------------------
# Model: synthetic forward_features + custom classifier head
# ----------------------------------------------------------------------------
class TransferLearningModelPallas:
    def __init__(self, num_classes=10, in_ch=3, feat_ch=8, spatial=16, seed=0):
        key = jax.random.PRNGKey(seed)
        ks = jax.random.split(key, 8)
        f32 = jnp.float32
        kh = kw = 3
        hw = spatial * spatial
        num_ftrs = feat_ch * hw
        k_raw = kh * kw * in_ch
        k_pad = -(-(k_raw + 1) // 32) * 32              # 27 (+1 bias row) -> 32
        n_pad = max(128, -(-num_classes // 128) * 128)  # lane-dense logits store

        # master weights (f32, PyTorch layouts) --------------------------------
        conv_w = jax.random.normal(ks[0], (feat_ch, in_ch, kh, kw), f32) * 0.1  # OIHW
        conv_b = jax.random.normal(ks[1], (feat_ch,), f32) * 0.01
        w1 = jax.random.normal(ks[2], (num_ftrs, 512), f32) * (num_ftrs ** -0.5)
        b1 = jax.random.normal(ks[3], (512,), f32) * 0.01
        w2 = jax.random.normal(ks[4], (512, 256), f32) * (512 ** -0.5)
        b2 = jax.random.normal(ks[5], (256,), f32) * 0.01
        w3 = jax.random.normal(ks[6], (256, num_classes), f32) * (256 ** -0.5)
        b3 = jax.random.normal(ks[7], (num_classes,), f32) * 0.01
        self.master = dict(conv_w=conv_w, conv_b=conv_b, w1=w1, b1=b1,
                           w2=w2, b2=b2, w3=w3, b3=b3)

        # kernel-side weights: bf16, re-laid-out / padded ONCE at init ---------
        # conv weight rows match the im2col k-order; bias folded as a column.
        wc = jnp.transpose(conv_w, (0, 2, 3, 1)).reshape(feat_ch, k_raw)
        wc = jnp.concatenate([wc, conv_b.reshape(feat_ch, 1)], axis=1)
        wc = jnp.pad(wc, ((0, 0), (0, k_pad - k_raw - 1))).astype(jnp.bfloat16)
        # w1 stored (Cout, HW, 512): w1_3d[c, p, :] == w1[c*HW + p, :] — exactly
        # the PyTorch NCHW flatten order, so the kernel never builds `flat`.
        w1_3d = w1.reshape(feat_ch, hw, 512).astype(jnp.bfloat16)
        w3p = jnp.pad(w3, ((0, 0), (0, n_pad - num_classes))).astype(jnp.bfloat16)
        b3p = jnp.pad(b3, (0, n_pad - num_classes)).reshape(1, n_pad)
        # TODO(synk): store w1 as int8 (v5e/v6e) or fp8 (v7x) with per-column
        # scales to halve the dominant ~2 MiB weight DMA; kept bf16 here for
        # portability across MXU generations.
        self.params = dict(
            wc=wc, w1=w1_3d, b1=b1.reshape(1, 512),
            w2=w2.astype(jnp.bfloat16), b2=b2.reshape(1, 256),
            w3=w3p, b3=b3p)

        self._fwd = jax.jit(functools.partial(
            _forward, kh=kh, kw=kw, k_pad=k_pad, hw=hw, num_classes=num_classes))

    def __call__(self, x_nchw):
        return self._fwd(x_nchw, self.params)

    def reference(self, x_nchw):
        """Pure-JAX f32 reference with PyTorch semantics (for validation)."""
        m = self.master
        B, C, H, W = x_nchw.shape
        xp = jnp.pad(jnp.transpose(x_nchw, (0, 2, 3, 1)),
                     ((0, 0), (1, 1), (1, 1), (0, 0)))
        cols = [xp[:, di:di + H, dj:dj + W, :] for di in range(3) for dj in range(3)]
        patches = jnp.concatenate(cols, axis=-1).reshape(B * H * W, -1)
        w_mat = jnp.transpose(m["conv_w"], (2, 3, 1, 0)).reshape(patches.shape[1], -1)
        feat = jnp.maximum(patches @ w_mat + m["conv_b"], 0.0)         # (B*HW, Cout)
        feat = jnp.transpose(feat.reshape(B, H, W, -1), (0, 3, 1, 2))  # NCHW
        flat = feat.reshape(B, -1)
        h1 = jnp.maximum(flat @ m["w1"] + m["b1"], 0.0)
        h2 = jnp.maximum(h1 @ m["w2"] + m["b2"], 0.0)
        return h2 @ m["w3"] + m["b3"]


if __name__ == "__main__":
    B, C, H, W = 2, 3, 16, 16
    num_classes = 10

    model = TransferLearningModelPallas(num_classes=num_classes, in_ch=C,
                                        feat_ch=8, spatial=H, seed=0)

    x = jax.random.normal(jax.random.PRNGKey(0), (B, C, H, W), jnp.float32)

    out = jax.block_until_ready(model(x))
    assert out.shape == (B, num_classes)
    assert out.dtype == jnp.float32

    ref = jax.block_until_ready(model.reference(x))
    err = float(jnp.max(jnp.abs(out - ref)))
    assert err < 5e-2, f"kernel/reference mismatch: max abs err = {err}"

    print("KERNEL_OK")
</pallas_src>

<mosaic_0001>
module attributes {stable_mosaic.version = 11 : i64} {
  func.func @_fused_forward_kernel(%arg0: i32, %arg1: memref<16x32x256xbf16, #tpu.memory_space<vmem>>, %arg2: memref<8x32xbf16, #tpu.memory_space<vmem>>, %arg3: memref<8x256x512xbf16, #tpu.memory_space<vmem>>, %arg4: memref<1x512xf32, #tpu.memory_space<vmem>>, %arg5: memref<512x256xbf16, #tpu.memory_space<vmem>>, %arg6: memref<1x256xf32, #tpu.memory_space<vmem>>, %arg7: memref<256x128xbf16, #tpu.memory_space<vmem>>, %arg8: memref<1x128xf32, #tpu.memory_space<vmem>>, %arg9: memref<16x128xf32, #tpu.memory_space<vmem>>) attributes {dimension_semantics = [#tpu.dimension_semantics<parallel>], iteration_bounds = array<i64: 1>, scalar_prefetch = 0 : i64, scratch_operands = 0 : i64, tpu.core_type = #tpu.core_type<tc>, window_params = [{transform_indices = @transform_0, window_bounds = array<i64: 16, 32, 256>}, {pipeline_mode = #tpu.pipeline_mode<synchronous>, transform_indices = @transform_1, window_bounds = array<i64: 8, 32>}, {pipeline_mode = #tpu.pipeline_mode<synchronous>, transform_indices = @transform_2, window_bounds = array<i64: 8, 256, 512>}, {pipeline_mode = #tpu.pipeline_mode<synchronous>, transform_indices = @transform_3, window_bounds = array<i64: 1, 512>}, {pipeline_mode = #tpu.pipeline_mode<synchronous>, transform_indices = @transform_4, window_bounds = array<i64: 512, 256>}, {pipeline_mode = #tpu.pipeline_mode<synchronous>, transform_indices = @transform_5, window_bounds = array<i64: 1, 256>}, {pipeline_mode = #tpu.pipeline_mode<synchronous>, transform_indices = @transform_6, window_bounds = array<i64: 256, 128>}, {pipeline_mode = #tpu.pipeline_mode<synchronous>, transform_indices = @transform_7, window_bounds = array<i64: 1, 128>}, {transform_indices = @transform_8, window_bounds = array<i64: 16, 128>}]} {
    %c0 = arith.constant 0 : index
    %c0_0 = arith.constant 0 : index
    %0 = vector.load %arg2[%c0, %c0_0] : memref<8x32xbf16, #tpu.memory_space<vmem>>, vector<8x32xbf16>
    %1 = vector.shape_cast %0 : vector<8x32xbf16> to vector<1x8x32xbf16>
    %2 = vector.broadcast %1 : vector<1x8x32xbf16> to vector<16x8x32xbf16>
    %c0_1 = arith.constant 0 : index
    %c0_2 = arith.constant 0 : index
    %c0_3 = arith.constant 0 : index
    %3 = vector.load %arg1[%c0_1, %c0_2, %c0_3] : memref<16x32x256xbf16, #tpu.memory_space<vmem>>, vector<16x32x256xbf16>
    "tpu.trace_start"() <{level = 10 : i32, message = "bck,bkp->bcp"}> : () -> ()
    %cst = arith.constant dense<0.000000e+00> : vector<16x8x256xf32>
    %4 = tpu.matmul %2, %3, %cst {dimension_numbers = #tpu.dot_dimension_numbers<[2], [1], [1], [2], [0, 0, 0, 1, 1, 2], [0], [0]>} : vector<16x8x32xbf16>, vector<16x32x256xbf16>, vector<16x8x256xf32> -> vector<16x8x256xf32>
    "tpu.trace_stop"() : () -> ()
    %cst_4 = arith.constant 0.000000e+00 : f32
    %5 = vector.broadcast %cst_4 : f32 to vector<16x8x256xf32>
    %6 = arith.maximumf %4, %5 : vector<16x8x256xf32>
    %7 = arith.truncf %6 : vector<16x8x256xf32> to vector<16x8x256xbf16>
    %8 = vector.extract_strided_slice %7 {offsets = [0, 0, 0], sizes = [16, 1, 256], strides = [1, 1, 1]} : vector<16x8x256xbf16> to vector<16x1x256xbf16>
    %9 = vector.shape_cast %8 : vector<16x1x256xbf16> to vector<16x256xbf16>
    %c0_5 = arith.constant 0 : index
    %c0_6 = arith.constant 0 : index
    %c0_7 = arith.constant 0 : index
    %10 = vector.load %arg3[%c0_5, %c0_6, %c0_7] : memref<8x256x512xbf16, #tpu.memory_space<vmem>>, vector<1x256x512xbf16>
    %11 = vector.shape_cast %10 : vector<1x256x512xbf16> to vector<256x512xbf16>
    %cst_8 = arith.constant dense<0.000000e+00> : vector<16x512xf32>
    %12 = tpu.matmul %9, %11, %cst_8 {dimension_numbers = #tpu.dot_dimension_numbers<[1], [0], [0], [1], [0, 0, 1, 1], [], []>} : vector<16x256xbf16>, vector<256x512xbf16>, vector<16x512xf32> -> vector<16x512xf32>
    %13 = vector.extract_strided_slice %7 {offsets = [0, 1, 0], sizes = [16, 1, 256], strides = [1, 1, 1]} : vector<16x8x256xbf16> to vector<16x1x256xbf16>
    %14 = vector.shape_cast %13 : vector<16x1x256xbf16> to vector<16x256xbf16>
    %c1 = arith.constant 1 : index
    %c0_9 = arith.constant 0 : index
    %c0_10 = arith.constant 0 : index
    %15 = vector.load %arg3[%c1, %c0_9, %c0_10] : memref<8x256x512xbf16, #tpu.memory_space<vmem>>, vector<1x256x512xbf16>
    %16 = vector.shape_cast %15 : vector<1x256x512xbf16> to vector<256x512xbf16>
    %cst_11 = arith.constant dense<0.000000e+00> : vector<16x512xf32>
    %17 = tpu.matmul %14, %16, %cst_11 {dimension_numbers = #tpu.dot_dimension_numbers<[1], [0], [0], [1], [0, 0, 1, 1], [], []>} : vector<16x256xbf16>, vector<256x512xbf16>, vector<16x512xf32> -> vector<16x512xf32>
    %18 = arith.addf %12, %17 : vector<16x512xf32>
    %19 = vector.extract_strided_slice %7 {offsets = [0, 2, 0], sizes = [16, 1, 256], strides = [1, 1, 1]} : vector<16x8x256xbf16> to vector<16x1x256xbf16>
    %20 = vector.shape_cast %19 : vector<16x1x256xbf16> to vector<16x256xbf16>
    %c2 = arith.constant 2 : index
    %c0_12 = arith.constant 0 : index
    %c0_13 = arith.constant 0 : index
    %21 = vector.load %arg3[%c2, %c0_12, %c0_13] : memref<8x256x512xbf16, #tpu.memory_space<vmem>>, vector<1x256x512xbf16>
    %22 = vector.shape_cast %21 : vector<1x256x512xbf16> to vector<256x512xbf16>
    %cst_14 = arith.constant dense<0.000000e+00> : vector<16x512xf32>
    %23 = tpu.matmul %20, %22, %cst_14 {dimension_numbers = #tpu.dot_dimension_numbers<[1], [0], [0], [1], [0, 0, 1, 1], [], []>} : vector<16x256xbf16>, vector<256x512xbf16>, vector<16x512xf32> -> vector<16x512xf32>
    %24 = arith.addf %18, %23 : vector<16x512xf32>
    %25 = vector.extract_strided_slice %7 {offsets = [0, 3, 0], sizes = [16, 1, 256], strides = [1, 1, 1]} : vector<16x8x256xbf16> to vector<16x1x256xbf16>
    %26 = vector.shape_cast %25 : vector<16x1x256xbf16> to vector<16x256xbf16>
    %c3 = arith.constant 3 : index
    %c0_15 = arith.constant 0 : index
    %c0_16 = arith.constant 0 : index
    %27 = vector.load %arg3[%c3, %c0_15, %c0_16] : memref<8x256x512xbf16, #tpu.memory_space<vmem>>, vector<1x256x512xbf16>
    %28 = vector.shape_cast %27 : vector<1x256x512xbf16> to vector<256x512xbf16>
    %cst_17 = arith.constant dense<0.000000e+00> : vector<16x512xf32>
    %29 = tpu.matmul %26, %28, %cst_17 {dimension_numbers = #tpu.dot_dimension_numbers<[1], [0], [0], [1], [0, 0, 1, 1], [], []>} : vector<16x256xbf16>, vector<256x512xbf16>, vector<16x512xf32> -> vector<16x512xf32>
    %30 = arith.addf %24, %29 : vector<16x512xf32>
    %31 = vector.extract_strided_slice %7 {offsets = [0, 4, 0], sizes = [16, 1, 256], strides = [1, 1, 1]} : vector<16x8x256xbf16> to vector<16x1x256xbf16>
    %32 = vector.shape_cast %31 : vector<16x1x256xbf16> to vector<16x256xbf16>
    %c4 = arith.constant 4 : index
    %c0_18 = arith.constant 0 : index
    %c0_19 = arith.constant 0 : index
    %33 = vector.load %arg3[%c4, %c0_18, %c0_19] : memref<8x256x512xbf16, #tpu.memory_space<vmem>>, vector<1x256x512xbf16>
    %34 = vector.shape_cast %33 : vector<1x256x512xbf16> to vector<256x512xbf16>
    %cst_20 = arith.constant dense<0.000000e+00> : vector<16x512xf32>
    %35 = tpu.matmul %32, %34, %cst_20 {dimension_numbers = #tpu.dot_dimension_numbers<[1], [0], [0], [1], [0, 0, 1, 1], [], []>} : vector<16x256xbf16>, vector<256x512xbf16>, vector<16x512xf32> -> vector<16x512xf32>
    %36 = arith.addf %30, %35 : vector<16x512xf32>
    %37 = vector.extract_strided_slice %7 {offsets = [0, 5, 0], sizes = [16, 1, 256], strides = [1, 1, 1]} : vector<16x8x256xbf16> to vector<16x1x256xbf16>
    %38 = vector.shape_cast %37 : vector<16x1x256xbf16> to vector<16x256xbf16>
    %c5 = arith.constant 5 : index
    %c0_21 = arith.constant 0 : index
    %c0_22 = arith.constant 0 : index
    %39 = vector.load %arg3[%c5, %c0_21, %c0_22] : memref<8x256x512xbf16, #tpu.memory_space<vmem>>, vector<1x256x512xbf16>
    %40 = vector.shape_cast %39 : vector<1x256x512xbf16> to vector<256x512xbf16>
    %cst_23 = arith.constant dense<0.000000e+00> : vector<16x512xf32>
    %41 = tpu.matmul %38, %40, %cst_23 {dimension_numbers = #tpu.dot_dimension_numbers<[1], [0], [0], [1], [0, 0, 1, 1], [], []>} : vector<16x256xbf16>, vector<256x512xbf16>, vector<16x512xf32> -> vector<16x512xf32>
    %42 = arith.addf %36, %41 : vector<16x512xf32>
    %43 = vector.extract_strided_slice %7 {offsets = [0, 6, 0], sizes = [16, 1, 256], strides = [1, 1, 1]} : vector<16x8x256xbf16> to vector<16x1x256xbf16>
    %44 = vector.shape_cast %43 : vector<16x1x256xbf16> to vector<16x256xbf16>
    %c6 = arith.constant 6 : index
    %c0_24 = arith.constant 0 : index
    %c0_25 = arith.constant 0 : index
    %45 = vector.load %arg3[%c6, %c0_24, %c0_25] : memref<8x256x512xbf16, #tpu.memory_space<vmem>>, vector<1x256x512xbf16>
    %46 = vector.shape_cast %45 : vector<1x256x512xbf16> to vector<256x512xbf16>
    %cst_26 = arith.constant dense<0.000000e+00> : vector<16x512xf32>
    %47 = tpu.matmul %44, %46, %cst_26 {dimension_numbers = #tpu.dot_dimension_numbers<[1], [0], [0], [1], [0, 0, 1, 1], [], []>} : vector<16x256xbf16>, vector<256x512xbf16>, vector<16x512xf32> -> vector<16x512xf32>
    %48 = arith.addf %42, %47 : vector<16x512xf32>
    %49 = vector.extract_strided_slice %7 {offsets = [0, 7, 0], sizes = [16, 1, 256], strides = [1, 1, 1]} : vector<16x8x256xbf16> to vector<16x1x256xbf16>
    %50 = vector.shape_cast %49 : vector<16x1x256xbf16> to vector<16x256xbf16>
    %c7 = arith.constant 7 : index
    %c0_27 = arith.constant 0 : index
    %c0_28 = arith.constant 0 : index
    %51 = vector.load %arg3[%c7, %c0_27, %c0_28] : memref<8x256x512xbf16, #tpu.memory_space<vmem>>, vector<1x256x512xbf16>
    %52 = vector.shape_cast %51 : vector<1x256x512xbf16> to vector<256x512xbf16>
    %cst_29 = arith.constant dense<0.000000e+00> : vector<16x512xf32>
    %53 = tpu.matmul %50, %52, %cst_29 {dimension_numbers = #tpu.dot_dimension_numbers<[1], [0], [0], [1], [0, 0, 1, 1], [], []>} : vector<16x256xbf16>, vector<256x512xbf16>, vector<16x512xf32> -> vector<16x512xf32>
    %54 = arith.addf %48, %53 : vector<16x512xf32>
    %c0_30 = arith.constant 0 : index
    %c0_31 = arith.constant 0 : index
    %55 = vector.load %arg4[%c0_30, %c0_31] : memref<1x512xf32, #tpu.memory_space<vmem>>, vector<1x512xf32>
    %56 = vector.broadcast %55 : vector<1x512xf32> to vector<16x512xf32>
    %57 = arith.addf %54, %56 : vector<16x512xf32>
    %cst_32 = arith.constant 0.000000e+00 : f32
    %58 = vector.broadcast %cst_32 : f32 to vector<16x512xf32>
    %59 = arith.maximumf %57, %58 : vector<16x512xf32>
    %60 = arith.truncf %59 : vector<16x512xf32> to vector<16x512xbf16>
    %c0_33 = arith.constant 0 : index
    %c0_34 = arith.constant 0 : index
    %61 = vector.load %arg5[%c0_33, %c0_34] : memref<512x256xbf16, #tpu.memory_space<vmem>>, vector<512x256xbf16>
    %cst_35 = arith.constant dense<0.000000e+00> : vector<16x256xf32>
    %62 = tpu.matmul %60, %61, %cst_35 {dimension_numbers = #tpu.dot_dimension_numbers<[1], [0], [0], [1], [0, 0, 1, 1], [], []>} : vector<16x512xbf16>, vector<512x256xbf16>, vector<16x256xf32> -> vector<16x256xf32>
    %c0_36 = arith.constant 0 : index
    %c0_37 = arith.constant 0 : index
    %63 = vector.load %arg6[%c0_36, %c0_37] : memref<1x256xf32, #tpu.memory_space<vmem>>, vector<1x256xf32>
    %64 = vector.broadcast %63 : vector<1x256xf32> to vector<16x256xf32>
    %65 = arith.addf %62, %64 : vector<16x256xf32>
    %cst_38 = arith.constant 0.000000e+00 : f32
    %66 = vector.broadcast %cst_38 : f32 to vector<16x256xf32>
    %67 = arith.maximumf %65, %66 : vector<16x256xf32>
    %68 = arith.truncf %67 : vector<16x256xf32> to vector<16x256xbf16>
    %c0_39 = arith.constant 0 : index
    %c0_40 = arith.constant 0 : index
    %69 = vector.load %arg7[%c0_39, %c0_40] : memref<256x128xbf16, #tpu.memory_space<vmem>>, vector<256x128xbf16>
    %cst_41 = arith.constant dense<0.000000e+00> : vector<16x128xf32>
    %70 = tpu.matmul %68, %69, %cst_41 {dimension_numbers = #tpu.dot_dimension_numbers<[1], [0], [0], [1], [0, 0, 1, 1], [], []>} : vector<16x256xbf16>, vector<256x128xbf16>, vector<16x128xf32> -> vector<16x128xf32>
    %c0_42 = arith.constant 0 : index
    %c0_43 = arith.constant 0 : index
    %71 = vector.load %arg8[%c0_42, %c0_43] : memref<1x128xf32, #tpu.memory_space<vmem>>, vector<1x128xf32>
    %72 = vector.broadcast %71 : vector<1x128xf32> to vector<16x128xf32>
    %73 = arith.addf %70, %72 : vector<16x128xf32>
    %c0_44 = arith.constant 0 : index
    %c0_45 = arith.constant 0 : index
    %74 = vector.load %arg9[%c0_44, %c0_45] : memref<16x128xf32, #tpu.memory_space<vmem>>, vector<16x128xf32>
    tpu.vector_store %arg9[%c0_44, %c0_45], %73 {strides = array<i32>} : memref<16x128xf32, #tpu.memory_space<vmem>>, vector<16x128xf32>,
    return
  }
  func.func @transform_0(%arg0: i32) -> (i32, i32, i32) {
    %c0_i32 = arith.constant 0 : i32
    %c0_i32_0 = arith.constant 0 : i32
    %c0_i32_1 = arith.constant 0 : i32
    return %arg0, %c0_i32, %c0_i32_0 : i32, i32, i32
  }
  func.func @transform_1(%arg0: i32) -> (i32, i32) {
    %c0_i32 = arith.constant 0 : i32
    %c0_i32_0 = arith.constant 0 : i32
    %c0_i32_1 = arith.constant 0 : i32
    return %c0_i32, %c0_i32_0 : i32, i32
  }
  func.func @transform_2(%arg0: i32) -> (i32, i32, i32) {
    %c0_i32 = arith.constant 0 : i32
    %c0_i32_0 = arith.constant 0 : i32
    %c0_i32_1 = arith.constant 0 : i32
    %c0_i32_2 = arith.constant 0 : i32
    return %c0_i32, %c0_i32_0, %c0_i32_1 : i32, i32, i32
  }
  func.func @transform_3(%arg0: i32) -> (i32, i32) {
    %c0_i32 = arith.constant 0 : i32
    %c0_i32_0 = arith.constant 0 : i32
    %c0_i32_1 = arith.constant 0 : i32
    return %c0_i32, %c0_i32_0 : i32, i32
  }
  func.func @transform_4(%arg0: i32) -> (i32, i32) {
    %c0_i32 = arith.constant 0 : i32
    %c0_i32_0 = arith.constant 0 : i32
    %c0_i32_1 = arith.constant 0 : i32
    return %c0_i32, %c0_i32_0 : i32, i32
  }
  func.func @transform_5(%arg0: i32) -> (i32, i32) {
    %c0_i32 = arith.constant 0 : i32
    %c0_i32_0 = arith.constant 0 : i32
    %c0_i32_1 = arith.constant 0 : i32
    return %c0_i32, %c0_i32_0 : i32, i32
  }
  func.func @transform_6(%arg0: i32) -> (i32, i32) {
    %c0_i32 = arith.constant 0 : i32
    %c0_i32_0 = arith.constant 0 : i32
    %c0_i32_1 = arith.constant 0 : i32
    return %c0_i32, %c0_i32_0 : i32, i32
  }
  func.func @transform_7(%arg0: i32) -> (i32, i32) {
    %c0_i32 = arith.constant 0 : i32
    %c0_i32_0 = arith.constant 0 : i32
    %c0_i32_1 = arith.constant 0 : i32
    return %c0_i32, %c0_i32_0 : i32, i32
  }
  func.func @transform_8(%arg0: i32) -> (i32, i32) {
    %c0_i32 = arith.constant 0 : i32
    %c0_i32_0 = arith.constant 0 : i32
    return %arg0, %c0_i32 : i32, i32
  }
}

</mosaic_0001>

<bundles_post_ra>
// kernel: _forward.1
= control target key start
LH: loop header
LB: loop body
LE: loop exit
PB: predicated region body
PF: predicated region fallthrough
CT: control target
= control target key end

     0   :  { %13 = vsyncpa [#allocation3], 0  ;;  %s9329_s0 = inlined_call_operand.vmem [shape: bf16[16,32,256], index: 0, kind: input, shape index: {}]   ;;  %s9330_s1 = inlined_call_operand.hbm [shape: bf16[8,32], index: 1, kind: input, shape index: {}]   ;;  %s9331_s2 = inlined_call_operand.hbm [shape: bf16[8,256,512], index: 2, kind: input, shape index: {}]   ;;  %s9332_s3 = inlined_call_operand.hbm [shape: f32[1,512], index: 3, kind: input, shape index: {}]   ;;  %s9333_s4 = inlined_call_operand.hbm [shape: bf16[512,256], index: 4, kind: input, shape index: {}]   ;;  %s9334_s5 = inlined_call_operand.hbm [shape: f32[1,256], index: 5, kind: input, shape index: {}]   ;;  %s9335_s6 = inlined_call_operand.hbm [shape: bf16[256,128], index: 6, kind: input, shape index: {}]   ;;  %s9336_s7 = inlined_call_operand.hbm [shape: f32[1,128], index: 7, kind: input, shape index: {}]   ;;  %s9337_s8 = inlined_call_operand.vmem [shape: f32[16,128], index: 8, kind: output, shape index: {}]  }
   0x1   :  { %14 = vsyncpa [#allocation5], 0 }
   0x2   :  { %15 = vsyncpa [#allocation8], 0 }
   0x3   :  { %16 = vsyncpa [#allocation11], 0  ;;  %s8219_s27 = smov [#allocation4]   ;;  %s8057_s9 = scalar_lea.hbm %s9331_s2, 65536 }
   0x4   :  { %s34_s28 = sshll.u32 %s8219_s27, 4  ;;  %p8058_p0 = scmp.ne.s32.totalorder %s9331_s2, %s8057_s9  ;;  %s35_s28 = int_to_ptr.vmem [resolvable:$true] %s34_s28 }
   0x5   :  { %p8061_p1 = scmp.lt.u32.totalorder %s8057_s9, %s9331_s2 }
   0x7   :  { %p8063_p2 = pnand %p8061_p1, %p8058_p0 }
   0x9   :  { %8066 = shalt.err (!%p8063_p2)
}
   0xa   :  { %s8067_s14 = scalar_lea.vmem %s35_s28, 65536  ;;  %p8072_p4 = scmp.lt.s32.totalorder %s35_s28, %s35_s28 }
   0xb   :  { %p8068_p3 = scmp.ne.s32.totalorder %s35_s28, %s8067_s14  ;;  %p8073_p5 = scmp.lt.s32.totalorder %s8067_s14, %s8067_s14 }
   0xd   :  { %p8074_p6 = por %p8073_p5, %p8072_p4 }
   0xf   :  { %p8075_p7 = pnand %p8074_p6, %p8068_p3 }
  0x11   :  { %8078 = shalt.err (!%p8075_p7)
}
  0x12   :  { %s8220_s15 = smov 256   ;;  %s8221_s16 = smov 16  }
  0x13   :  { %40 = dma.hbm_to_vmem [thread:$0]  %s9331_s2, 65536, %s35_s28, [#allocation5], %s8220_s15, %s8220_s15, %s8221_s16  }
  0x14   :  { %s8222_s19 = smov [#allocation7]   ;;  %s8079_s23 = scalar_lea.hbm %s9333_s4, 8192 }
  0x15   :  { %s56_s20 = sshll.u32 %s8222_s19, 4  ;;  %p8080_p8 = scmp.ne.s32.totalorder %s9333_s4, %s8079_s23  ;;  %s57_s20 = int_to_ptr.vmem [resolvable:$true] %s56_s20 }
  0x16   :  { %p8083_p9 = scmp.lt.u32.totalorder %s8079_s23, %s9333_s4 }
  0x18   :  { %p8085_p10 = pnand %p8083_p9, %p8080_p8 }
  0x1a   :  { %8088 = shalt.err (!%p8085_p10)
}
  0x1b   :  { %s8089_s29 = scalar_lea.vmem %s57_s20, 8192  ;;  %p8094_p12 = scmp.lt.s32.totalorder %s57_s20, %s57_s20 }
  0x1c   :  { %p8090_p11 = scmp.ne.s32.totalorder %s57_s20, %s8089_s29  ;;  %p8095_p13 = scmp.lt.s32.totalorder %s8089_s29, %s8089_s29 }
  0x1e   :  { %p8096_p0 = por %p8095_p13, %p8094_p12 }
  0x20   :  { %p8097_p1 = pnand %p8096_p0, %p8090_p11 }
  0x22   :  { %8100 = shalt.err (!%p8097_p1)
}
  0x23   :  { %s8223_s2 = smov 128   ;;  %s8224_s28 = smov 8  }
  0x24   :  { %62 = dma.hbm_to_vmem [thread:$0]  %s9333_s4, 8192, %s57_s20, [#allocation8], %s8223_s2, %s8223_s2, %s8224_s28  }
  0x25   :  { %s8225_s10 = smov [#allocation10]   ;;  %s8101_s14 = scalar_lea.hbm %s9335_s6, 2048 }
  0x26   :  { %s78_s11 = sshll.u32 %s8225_s10, 4  ;;  %p8102_p2 = scmp.ne.s32.totalorder %s9335_s6, %s8101_s14  ;;  %s79_s11 = int_to_ptr.vmem [resolvable:$true] %s78_s11 }
  0x27   :  { %p8105_p3 = scmp.lt.u32.totalorder %s8101_s14, %s9335_s6 }
  0x29   :  { %p8107_p4 = pnand %p8105_p3, %p8102_p2 }
  0x2b   :  { %8110 = shalt.err (!%p8107_p4)
}
  0x2c   :  { %s8111_s19 = scalar_lea.vmem %s79_s11, 2048  ;;  %p8116_p6 = scmp.lt.s32.totalorder %s79_s11, %s79_s11 }
  0x2d   :  { %p8112_p5 = scmp.ne.s32.totalorder %s79_s11, %s8111_s19  ;;  %p8117_p7 = scmp.lt.s32.totalorder %s8111_s19, %s8111_s19 }
  0x2f   :  { %p8118_p8 = por %p8117_p7, %p8116_p6 }
  0x31   :  { %p8119_p9 = pnand %p8118_p8, %p8112_p5 }
  0x33   :  { %8122 = shalt.err (!%p8119_p9)
}
  0x34   :  { %s8226_s4 = smov 64   ;;  %s8227_s20 = smov 4  }
  0x35   :  { %84 = dma.hbm_to_vmem [thread:$0]  %s9335_s6, 2048, %s79_s11, [#allocation11], %s8226_s4, %s8226_s4, %s8227_s20  }
  0x36   :  { %s8228_s23 = smov [#allocation2]   ;;  %s8229_s25 = smov [#allocation6]  }
  0x37   :  { %s25_s24 = sshll.u32 %s8228_s23, 4  ;;  %s47_s26 = sshll.u32 %s8229_s25, 4  ;;  %s26_s24 = int_to_ptr.vmem [resolvable:$true] %s25_s24  ;;  %s48_s26 = int_to_ptr.vmem [resolvable:$true] %s47_s26 }
  0x38   :  { %s8123_s2 = scalar_lea.hbm %s9330_s1, 64 }
  0x39   :  { %p8124_p10 = scmp.ne.s32.totalorder %s9330_s1, %s8123_s2  ;;  %p8127_p11 = scmp.lt.u32.totalorder %s8123_s2, %s9330_s1 }
  0x3b   :  { %p8129_p12 = pnand %p8127_p11, %p8124_p10 }
  0x3d   :  { %8132 = shalt.err (!%p8129_p12)
}
  0x3e   :  { %s8133_s6 = scalar_lea.vmem %s26_s24, 64  ;;  %p8138_p0 = scmp.lt.s32.totalorder %s26_s24, %s26_s24 }
  0x3f   :  { %p8134_p13 = scmp.ne.s32.totalorder %s26_s24, %s8133_s6  ;;  %p8139_p1 = scmp.lt.s32.totalorder %s8133_s6, %s8133_s6 }
  0x41   :  { %p8140_p2 = por %p8139_p1, %p8138_p0 }
  0x43   :  { %p8141_p3 = pnand %p8140_p2, %p8134_p13 }
  0x45   :  { %8144 = shalt.err (!%p8141_p3)
}
  0x46   :  { %28 = dma.hbm_to_vmem [thread:$0]  %s9330_s1, 64, %s26_s24, [#allocation3]  }
  0x47   :  { %s8145_s15 = scalar_lea.hbm %s9332_s3, 64 }
  0x48   :  { %p8146_p4 = scmp.ne.s32.totalorder %s9332_s3, %s8145_s15  ;;  %p8149_p5 = scmp.lt.u32.totalorder %s8145_s15, %s9332_s3 }
  0x4a   :  { %p8151_p6 = pnand %p8149_p5, %p8146_p4 }
  0x4c   :  { %8154 = shalt.err (!%p8151_p6)
}
  0x4d   :  { %s8155_s4 = scalar_lea.vmem %s48_s26, 64  ;;  %p8160_p8 = scmp.lt.s32.totalorder %s48_s26, %s48_s26 }
  0x4e   :  { %p8156_p7 = scmp.ne.s32.totalorder %s48_s26, %s8155_s4  ;;  %p8161_p9 = scmp.lt.s32.totalorder %s8155_s4, %s8155_s4 }
  0x50   :  { %p8162_p10 = por %p8161_p9, %p8160_p8 }
  0x52   :  { %p8163_p11 = pnand %p8162_p10, %p8156_p7 }
  0x54   :  { %8166 = shalt.err (!%p8163_p11)
}
  0x55   :  { %50 = dma.hbm_to_vmem [thread:$0]  %s9332_s3, 64, %s48_s26, [#allocation5]  }
  0x56   :  { %s8230_s21 = smov [#allocation9]   ;;  %s8231_s23 = smov [#allocation12]  }
  0x57   :  { %s69_s22 = sshll.u32 %s8230_s21, 4  ;;  %s91_s24 = sshll.u32 %s8231_s23, 4  ;;  %s70_s22 = int_to_ptr.vmem [resolvable:$true] %s69_s22  ;;  %s92_s24 = int_to_ptr.vmem [resolvable:$true] %s91_s24 }
  0x58   :  { %s8167_s29 = scalar_lea.hbm %s9334_s5, 32 }
  0x59   :  { %p8168_p12 = scmp.ne.s32.totalorder %s9334_s5, %s8167_s29  ;;  %p8171_p13 = scmp.lt.u32.totalorder %s8167_s29, %s9334_s5 }
  0x5b   :  { %p8173_p0 = pnand %p8171_p13, %p8168_p12 }
  0x5d   :  { %8176 = shalt.err (!%p8173_p0)
}
  0x5e   :  { %s8177_s3 = scalar_lea.vmem %s70_s22, 32  ;;  %p8182_p2 = scmp.lt.s32.totalorder %s70_s22, %s70_s22 }
  0x5f   :  { %p8178_p1 = scmp.ne.s32.totalorder %s70_s22, %s8177_s3  ;;  %p8183_p3 = scmp.lt.s32.totalorder %s8177_s3, %s8177_s3 }
  0x61   :  { %p8184_p4 = por %p8183_p3, %p8182_p2 }
  0x63   :  { %p8185_p5 = pnand %p8184_p4, %p8178_p1 }
  0x65   :  { %8188 = shalt.err (!%p8185_p5)
}
  0x66   :  { %72 = dma.hbm_to_vmem [thread:$0]  %s9334_s5, 32, %s70_s22, [#allocation8]  }
  0x67   :  { %s8189_s12 = scalar_lea.hbm %s9336_s7, 16 }
  0x68   :  { %p8190_p6 = scmp.ne.s32.totalorder %s9336_s7, %s8189_s12  ;;  %p8193_p7 = scmp.lt.u32.totalorder %s8189_s12, %s9336_s7 }
  0x6a   :  { %p8195_p8 = pnand %p8193_p7, %p8190_p6 }
  0x6c   :  { %8198 = shalt.err (!%p8195_p8)
}
  0x6d   :  { %s8199_s17 = scalar_lea.vmem %s92_s24, 16  ;;  %s8203_s18 = scalar_lea.vmem %s92_s24, 32 }
  0x6e   :  { %p8200_p9 = scmp.ne.s32.totalorder %s92_s24, %s8199_s17  ;;  %p8204_p10 = scmp.lt.s32.totalorder %s92_s24, %s92_s24 }
  0x6f   :  { %p8205_p11 = scmp.lt.s32.totalorder %s8203_s18, %s8199_s17 }
  0x71   :  { %p8206_p12 = por %p8205_p11, %p8204_p10 }
  0x73   :  { %p8207_p13 = pnand %p8206_p12, %p8200_p9 }
  0x75   :  { %8210 = shalt.err (!%p8207_p13)
}
  0x76   :  { %94 = dma.hbm_to_vmem [thread:$0]  %s9336_s7, 16, %s92_s24, [#allocation11]  }
  0x77   :  { %8211 = dma.done.wait [#allocation3], 64  }
  0x78   :  { %8212 = vsyncadd [#allocation3], 4294967232 }
  0x79   :  { %8213 = dma.done.wait [#allocation5], 65600  }
  0x7a   :  { %8214 = vsyncadd [#allocation5], 4294901696 }
  0x7b   :  { %8215 = dma.done.wait [#allocation8], 8224  }
  0x7c   :  { %8216 = vsyncadd [#allocation8], 4294959072 }
  0x7d   :  { %8217 = dma.done.wait [#allocation11], 2064  }
  0x7e   :  { %8218 = vsyncadd [#allocation11], 4294965232  ;;  %v8232_v0 = vmov 0   ;;  %v7081_v1 = vld [vmem:[%s9329_s0 + $0x4] ss:$8 sps:$4 sm:$0xff]   ;;  %vm202_vm0 = vcmask 261120  }
  0x7f   :  { %238 = vmatprep.mubr.bf16.mxu0 %v8232_v0  ;;  %543 = vmatprep.mubr.bf16.mxu1 %v8232_v0  ;;  %v7083_v2 = vld [vmem:[%s9329_s0] ss:$8 sps:$4 sm:$0xff]   ;;  %v7084_v3 = vld [vmem:[%s9329_s0 + $0x14] ss:$8 sps:$4 sm:$0xff]   ;;  %v7086_v4 = vld [vmem:[%s9329_s0 + $0x10] ss:$8 sps:$4 sm:$0xff]  }
  0x80   :  { %206 = vmatprep.subr.bf16.mxu0 %v7081_v1  ;;  %v7089_v5 = vld [vmem:[%s9329_s0 + $0x24] ss:$8 sps:$4 sm:$0xff]   ;;  %v8379_v6 = vld [vmem:[#allocation2] sm:$0xf]  ;;  %v7092_v8 = vld [vmem:[%s9329_s0 + $0x34] ss:$8 sps:$4 sm:$0xff]  }
  0x81   :  { %207 = vmatpush1.bf16.msra.mxu0 %v7083_v2  ;;  %v7087_v7 = vld [vmem:[%s9329_s0 + $0x20] ss:$8 sps:$4 sm:$0xff]   ;;  %v7090_v9 = vld [vmem:[%s9329_s0 + $0x30] ss:$8 sps:$4 sm:$0xff]   ;;  %v7095_v10 = vld [vmem:[%s9329_s0 + $0x44] ss:$8 sps:$4 sm:$0xff]  }
  0x82   :  { %208 = vmatprep.subr.bf16.mxu0 %v7084_v3  ;;  %v7105_v11 = vld [vmem:[%s9329_s0 + $0xa4] ss:$8 sps:$4 sm:$0xff]   ;;  %v7107_v12 = vld [vmem:[%s9329_s0 + $0xa0] ss:$8 sps:$4 sm:$0xff]   ;;  %v7111_v13 = vld [vmem:[%s9329_s0 + $0xb4] ss:$8 sps:$4 sm:$0xff]  }
  0x83   :  { %511 = vmatprep.subr.bf16.mxu1 %v7105_v11  ;;  %v7113_v14 = vld [vmem:[%s9329_s0 + $0xb0] ss:$8 sps:$4 sm:$0xff]   ;;  %v7093_v15 = vld [vmem:[%s9329_s0 + $0x40] ss:$8 sps:$4 sm:$0xff]   ;;  %v7098_v16 = vld [vmem:[%s9329_s0 + $0x54] ss:$8 sps:$4 sm:$0xff]  }
  0x84   :  { %512 = vmatpush1.bf16.msra.mxu1 %v7107_v12  ;;  %v7119_v17 = vld [vmem:[%s9329_s0 + $0xe4] ss:$8 sps:$4 sm:$0xff]   ;;  %v7096_v18 = vld [vmem:[%s9329_s0 + $0x50] ss:$8 sps:$4 sm:$0xff]   ;;  %v7117_v19 = vld [vmem:[%s9329_s0 + $0xe0] ss:$8 sps:$4 sm:$0xff]  }
  0x85   :  { %209 = vmatpush1.bf16.msra.mxu0 %v7086_v4  ;;  %513 = vmatprep.subr.bf16.mxu1 %v7111_v13  ;;  %v7101_v20 = vld [vmem:[%s9329_s0 + $0x64] ss:$8 sps:$4 sm:$0xff]   ;;  %v7125_v21 = vld [vmem:[%s9329_s0 + $0xf4] ss:$8 sps:$4 sm:$0xff]   ;;  %v7099_v22 = vld [vmem:[%s9329_s0 + $0x60] ss:$8 sps:$4 sm:$0xff]  }
  0x86   :  { %267 = vmatprep.subr.bf16.mxu0 %v7089_v5  ;;  %v7123_v23 = vld [vmem:[%s9329_s0 + $0xf0] ss:$8 sps:$4 sm:$0xff]   ;;  %v7104_v24 = vld [vmem:[%s9329_s0 + $0x74] ss:$8 sps:$4 sm:$0xff]   ;;  %v7131_v25 = vld [vmem:[%s9329_s0 + $0x124] ss:$8 sps:$4 sm:$0xff]  }
  0x87   :  { %v7102_v26 = vld [vmem:[%s9329_s0 + $0x70] ss:$8 sps:$4 sm:$0xff]   ;;  %v7129_v27 = vld [vmem:[%s9329_s0 + $0x120] ss:$8 sps:$4 sm:$0xff]   ;;  %v7137_v28 = vld [vmem:[%s9329_s0 + $0x134] ss:$8 sps:$4 sm:$0xff]  }
  0x88   :  { %6312 = vmatmul.mubr.msk.bf16.vlgmr.msra.gmra.mrb[0].mxu0 %vm202_vm0, %v8379_v6  ;;  %514 = vmatpush1.bf16.msra.mxu1 %v7113_v14  ;;  %v7110_v29 = vld [vmem:[%s9329_s0 + $0x84] ss:$8 sps:$4 sm:$0xff]   ;;  %v7108_v30 = vld [vmem:[%s9329_s0 + $0x80] ss:$8 sps:$4 sm:$0xff]   ;;  %v7135_v31 = vld [vmem:[%s9329_s0 + $0x130] ss:$8 sps:$4 sm:$0xff]  }
  0x89   :  { %268 = vmatpush1.bf16.msra.mxu0 %v7087_v7  ;;  %299 = vmatprep.mubr.bf16.mxu0 %v8232_v0  ;;  %v7116_v32 = vld [vmem:[%s9329_s0 + $0x94] ss:$8 sps:$4 sm:$0xff]   ;;  %v7143_v33 = vld [vmem:[%s9329_s0 + $0x164] ss:$8 sps:$4 sm:$0xff]   ;;  %v7114_v34 = vld [vmem:[%s9329_s0 + $0x90] ss:$8 sps:$4 sm:$0xff]  }
  0x8a   :  { %269 = vmatprep.subr.bf16.mxu0 %v7092_v8  ;;  %633 = vmatprep.subr.bf16.mxu1 %v7119_v17  ;;  %v7141_v35 = vld [vmem:[%s9329_s0 + $0x160] ss:$8 sps:$4 sm:$0xff]   ;;  %v7149_v36 = vld [vmem:[%s9329_s0 + $0x174] ss:$8 sps:$4 sm:$0xff]   ;;  %v7122_v37 = vld [vmem:[%s9329_s0 + $0xc4] ss:$8 sps:$4 sm:$0xff]  }
  0x8b   :  { %6337 = vmatmul.mubr.msk.bf16.vlgmr.msra.gmra.mrb[0].mxu1 %vm202_vm0, %v8379_v6  ;;  %v7120_v38 = vld [vmem:[%s9329_s0 + $0xc0] ss:$8 sps:$4 sm:$0xff]   ;;  %v7147_v39 = vld [vmem:[%s9329_s0 + $0x170] ss:$8 sps:$4 sm:$0xff]   ;;  %v7128_v40 = vld [vmem:[%s9329_s0 + $0xd4] ss:$8 sps:$4 sm:$0xff]  }
  0x8c   :  { %634 = vmatpush1.bf16.msra.mxu1 %v7117_v19  ;;  %665 = vmatprep.mubr.bf16.mxu1 %v8232_v0  ;;  %v7155_v41 = vld [vmem:[%s9329_s0 + $0x1a4] ss:$8 sps:$4 sm:$0xff]   ;;  %v7126_v42 = vld [vmem:[%s9329_s0 + $0xd0] ss:$8 sps:$4 sm:$0xff]   ;;  %v7153_v44 = vld [vmem:[%s9329_s0 + $0x1a0] ss:$8 sps:$4 sm:$0xff]  }
  0x8d   :  { %270 = vmatpush1.bf16.msra.mxu0 %v7090_v9  ;;  %635 = vmatprep.subr.bf16.mxu1 %v7125_v21  ;;  %v7134_v43 = vld [vmem:[%s9329_s0 + $0x104] ss:$8 sps:$4 sm:$0xff]   ;;  %v7161_v45 = vld [vmem:[%s9329_s0 + $0x1b4] ss:$8 sps:$4 sm:$0xff]   ;;  %v7159_v46 = vld [vmem:[%s9329_s0 + $0x1b0] ss:$8 sps:$4 sm:$0xff]  }
  0x8e   :  { %328 = vmatprep.subr.bf16.mxu0 %v7095_v10  ;;  %v7132_v47 = vld [vmem:[%s9329_s0 + $0x100] ss:$8 sps:$4 sm:$0xff]   ;;  %v7140_v48 = vld [vmem:[%s9329_s0 + $0x114] ss:$8 sps:$4 sm:$0xff]   ;;  %v7167_v49 = vld [vmem:[%s9329_s0 + $0x1e4] ss:$8 sps:$4 sm:$0xff]  }
  0x8f   :  { %v7165_v50 = vld [vmem:[%s9329_s0 + $0x1e0] ss:$8 sps:$4 sm:$0xff]   ;;  %v7138_v51 = vld [vmem:[%s9329_s0 + $0x110] ss:$8 sps:$4 sm:$0xff]   ;;  %v7173_v52 = vld [vmem:[%s9329_s0 + $0x1f4] ss:$8 sps:$4 sm:$0xff]  }
  0x90   :  { %6317 = vmatmul.mubr.msk.bf16.vlgmr.msra.gmra.mrb[4].mxu0 %vm202_vm0, %v8379_v6  ;;  %636 = vmatpush1.bf16.msra.mxu1 %v7123_v23  ;;  %v7146_v53 = vld [vmem:[%s9329_s0 + $0x144] ss:$8 sps:$4 sm:$0xff]   ;;  %v7171_v54 = vld [vmem:[%s9329_s0 + $0x1f0] ss:$8 sps:$4 sm:$0xff]   ;;  %v7144_v55 = vld [vmem:[%s9329_s0 + $0x140] ss:$8 sps:$4 sm:$0xff]  }
  0x91   :  { %329 = vmatpush1.bf16.msra.mxu0 %v7093_v15  ;;  %360 = vmatprep.mubr.bf16.mxu0 %v8232_v0  ;;  %v7152_v56 = vld [vmem:[%s9329_s0 + $0x154] ss:$8 sps:$4 sm:$0xff]   ;;  %v7150_v57 = vld [vmem:[%s9329_s0 + $0x150] ss:$8 sps:$4 sm:$0xff]   ;;  %v7158_v58 = vld [vmem:[%s9329_s0 + $0x184] ss:$8 sps:$4 sm:$0xff]  }
  0x92   :  { %330 = vmatprep.subr.bf16.mxu0 %v7098_v16  ;;  %755 = vmatprep.subr.bf16.mxu1 %v7131_v25  ;;  %v7156_v59 = vld [vmem:[%s9329_s0 + $0x180] ss:$8 sps:$4 sm:$0xff]   ;;  %v7164_v60 = vld [vmem:[%s9329_s0 + $0x194] ss:$8 sps:$4 sm:$0xff]   ;;  %v7162_v61 = vld [vmem:[%s9329_s0 + $0x190] ss:$8 sps:$4 sm:$0xff]  }
  0x93   :  { %6347 = vmatmul.mubr.msk.bf16.vlgmr.msra.gmra.mrb[4].mxu1 %vm202_vm0, %v8379_v6  ;;  %v7170_v62 = vld [vmem:[%s9329_s0 + $0x1c4] ss:$8 sps:$4 sm:$0xff]   ;;  %v7168_v63 = vld [vmem:[%s9329_s0 + $0x1c0] ss:$8 sps:$4 sm:$0xff]   ;;  %v7176_v1 = vld [vmem:[%s9329_s0 + $0x1d4] ss:$8 sps:$4 sm:$0xff]  }
  0x94   :  { %756 = vmatpush1.bf16.msra.mxu1 %v7129_v27  ;;  %787 = vmatprep.mubr.bf16.mxu1 %v8232_v0  ;;  %v7174_v2 = vld [vmem:[%s9329_s0 + $0x1d0] ss:$8 sps:$4 sm:$0xff]   ;;  %v7177_v5 = vld [vmem:[#allocation4 + $0x200] ss:$16 sps:$4 sm:$0xff]   ;;  %vm1420_vm1 = vcmask 1041409   ;;  %vm1423_vm2 = vcmask 1042434  }
  0x95   :  { %331 = vmatpush1.bf16.msra.mxu0 %v7096_v18  ;;  %757 = vmatprep.subr.bf16.mxu1 %v7137_v28  ;;  %v7179_v3 = vld [vmem:[#allocation4 + $0x204] ss:$16 sps:$4 sm:$0xff]   ;;  %v7180_v7 = vld [vmem:[#allocation4] ss:$16 sps:$4 sm:$0xff]   ;;  %vm1426_vm3 = vcmask 1043459   ;;  %vm1429_vm4 = vcmask 1044484  }
  0x96   :  { %389 = vmatprep.subr.bf16.mxu0 %v7101_v20  ;;  %v7182_v4 = vld [vmem:[#allocation4 + $0x4] ss:$16 sps:$4 sm:$0xff]   ;;  %v7183_v10 = vld [vmem:[#allocation4 + $0x220] ss:$16 sps:$4 sm:$0xff]   ;;  %vm1432_vm5 = vcmask 1045509   ;;  %vm1435_vm6 = vcmask 1046534  }
  0x97   :  { %v7185_v8 = vld [vmem:[#allocation4 + $0x224] ss:$16 sps:$4 sm:$0xff]   ;;  %v7186_v11 = vld [vmem:[#allocation4 + $0x20] ss:$16 sps:$4 sm:$0xff]   ;;  %vm1438_vm7 = vcmask 1047559  }
  0x98   :  { %6322 = vmatmul.mubr.msk.bf16.vlgmr.msra.gmra.mrb[8].mxu0 %vm202_vm0, %v8379_v6  ;;  %758 = vmatpush1.bf16.msra.mxu1 %v7135_v31  ;;  %v7188_v9 = vld [vmem:[#allocation4 + $0x24] ss:$16 sps:$4 sm:$0xff]   ;;  %v7189_v13 = vld [vmem:[#allocation4 + $0x240] ss:$16 sps:$4 sm:$0xff]  }
  0x99   :  { %390 = vmatpush1.bf16.msra.mxu0 %v7099_v22  ;;  %421 = vmatprep.mubr.bf16.mxu0 %v8232_v0  ;;  %v7194_v12 = vld [vmem:[#allocation4 + $0x44] ss:$16 sps:$4 sm:$0xff]   ;;  %v7195_v16 = vld [vmem:[#allocation4 + $0x260] ss:$16 sps:$4 sm:$0xff]  }
  0x9a   :  { %391 = vmatprep.subr.bf16.mxu0 %v7104_v24  ;;  %877 = vmatprep.subr.bf16.mxu1 %v7143_v33  ;;  %v7197_v14 = vld [vmem:[#allocation4 + $0x264] ss:$16 sps:$4 sm:$0xff]   ;;  %v7198_v17 = vld [vmem:[#allocation4 + $0x60] ss:$16 sps:$4 sm:$0xff]  }
  0x9b   :  { %6357 = vmatmul.mubr.msk.bf16.vlgmr.msra.gmra.mrb[8].mxu1 %vm202_vm0, %v8379_v6  ;;  %v7200_v15 = vld [vmem:[#allocation4 + $0x64] ss:$16 sps:$4 sm:$0xff]   ;;  %v7201_v20 = vld [vmem:[#allocation4 + $0x280] ss:$16 sps:$4 sm:$0xff]  }
  0x9c   :  { %878 = vmatpush1.bf16.msra.mxu1 %v7141_v35  ;;  %909 = vmatprep.mubr.bf16.mxu1 %v8232_v0  ;;  %v7203_v18 = vld [vmem:[#allocation4 + $0x284] ss:$16 sps:$4 sm:$0xff]   ;;  %v7204_v21 = vld [vmem:[#allocation4 + $0x80] ss:$16 sps:$4 sm:$0xff]  }
  0x9d   :  { %392 = vmatpush1.bf16.msra.mxu0 %v7102_v26  ;;  %879 = vmatprep.subr.bf16.mxu1 %v7149_v36  ;;  %v7206_v19 = vld [vmem:[#allocation4 + $0x84] ss:$16 sps:$4 sm:$0xff]   ;;  %v7207_v24 = vld [vmem:[#allocation4 + $0x2a0] ss:$16 sps:$4 sm:$0xff]  }
  0x9e   :  { %450 = vmatprep.subr.bf16.mxu0 %v7110_v29  ;;  %v7209_v22 = vld [vmem:[#allocation4 + $0x2a4] ss:$16 sps:$4 sm:$0xff]   ;;  %v7210_v25 = vld [vmem:[#allocation4 + $0xa0] ss:$16 sps:$4 sm:$0xff]  }
  0x9f   :  { %v7212_v23 = vld [vmem:[#allocation4 + $0xa4] ss:$16 sps:$4 sm:$0xff]   ;;  %v7213_v28 = vld [vmem:[#allocation4 + $0x2c0] ss:$16 sps:$4 sm:$0xff]  }
  0xa0   :  { %6327 = vmatmul.mubr.msk.bf16.vlgmr.msra.gmra.mrb[12].mxu0 %vm202_vm0, %v8379_v6  ;;  %880 = vmatpush1.bf16.msra.mxu1 %v7147_v39  ;;  %v7215_v26 = vld [vmem:[#allocation4 + $0x2c4] ss:$16 sps:$4 sm:$0xff]   ;;  %v7216_v29 = vld [vmem:[#allocation4 + $0xc0] ss:$16 sps:$4 sm:$0xff]  }
  0xa1   :  { %451 = vmatpush1.bf16.msra.mxu0 %v7108_v30  ;;  %482 = vmatprep.mubr.bf16.mxu0 %v8232_v0  ;;  %v7218_v27 = vld [vmem:[#allocation4 + $0xc4] ss:$16 sps:$4 sm:$0xff]   ;;  %v7222_v33 = vld [vmem:[#allocation4 + $0xe0] ss:$16 sps:$4 sm:$0xff]  }
  0xa2   :  { %452 = vmatprep.subr.bf16.mxu0 %v7116_v32  ;;  %999 = vmatprep.subr.bf16.mxu1 %v7155_v41  ;;  %v7221_v30 = vld [vmem:[#allocation4 + $0x2e4] ss:$16 sps:$4 sm:$0xff]   ;;  %v7219_v32 = vld [vmem:[#allocation4 + $0x2e0] ss:$16 sps:$4 sm:$0xff]  }
  0xa3   :  { %6367 = vmatmul.mubr.msk.bf16.vlgmr.msra.gmra.mrb[12].mxu1 %vm202_vm0, %v8379_v6  ;;  %v7224_v31 = vld [vmem:[#allocation4 + $0xe4] ss:$16 sps:$4 sm:$0xff]   ;;  %v7225_v36 = vld [vmem:[#allocation4 + $0x300] ss:$16 sps:$4 sm:$0xff]  }
  0xa4   :  { %1000 = vmatpush1.bf16.msra.mxu1 %v7153_v44  ;;  %1031 = vmatprep.mubr.bf16.mxu1 %v8232_v0  ;;  %v7230_v35 = vld [vmem:[#allocation4 + $0x104] ss:$16 sps:$4 sm:$0xff]   ;;  %v7234_v41 = vld [vmem:[#allocation4 + $0x120] ss:$16 sps:$4 sm:$0xff]  }
  0xa5   :  { %453 = vmatpush1.bf16.msra.mxu0 %v7114_v34  ;;  %1001 = vmatprep.subr.bf16.mxu1 %v7161_v45  ;;  %v7227_v34 = vld [vmem:[#allocation4 + $0x304] ss:$16 sps:$4 sm:$0xff]   ;;  %v7237_v44 = vld [vmem:[#allocation4 + $0x340] ss:$16 sps:$4 sm:$0xff]  }
  0xa6   :  { %572 = vmatprep.subr.bf16.mxu0 %v7122_v37  ;;  %v7228_v37 = vld [vmem:[#allocation4 + $0x100] ss:$16 sps:$4 sm:$0xff]   ;;  %v7236_v39 = vld [vmem:[#allocation4 + $0x124] ss:$16 sps:$4 sm:$0xff]  }
  0xa7   :  { %v7240_v45 = vld [vmem:[#allocation4 + $0x140] ss:$16 sps:$4 sm:$0xff]  }
  0xa8   :  { %6332 = vmatmul.mubr.msk.bf16.vlgmr.msra.gmra.mrb[16].mxu0 %vm202_vm0, %v8379_v6  ;;  %1002 = vmatpush1.bf16.msra.mxu1 %v7159_v46  ;;  %v7245_v46 = vld [vmem:[#allocation4 + $0x364] ss:$16 sps:$4 sm:$0xff]  }
  0xa9   :  { %573 = vmatpush1.bf16.msra.mxu0 %v7120_v38  ;;  %604 = vmatprep.mubr.bf16.mxu0 %v8232_v0  ;;  %v7233_v38 = vld [vmem:[#allocation4 + $0x324] ss:$16 sps:$4 sm:$0xff]  }
  0xaa   :  { %574 = vmatprep.subr.bf16.mxu0 %v7128_v40  ;;  %1121 = vmatprep.subr.bf16.mxu1 %v7167_v49  ;;  %v7231_v40 = vld [vmem:[#allocation4 + $0x320] ss:$16 sps:$4 sm:$0xff]  }
  0xab   :  { %6377 = vmatmul.mubr.msk.bf16.vlgmr.msra.gmra.mrb[16].mxu1 %vm202_vm0, %v8379_v6  ;;  %v7246_v49 = vld [vmem:[#allocation4 + $0x160] ss:$16 sps:$4 sm:$0xff]  }
  0xac   :  { %1122 = vmatpush1.bf16.msra.mxu1 %v7165_v50  ;;  %1153 = vmatprep.mubr.bf16.mxu1 %v8232_v0  ;;  %v7251_v50 = vld [vmem:[#allocation4 + $0x384] ss:$16 sps:$4 sm:$0xff]  }
  0xad   :  { %575 = vmatpush1.bf16.msra.mxu0 %v7126_v42  ;;  %1123 = vmatprep.subr.bf16.mxu1 %v7173_v52  ;;  %v7239_v42 = vld [vmem:[#allocation4 + $0x344] ss:$16 sps:$4 sm:$0xff]   ;;  %v7249_v52 = vld [vmem:[#allocation4 + $0x380] ss:$16 sps:$4 sm:$0xff]  }
  0xae   :  { %694 = vmatprep.subr.bf16.mxu0 %v7134_v43  ;;  %v7242_v43 = vld [vmem:[#allocation4 + $0x144] ss:$16 sps:$4 sm:$0xff]  }
  0xb0   :  { %6342 = vmatmul.mubr.msk.bf16.vlgmr.msra.gmra.mrb[20].mxu0 %vm202_vm0, %v8379_v6  ;;  %1124 = vmatpush1.bf16.msra.mxu1 %v7171_v54  ;;  %v7257_v54 = vld [vmem:[#allocation4 + $0x3a4] ss:$16 sps:$4 sm:$0xff]  }
  0xb1   :  { %695 = vmatpush1.bf16.msra.mxu0 %v7132_v47  ;;  %726 = vmatprep.mubr.bf16.mxu0 %v8232_v0  ;;  %v7248_v47 = vld [vmem:[#allocation4 + $0x164] ss:$16 sps:$4 sm:$0xff]  }
  0xb2   :  { %696 = vmatprep.subr.bf16.mxu0 %v7140_v48  ;;  %1806 = vmatprep.subr.bf16.mxu1 %v7179_v3  ;;  %v7243_v48 = vld [vmem:[#allocation4 + $0x360] ss:$16 sps:$4 sm:$0xff]   ;;  %v7275_v3 = vld [vmem:[#allocation4 + $0x20c] ss:$16 sps:$4 sm:$0xff]  }
  0xb3   :  { %6387 = vmatmul.mubr.msk.bf16.vlgmr.msra.gmra.mrb[20].mxu1 %vm202_vm0, %v8379_v6 }
  0xb4   :  { %1807 = vmatpush1.bf16.msra.mxu1 %v7177_v5 }
  0xb5   :  { %697 = vmatpush1.bf16.msra.mxu0 %v7138_v51  ;;  %1808 = vmatprep.subr.bf16.mxu1 %v7185_v8  ;;  %v7254_v51 = vld [vmem:[#allocation4 + $0x184] ss:$16 sps:$4 sm:$0xff]  }
  0xb6   :  { %816 = vmatprep.subr.bf16.mxu0 %v7146_v53  ;;  %v7252_v53 = vld [vmem:[#allocation4 + $0x180] ss:$16 sps:$4 sm:$0xff]  }
  0xb8   :  { %6352 = vmatmul.mubr.msk.bf16.vlgmr.msra.gmra.mrb[24].mxu0 %vm202_vm0, %v8379_v6  ;;  %1809 = vmatpush1.bf16.msra.mxu1 %v7183_v10 }
  0xb9   :  { %817 = vmatpush1.bf16.msra.mxu0 %v7144_v55  ;;  %848 = vmatprep.mubr.bf16.mxu0 %v8232_v0  ;;  %v7260_v55 = vld [vmem:[#allocation4 + $0x1a4] ss:$16 sps:$4 sm:$0xff]  }
  0xba   :  { %818 = vmatprep.subr.bf16.mxu0 %v7152_v56  ;;  %v7255_v56 = vld [vmem:[#allocation4 + $0x3a0] ss:$16 sps:$4 sm:$0xff]  }
  0xbd   :  { %819 = vmatpush1.bf16.msra.mxu0 %v7150_v57  ;;  %v7258_v57 = vld [vmem:[#allocation4 + $0x1a0] ss:$16 sps:$4 sm:$0xff]  }
  0xbe   :  { %938 = vmatprep.subr.bf16.mxu0 %v7158_v58  ;;  %v7263_v58 = vld [vmem:[#allocation4 + $0x3c4] ss:$16 sps:$4 sm:$0xff]  }
  0xc0   :  { %6362 = vmatmul.mubr.msk.bf16.vlgmr.msra.gmra.mrb[28].mxu0 %vm202_vm0, %v8379_v6 }
  0xc1   :  { %939 = vmatpush1.bf16.msra.mxu0 %v7156_v59  ;;  %970 = vmatprep.mubr.bf16.mxu0 %v8232_v0  ;;  %v7266_v59 = vld [vmem:[#allocation4 + $0x1c4] ss:$16 sps:$4 sm:$0xff]  }
  0xc2   :  { %940 = vmatprep.subr.bf16.mxu0 %v7164_v60  ;;  %v7261_v60 = vld [vmem:[#allocation4 + $0x3c0] ss:$16 sps:$4 sm:$0xff]  }
  0xc5   :  { %941 = vmatpush1.bf16.msra.mxu0 %v7162_v61  ;;  %v7264_v61 = vld [vmem:[#allocation4 + $0x1c0] ss:$16 sps:$4 sm:$0xff]  }
  0xc6   :  { %1060 = vmatprep.subr.bf16.mxu0 %v7170_v62  ;;  %v7267_v62 = vld [vmem:[#allocation4 + $0x3e0] ss:$16 sps:$4 sm:$0xff]  }
  0xc8   :  { %6372 = vmatmul.mubr.msk.bf16.vlgmr.msra.gmra.mrb[32].mxu0 %vm202_vm0, %v8379_v6 }
  0xc9   :  { %1061 = vmatpush1.bf16.msra.mxu0 %v7168_v63  ;;  %1092 = vmatprep.mubr.bf16.mxu0 %v8232_v0  ;;  %v7191_v0 = vld [vmem:[#allocation4 + $0x244] ss:$16 sps:$4 sm:$0xff]  }
  0xca   :  { %1062 = vmatprep.subr.bf16.mxu0 %v7176_v1  ;;  %1810 = vmatprep.subr.bf16.mxu1 %v7191_v0  ;;  %v7269_v63 = vld [vmem:[#allocation4 + $0x3e4] ss:$16 sps:$4 sm:$0xff]   ;;  %v7270_v1 = vld [vmem:[#allocation4 + $0x1e0] ss:$16 sps:$4 sm:$0xff]  }
  0xcb   :  { %1811 = vmatpush1.bf16.msra.mxu1 %v7189_v13 }
  0xcc   :  { %1812 = vmatprep.subr.bf16.mxu1 %v7197_v14 }
  0xcd   :  { %1063 = vmatpush1.bf16.msra.mxu0 %v7174_v2  ;;  %v7272_v2 = vld [vmem:[#allocation4 + $0x1e4] ss:$16 sps:$4 sm:$0xff]  }
  0xce   :  { %2272 = vmatprep.subr.bf16.mxu0 %v7182_v4  ;;  %v7278_v4 = vld [vmem:[#allocation4 + $0x404] ss:$16 sps:$4 sm:$0xff]  }
  0xcf   :  { %1813 = vmatpush1.bf16.msra.mxu1 %v7195_v16 }
  0xd0   :  { %6382 = vmatmul.mubr.msk.bf16.vlgmr.msra.gmra.mrb[36].mxu0 %vm202_vm0, %v8379_v6  ;;  %v7192_v6 = vld [vmem:[#allocation4 + $0x40] ss:$16 sps:$4 sm:$0xff]   ;;  %1814 = vmatprep.subr.bf16.mxu1 %v7203_v18 }
  0xd1   :  { %2273 = vmatpush1.bf16.msra.mxu0 %v7180_v7 }
  0xd2   :  { %2274 = vmatprep.subr.bf16.mxu0 %v7188_v9 }
  0xd3   :  { %1815 = vmatpush1.bf16.msra.mxu1 %v7201_v20 }
  0xd4   :  { %1816 = vmatprep.subr.bf16.mxu1 %v7209_v22 }
  0xd5   :  { %2275 = vmatpush1.bf16.msra.mxu0 %v7186_v11 }
  0xd6   :  { %2276 = vmatprep.subr.bf16.mxu0 %v7194_v12 }
  0xd7   :  { %1817 = vmatpush1.bf16.msra.mxu1 %v7207_v24 }
  0xd8   :  { %1818 = vmatprep.subr.bf16.mxu1 %v7215_v26 }
  0xd9   :  { %2277 = vmatpush1.bf16.msra.mxu0 %v7192_v6 }
  0xda   :  { %2278 = vmatprep.subr.bf16.mxu0 %v7200_v15 }
  0xdb   :  { %1819 = vmatpush1.bf16.msra.mxu1 %v7213_v28 }
  0xdc   :  { %1820 = vmatprep.subr.bf16.mxu1 %v7221_v30 }
  0xdd   :  { %2279 = vmatpush1.bf16.msra.mxu0 %v7198_v17 }
  0xde   :  { %2280 = vmatprep.subr.bf16.mxu0 %v7206_v19 }
  0xdf   :  { %1821 = vmatpush1.bf16.msra.mxu1 %v7219_v32 }
  0xe0   :  { %1822 = vmatprep.subr.bf16.mxu1 %v7227_v34 }
  0xe1   :  { %2281 = vmatpush1.bf16.msra.mxu0 %v7204_v21 }
  0xe2   :  { %2282 = vmatprep.subr.bf16.mxu0 %v7212_v23 }
  0xe3   :  { %1823 = vmatpush1.bf16.msra.mxu1 %v7225_v36 }
  0xe4   :  { %1824 = vmatprep.subr.bf16.mxu1 %v7233_v38 }
  0xe5   :  { %2283 = vmatpush1.bf16.msra.mxu0 %v7210_v25 }
  0xe6   :  { %2284 = vmatprep.subr.bf16.mxu0 %v7218_v27 }
  0xe7   :  { %1825 = vmatpush1.bf16.msra.mxu1 %v7231_v40 }
  0xe8   :  { %1826 = vmatprep.subr.bf16.mxu1 %v7239_v42 }
  0xe9   :  { %2285 = vmatpush1.bf16.msra.mxu0 %v7216_v29 }
  0xea   :  { %2286 = vmatprep.subr.bf16.mxu0 %v7224_v31 }
  0xeb   :  { %1827 = vmatpush1.bf16.msra.mxu1 %v7237_v44 }
  0xec   :  { %1828 = vmatprep.subr.bf16.mxu1 %v7245_v46 }
  0xed   :  { %2287 = vmatpush1.bf16.msra.mxu0 %v7222_v33 }
  0xee   :  { %2288 = vmatprep.subr.bf16.mxu0 %v7230_v35 }
  0xef   :  { %1829 = vmatpush1.bf16.msra.mxu1 %v7243_v48 }
  0xf0   :  { %1830 = vmatprep.subr.bf16.mxu1 %v7251_v50 }
  0xf1   :  { %2289 = vmatpush1.bf16.msra.mxu0 %v7228_v37 }
  0xf2   :  { %2290 = vmatprep.subr.bf16.mxu0 %v7236_v39 }
  0xf3   :  { %1831 = vmatpush1.bf16.msra.mxu1 %v7249_v52 }
  0xf4   :  { %1832 = vmatprep.subr.bf16.mxu1 %v7257_v54 }
  0xf5   :  { %2291 = vmatpush1.bf16.msra.mxu0 %v7234_v41 }
  0xf6   :  { %2292 = vmatprep.subr.bf16.mxu0 %v7242_v43 }
  0xf7   :  { %1833 = vmatpush1.bf16.msra.mxu1 %v7255_v56 }
  0xf8   :  { %1834 = vmatprep.subr.bf16.mxu1 %v7263_v58 }
  0xf9   :  { %2293 = vmatpush1.bf16.msra.mxu0 %v7240_v45 }
  0xfa   :  { %2294 = vmatprep.subr.bf16.mxu0 %v7248_v47 }
  0xfb   :  { %1835 = vmatpush1.bf16.msra.mxu1 %v7261_v60 }
  0xfc   :  { %1836 = vmatprep.subr.bf16.mxu1 %v7269_v63 }
  0xfd   :  { %2295 = vmatpush1.bf16.msra.mxu0 %v7246_v49 }
  0xfe   :  { %2296 = vmatprep.subr.bf16.mxu0 %v7254_v51 }
  0xff   :  { %1837 = vmatpush1.bf16.msra.mxu1 %v7267_v62 }
 0x100   :  { %1849 = vmatprep.subr.bf16.mxu1 %v7275_v3 }
 0x101   :  { %2297 = vmatpush1.bf16.msra.mxu0 %v7252_v53 }
 0x102   :  { %2298 = vmatprep.subr.bf16.mxu0 %v7260_v55 }
 0x105   :  { %2299 = vmatpush1.bf16.msra.mxu0 %v7258_v57 }
 0x106   :  { %2300 = vmatprep.subr.bf16.mxu0 %v7266_v59 }
 0x109   :  { %2301 = vmatpush1.bf16.msra.mxu0 %v7264_v61 }
 0x10a   :  { %2302 = vmatprep.subr.bf16.mxu0 %v7272_v2 }
 0x10d   :  { %2303 = vmatpush1.bf16.msra.mxu0 %v7270_v1 }
 0x10e   :  { %2803 = vmatprep.subr.bf16.mxu0 %v7278_v4 }
 0x15b   :  { %v240_v5 = vpop.f32.mrb[0].mxu0 }
 0x15c   :  { %v242_v7 = vpop.f32.mrb[1].mxu0  ;;  %v1162_v6 = vmax.f32 %v240_v5, 0.0 }
 0x15d   :  { %v244_v8 = vpop.f32.mrb[2].mxu0  ;;  %v1163_v16 = vmax.f32 %v242_v7, 0.0 }
 0x15e   :  { %v245_v9 = vpop.f32.mrb[3].mxu0  ;;  %v545_v13 = vpop.f32.mrb[0].mxu1  ;;  %v1194_v20 = vpack.c.bf16 %v1162_v6, %v1162_v6 }
 0x15f   :  { %v547_v15 = vpop.f32.mrb[1].mxu1  ;;  %v1195_v23 = vpack.c.bf16 %v1163_v16, %v1163_v16  ;;  %v1172_v30 = vmax.f32 %v545_v13, 0.0 }
 0x160   :  { %v549_v18 = vpop.f32.mrb[2].mxu1  ;;  %v1173_v27 = vmax.f32 %v547_v15, 0.0  ;;  %v8604_v32 = vunpack.c.l.b16 %v1194_v20 }
 0x161   :  { %v550_v19 = vpop.f32.mrb[3].mxu1  ;;  %v8608_v36 = vunpack.c.l.b16 %v1195_v23  ;;  %v1204_v42 = vpack.c.bf16 %v1172_v30, %v1172_v30 }
 0x162   :  { %v1205_v39 = vpack.c.bf16 %v1173_v27, %v1173_v27  ;;  %v1419_v45 = vrot.slane %v8604_v32, 1 }
 0x163   :  { %v301_v10 = vpop.f32.mrb[4].mxu0  ;;  %v1440_v49 = vrot.slane %v8608_v36, 1  ;;  %v2437_v51 = vrot.slane %v8608_v36, 2  ;;  %v2976_v56 = vrot.slane %v8608_v36, 3  ;;  %v8623_v61 = vunpack.c.l.b16 %v1204_v42 }
 0x164   :  { %v303_v11 = vpop.f32.mrb[5].mxu0  ;;  %v1164_v14 = vmax.f32 %v301_v10, 0.0  ;;  %v8617_v53 = vunpack.c.l.b16 %v1205_v39 }
 0x165   :  { %v305_v0 = vpop.f32.mrb[6].mxu0  ;;  %v1165_v17 = vmax.f32 %v303_v11, 0.0  ;;  %v1431_v9 = vrot.slane %v8623_v61, 4  ;;  %v1900_v10 = vrot.slane %v8623_v61, 3 }
 0x166   :  { %v306_v12 = vpop.f32.mrb[7].mxu0  ;;  %v1196_v21 = vpack.c.bf16 %v1164_v14, %v1164_v14  ;;  %v667_v31 = vpop.f32.mrb[4].mxu1  ;;  %v1914_v13 = vrot.slane %v8617_v53, 3 }
 0x167   :  { %v1197_v24 = vpack.c.bf16 %v1165_v17, %v1165_v17  ;;  %v669_v35 = vpop.f32.mrb[5].mxu1  ;;  %v1176_v54 = vmax.f32 %v667_v31, 0.0  ;;  %v1448_v12 = vrot.slane %v8617_v53, 4 }
 0x168   :  { %v8606_v33 = vunpack.c.l.b16 %v1196_v21  ;;  %v671_v38 = vpop.f32.mrb[6].mxu1  ;;  %v1177_v48 = vmax.f32 %v669_v35, 0.0  ;;  %v2445_v21 = vrot.slane %v8617_v53, 5 }
 0x169   :  { %v8610_v37 = vunpack.c.l.b16 %v1197_v24  ;;  %v672_v40 = vpop.f32.mrb[7].mxu1  ;;  %v1208_v11 = vpack.c.bf16 %v1176_v54, %v1176_v54 }
 0x16a   :  { %v1892_v46 = vrot.slane %v8606_v33, 7  ;;  %v1421_v3 = vsel %vm1420_vm1, %v8606_v33, %v1419_v45  ;;  %v1209_v5 = vpack.c.bf16 %v1177_v48, %v1177_v48 }
 0x16b   :  { %v362_v22 = vpop.f32.mrb[8].mxu0  ;;  %v1906_v50 = vrot.slane %v8610_v37, 7  ;;  %v2438_v55 = vrot.slane %v8610_v37, 1  ;;  %v1441_v2 = vsel %vm1420_vm1, %v8610_v37, %v1440_v49  ;;  %v8648_v30 = vunpack.c.l.b16 %v1208_v11 }
 0x16c   :  { %v364_v25 = vpop.f32.mrb[9].mxu0  ;;  %v1166_v28 = vmax.f32 %v362_v22, 0.0  ;;  %v1893_v4 = vsel %vm1420_vm1, %v1892_v46, %v8604_v32  ;;  %v2977_v22 = vrot.slane %v8610_v37, 2 }
 0x16d   :  { %v366_v26 = vpop.f32.mrb[10].mxu0  ;;  %v1167_v34 = vmax.f32 %v364_v25, 0.0  ;;  %v1907_v8 = vsel %vm1420_vm1, %v1906_v50, %v8608_v36  ;;  %v2439_v6 = vsel %vm1420_vm1, %v2438_v55, %v2437_v51  ;;  %v8646_v25 = vunpack.c.l.b16 %v1209_v5  ;;  %9340 = vst [vmem:[#allocation17_spill] sm:$0xff] %v8648_v30 }
 0x16e   :  { %v367_v29 = vpop.f32.mrb[11].mxu0  ;;  %v1198_v41 = vpack.c.bf16 %v1166_v28, %v1166_v28  ;;  %v789_v62 = vpop.f32.mrb[8].mxu1 }
 0x16f   :  { %v1199_v43 = vpack.c.bf16 %v1167_v34, %v1167_v34  ;;  %v791_v1 = vpop.f32.mrb[9].mxu1  ;;  %v1180_v26 = vmax.f32 %v789_v62, 0.0  ;;  %v2984_v34 = vrot.slane %v8617_v53, 6  ;;  %v1452_v51 = vrot.slane %v8646_v25, 2 }
 0x170   :  { %v8621_v57 = vunpack.c.l.b16 %v1198_v41  ;;  %v793_v7 = vpop.f32.mrb[10].mxu1  ;;  %v1181_v27 = vmax.f32 %v791_v1, 0.0 }
 0x171   :  { %v8625_v63 = vunpack.c.l.b16 %v1199_v43  ;;  %v794_v0 = vpop.f32.mrb[11].mxu1  ;;  %v1212_v48 = vpack.c.bf16 %v1180_v26, %v1180_v26 }
 0x172   :  { %v1422_v16 = vrot.slane %v8621_v57, 7  ;;  %v1894_v17 = vrot.slane %v8621_v57, 6  ;;  %v1213_v49 = vpack.c.bf16 %v1181_v27, %v1181_v27 }
 0x173   :  { %v423_v44 = vpop.f32.mrb[12].mxu0  ;;  %v1442_v19 = vrot.slane %v8625_v63, 7  ;;  %v1908_v20 = vrot.slane %v8625_v63, 6  ;;  %v8652_v31 = vsel %vm1423_vm2, %v8625_v63, %v2439_v6  ;;  %v2979_v11 = vrot.slane %v8625_v63, 1 }
 0x174   :  { %v425_v47 = vpop.f32.mrb[13].mxu0  ;;  %v1168_v58 = vmax.f32 %v423_v44, 0.0  ;;  %v1424_v41 = vsel %vm1423_vm2, %v1422_v16, %v1421_v3  ;;  %v1895_v42 = vsel %vm1423_vm2, %v1894_v17, %v1893_v4  ;;  %v2978_v3 = vsel %vm1420_vm1, %v2977_v22, %v2976_v56 }
 0x175   :  { %v427_v52 = vpop.f32.mrb[14].mxu0  ;;  %v1169_v59 = vmax.f32 %v425_v47, 0.0  ;;  %v1443_v46 = vsel %vm1423_vm2, %v1442_v19, %v1441_v2  ;;  %v1909_v47 = vsel %vm1423_vm2, %v1908_v20, %v1907_v8 }
 0x176   :  { %v428_v60 = vpop.f32.mrb[15].mxu0  ;;  %v1200_v14 = vpack.c.bf16 %v1168_v58, %v1168_v58  ;;  %v911_v40 = vpop.f32.mrb[12].mxu1  ;;  %v1437_v52 = vrot.slane %v8648_v30, 2  ;;  %v1918_v58 = vrot.slane %v8646_v25, 1 }
 0x177   :  { %v1201_v15 = vpack.c.bf16 %v1169_v59, %v1169_v59  ;;  %v913_v45 = vpop.f32.mrb[13].mxu1  ;;  %v1904_v59 = vrot.slane %v8648_v30, 1  ;;  %v2449_v60 = vrot.slane %v8646_v25, 3  ;;  %v1184_v16 = vmax.f32 %v911_v40, 0.0 }
 0x178   :  { %v8655_v35 = vunpack.c.l.b16 %v1200_v14  ;;  %v915_v50 = vpop.f32.mrb[14].mxu1  ;;  %v1185_v54 = vmax.f32 %v913_v45, 0.0  ;;  %v8680_v14 = vunpack.c.l.b16 %v1212_v48 }
 0x179   :  { %v8657_v38 = vunpack.c.l.b16 %v1201_v15  ;;  %v916_v55 = vpop.f32.mrb[15].mxu1  ;;  %v8682_v15 = vunpack.c.l.b16 %v1213_v49  ;;  %v1216_v45 = vpack.c.bf16 %v1184_v16, %v1184_v16 }
 0x17a   :  { %v1425_v1 = vrot.slane %v8655_v35, 6  ;;  %v1896_v2 = vrot.slane %v8655_v35, 5  ;;  %v1217_v19 = vpack.c.bf16 %v1185_v54, %v1185_v54 }
 0x17b   :  { %v484_v18 = vpop.f32.mrb[16].mxu0  ;;  %v1444_v62 = vrot.slane %v8657_v38, 6  ;;  %v1910_v8 = vrot.slane %v8657_v38, 5  ;;  %v2441_v56 = vrot.slane %v8657_v38, 7  ;;  %v1934_v50 = vrot.slane %v8682_v15, 7 }
 0x17c   :  { %v1170_v23 = vmax.f32 %v484_v18, 0.0  ;;  %v486_v24 = vpop.f32.mrb[17].mxu0  ;;  %v1427_v27 = vsel %vm1426_vm3, %v1425_v1, %v1424_v41  ;;  %v8695_v54 = vunpack.c.l.b16 %v1217_v19  ;;  %v8713_v19 = vunpack.c.l.b16 %v1216_v45 }
 0x17d   :  { %v1171_v28 = vmax.f32 %v486_v24, 0.0  ;;  %v488_v29 = vpop.f32.mrb[18].mxu0  ;;  %v1445_v26 = vsel %vm1426_vm3, %v1444_v62, %v1443_v46  ;;  %v1920_v46 = vrot.slane %v8680_v14, 7  ;;  %v2442_v55 = vsel %vm1426_vm3, %v2441_v56, %v8652_v31 }
 0x17e   :  { %v489_v39 = vpop.f32.mrb[19].mxu0  ;;  %v1202_v43 = vpack.c.bf16 %v1170_v23, %v1170_v23  ;;  %v1033_v24 = vpop.f32.mrb[16].mxu1 }
 0x17f   :  { %v1203_v44 = vpack.c.bf16 %v1171_v28, %v1171_v28  ;;  %v1897_v28 = vsel %vm1426_vm3, %v1896_v2, %v1895_v42  ;;  %v1035_v39 = vpop.f32.mrb[17].mxu1  ;;  %v2980_v2 = vsel %vm1423_vm2, %v2979_v11, %v2978_v3 }
 0x180   :  { %v8674_v4 = vunpack.c.l.b16 %v1202_v43  ;;  %v1911_v43 = vsel %vm1426_vm3, %v1910_v8, %v1909_v47  ;;  %v1037_v48 = vpop.f32.mrb[18].mxu1  ;;  %v2466_v47 = vrot.slane %v8682_v15, 1  ;;  %v1189_v1 = vmax.f32 %v1035_v39, 0.0 }
 0x181   :  { %v8676_v5 = vunpack.c.l.b16 %v1203_v44  ;;  %v1038_v41 = vpop.f32.mrb[19].mxu1 }
 0x182   :  { %v1428_v44 = vrot.slane %v8674_v4, 5  ;;  %v1898_v42 = vrot.slane %v8674_v4, 4  ;;  %v1221_v39 = vpack.c.bf16 %v1189_v1, %v1189_v1  ;;  %v1938_v41 = vrot.slane %v8695_v54, 5 }
 0x183   :  { %v606_v7 = vpop.f32.mrb[20].mxu0  ;;  %v1446_v40 = vrot.slane %v8676_v5, 5  ;;  %v1912_v49 = vrot.slane %v8676_v5, 4  ;;  %v2443_v11 = vrot.slane %v8676_v5, 6 }
 0x184   :  { %v1174_v0 = vmax.f32 %v606_v7, 0.0  ;;  %v608_v6 = vpop.f32.mrb[21].mxu0  ;;  %v1430_v16 = vsel %vm1429_vm4, %v1428_v44, %v1427_v27  ;;  %v1899_v27 = vsel %vm1429_vm4, %v1898_v42, %v1897_v28 }
 0x185   :  { %v1175_v17 = vmax.f32 %v608_v6, 0.0  ;;  %v610_v18 = vpop.f32.mrb[22].mxu0  ;;  %v1447_v6 = vsel %vm1429_vm4, %v1446_v40, %v1445_v26  ;;  %v1913_v3 = vsel %vm1429_vm4, %v1912_v49, %v1911_v43  ;;  %v1472_v26 = vrot.slane %v8695_v54, 6 }
 0x186   :  { %v1206_v22 = vpack.c.bf16 %v1174_v0, %v1174_v0  ;;  %v611_v23 = vpop.f32.mrb[23].mxu0  ;;  %v1155_v40 = vpop.f32.mrb[20].mxu1  ;;  %v1449_v44 = vsel %vm1432_vm5, %v1448_v12, %v1447_v6  ;;  %v1433_v43 = vsel %vm1432_vm5, %v1431_v9, %v1430_v16  ;;  %v1915_v28 = vsel %vm1432_vm5, %v1914_v13, %v1913_v3 }
 0x187   :  { %v1207_v29 = vpack.c.bf16 %v1175_v17, %v1175_v17  ;;  %v8711_v17 = vsel %vm1426_vm3, %v8657_v38, %v2980_v2  ;;  %v1188_v23 = vmax.f32 %v1033_v24, 0.0  ;;  %v1157_v48 = vpop.f32.mrb[21].mxu1  ;;  %v1458_v2 = vrot.slane %v8713_v19, 6 }
 0x188   :  { %v8701_v62 = vunpack.c.l.b16 %v1206_v22  ;;  %v1159_v12 = vpop.f32.mrb[22].mxu1  ;;  %v1901_v9 = vsel %vm1432_vm5, %v1900_v10, %v1899_v27  ;;  %v2444_v13 = vsel %vm1429_vm4, %v2443_v11, %v2442_v55  ;;  %v8739_v3 = vunpack.c.l.b16 %v1221_v39 }
 0x189   :  { %v8705_v8 = vunpack.c.l.b16 %v1207_v29  ;;  %v1160_v6 = vpop.f32.mrb[23].mxu1  ;;  %v1192_v12 = vmax.f32 %v1155_v40, 0.0  ;;  %v1193_v20 = vmax.f32 %v1157_v48, 0.0  ;;  %v2446_v39 = vsel %vm1432_vm5, %v2445_v21, %v2444_v13 }
 0x18a   :  { %v1434_v45 = vrot.slane %v8701_v62, 3  ;;  %v1902_v16 = vrot.slane %v8701_v62, 2  ;;  %v3012_v21 = vrot.slane %v8739_v3, 6 }
 0x18b   :  { %v728_v0 = vpop.f32.mrb[24].mxu0  ;;  %v1450_v24 = vrot.slane %v8705_v8, 3  ;;  %v1916_v49 = vrot.slane %v8705_v8, 2 }
 0x18c   :  { %v1178_v31 = vmax.f32 %v728_v0, 0.0  ;;  %v730_v18 = vpop.f32.mrb[25].mxu0  ;;  %v1220_v0 = vpack.c.bf16 %v1188_v23, %v1188_v23 }
 0x18d   :  { %v1179_v56 = vmax.f32 %v730_v18, 0.0  ;;  %v732_v22 = vpop.f32.mrb[26].mxu0  ;;  %v1924_v18 = vrot.slane %v8713_v19, 5  ;;  %v1451_v10 = vsel %vm1435_vm6, %v1450_v24, %v1449_v44  ;;  %v1917_v23 = vsel %vm1435_vm6, %v1916_v49, %v1915_v28 }
 0x18e   :  { %v733_v29 = vpop.f32.mrb[27].mxu0  ;;  %v1210_v42 = vpack.c.bf16 %v1178_v31, %v1178_v31  ;;  %v1436_v31 = vsel %vm1435_vm6, %v1434_v45, %v1433_v43  ;;  %v2469_v22 = vrot.slane %v8695_v54, 7  ;;  %v8753_v7 = vunpack.c.l.b16 %v1220_v0 }
 0x18f   :  { %v1211_v1 = vpack.c.bf16 %v1179_v56, %v1179_v56  ;;  %v2447_v56 = vrot.slane %v8705_v8, 4  ;;  %v8758_v40 = vsel %vm1438_vm7, %v1437_v52, %v1436_v31  ;;  %v1903_v44 = vsel %vm1435_vm6, %v1902_v16, %v1901_v9 }
 0x190   :  { %v8746_v27 = vunpack.c.l.b16 %v1210_v42  ;;  %v8764_v28 = vsel %vm1438_vm7, %v1452_v51, %v1451_v10  ;;  %v8770_v49 = vsel %vm1438_vm7, %v1918_v58, %v1917_v23  ;;  %v1225_v52 = vpack.c.bf16 %v1193_v20, %v1193_v20 }
 0x191   :  { %v8748_v6 = vunpack.c.l.b16 %v1211_v1  ;;  %v1224_v1 = vpack.c.bf16 %v1192_v12, %v1192_v12  ;;  %v2448_v0 = vsel %vm1435_vm6, %v2447_v56, %v2446_v39  ;;  %v8784_v58 = vsel %vm1438_vm7, %v1904_v59, %v1903_v44 }
 0x192   :  { %v1454_v51 = vrot.slane %v8746_v27, 1  ;;  %v1921_v56 = vsel %vm1420_vm1, %v1920_v46, %v8746_v27  ;;  %v8795_v10 = vsel %vm1438_vm7, %v2449_v60, %v2448_v0  ;;  %v8800_v59 = vunpack.c.l.b16 %v1225_v52 }
 0x193   :  { %v850_v29 = vpop.f32.mrb[28].mxu0  ;;  %v1468_v16 = vrot.slane %v8748_v6, 1  ;;  %v2465_v20 = vrot.slane %v8748_v6, 2  ;;  %v1935_v39 = vsel %vm1420_vm1, %v1934_v50, %v8748_v6  ;;  %v2982_v12 = vrot.slane %v8676_v5, 7 }
 0x194   :  { %v1182_v55 = vmax.f32 %v850_v29, 0.0  ;;  %v852_v11 = vpop.f32.mrb[29].mxu0 }
 0x195   :  { %v1183_v43 = vmax.f32 %v852_v11, 0.0  ;;  %v854_v45 = vpop.f32.mrb[30].mxu0  ;;  %v8798_v11 = vunpack.c.l.b16 %v1224_v1  ;;  %v1469_v60 = vsel %vm1420_vm1, %v8682_v15, %v1468_v16  ;;  %v2467_v50 = vsel %vm1420_vm1, %v2466_v47, %v2465_v20 }
 0x196   :  { %v1214_v48 = vpack.c.bf16 %v1182_v55, %v1182_v55  ;;  %v855_v24 = vpop.f32.mrb[31].mxu0  ;;  %v1946_v20 = vrot.slane %v8800_v59, 1 }
 0x197   :  { %v1215_v42 = vpack.c.bf16 %v1183_v43, %v1183_v43 }
 0x198   :  { %v8773_v9 = vunpack.c.l.b16 %v1214_v48  ;;  %v1455_v48 = vsel %vm1420_vm1, %v8680_v14, %v1454_v51 }
 0x199   :  { %v8778_v31 = vunpack.c.l.b16 %v1215_v42 }
 0x19a   :  { %v1456_v46 = vrot.slane %v8773_v9, 7  ;;  %v1922_v52 = vrot.slane %v8773_v9, 6 }
 0x19b   :  { %v972_v55 = vpop.f32.mrb[32].mxu0  ;;  %v1470_v44 = vrot.slane %v8778_v31, 7  ;;  %v1936_v1 = vrot.slane %v8778_v31, 6  ;;  %v2468_v16 = vsel %vm1423_vm2, %v8778_v31, %v2467_v50 }
 0x19c   :  { %v1186_v43 = vmax.f32 %v972_v55, 0.0  ;;  %v974_v45 = vpop.f32.mrb[33].mxu0 }
 0x19d   :  { %v1187_v24 = vmax.f32 %v974_v45, 0.0  ;;  %v976_v42 = vpop.f32.mrb[34].mxu0  ;;  %v1471_v47 = vsel %vm1423_vm2, %v1470_v44, %v1469_v60  ;;  %v1937_v50 = vsel %vm1423_vm2, %v1936_v1, %v1935_v39  ;;  %v2983_v44 = vsel %vm1429_vm4, %v2982_v12, %v8711_v17 }
 0x19e   :  { %v1218_v0 = vpack.c.bf16 %v1186_v43, %v1186_v43  ;;  %v977_v55 = vpop.f32.mrb[35].mxu0  ;;  %v1457_v42 = vsel %vm1423_vm2, %v1456_v46, %v1455_v48  ;;  %v2470_v46 = vsel %vm1426_vm3, %v2469_v22, %v2468_v16  ;;  %v1939_v16 = vsel %vm1426_vm3, %v1938_v41, %v1937_v50 }
 0x19f   :  { %v1219_v51 = vpack.c.bf16 %v1187_v24, %v1187_v24  ;;  %v1923_v24 = vsel %vm1423_vm2, %v1922_v52, %v1921_v56  ;;  %v1459_v48 = vsel %vm1426_vm3, %v1458_v2, %v1457_v42  ;;  %v1473_v56 = vsel %vm1426_vm3, %v1472_v26, %v1471_v47 }
 0x1a0   :  { %v8824_v13 = vunpack.c.l.b16 %v1218_v0  ;;  %v3004_v0 = vrot.slane %v8748_v6, 3  ;;  %v1925_v17 = vsel %vm1426_vm3, %v1924_v18, %v1923_v24  ;;  %v3007_v12 = vrot.slane %v8778_v31, 1 }
 0x1a1   :  { %v8829_v55 = vunpack.c.l.b16 %v1219_v51  ;;  %v2985_v43 = vsel %vm1432_vm5, %v2984_v34, %v2983_v44 }
 0x1a2   :  { %v1460_v60 = vrot.slane %v8824_v13, 5  ;;  %v1926_v1 = vrot.slane %v8824_v13, 4 }
 0x1a3   :  { %v1094_v51 = vpop.f32.mrb[36].mxu0  ;;  %v1474_v39 = vrot.slane %v8829_v55, 5  ;;  %v1940_v22 = vrot.slane %v8829_v55, 4  ;;  %v2471_v47 = vrot.slane %v8829_v55, 6 }
 0x1a4   :  { %v1190_v52 = vmax.f32 %v1094_v51, 0.0  ;;  %v1096_v2 = vpop.f32.mrb[37].mxu0  ;;  %v2986_v51 = vrot.slane %v8705_v8, 5  ;;  %v1461_v18 = vsel %vm1429_vm4, %v1460_v60, %v1459_v48  ;;  %v9342_v48 = vrot.slane %v8739_v3, 4 }
 0x1a5   :  { %v1191_v42 = vmax.f32 %v1096_v2, 0.0  ;;  %v1098_v26 = vpop.f32.mrb[38].mxu0  ;;  %v1475_v41 = vsel %vm1429_vm4, %v1474_v39, %v1473_v56  ;;  %v1941_v50 = vsel %vm1429_vm4, %v1940_v22, %v1939_v16  ;;  %v1927_v2 = vsel %vm1429_vm4, %v1926_v1, %v1925_v17 }
 0x1a6   :  { %v1222_v45 = vpack.c.bf16 %v1190_v52, %v1190_v52  ;;  %v1099_v29 = vpop.f32.mrb[39].mxu0  ;;  %v9341_v26 = vrot.slane %v8682_v15, 2  ;;  %v3016_v56 = vrot.slane %v8800_v59, 4  ;;  %v1477_v60 = vsel %vm1432_vm5, %v9342_v48, %v1475_v41 }
 0x1a7   :  { %v1223_v24 = vpack.c.bf16 %v1191_v42, %v1191_v42  ;;  %v3010_v29 = vrot.slane %v8829_v55, 7  ;;  %v9343_v22 = vrot.slane %v8739_v3, 3  ;;  %v9344_v1 = vrot.slane %v8753_v7, 4 }
 0x1a8   :  { %v3006_v23 = vsel %vm1420_vm1, %v9341_v26, %v3004_v0  ;;  %v8869_v34 = vunpack.c.l.b16 %v1222_v45  ;;  %v9345_v52 = vrot.slane %v8753_v7, 3 }
 0x1a9   :  { %v3008_v44 = vsel %vm1423_vm2, %v3007_v12, %v3006_v23  ;;  %v8874_v39 = vunpack.c.l.b16 %v1223_v24  ;;  %v1943_v0 = vsel %vm1432_vm5, %v9343_v22, %v1941_v50  ;;  %v1463_v45 = vsel %vm1432_vm5, %v9344_v1, %v1461_v18  ;;  %v7276_v1 = vld [vmem:[#allocation4 + $0x400] ss:$16 sps:$4 sm:$0xff]  }
 0x1aa   :  { %v1464_v23 = vrot.slane %v8869_v34, 3  ;;  %v1929_v16 = vsel %vm1432_vm5, %v9345_v52, %v1927_v2  ;;  %v1930_v17 = vrot.slane %v8869_v34, 2  ;;  %v2472_v12 = vsel %vm1429_vm4, %v2471_v47, %v2470_v46  ;;  %v7273_v46 = vld [vmem:[#allocation4 + $0x208] ss:$16 sps:$4 sm:$0xff]  }
 0x1ab   :  { %v1478_v42 = vrot.slane %v8874_v39, 3  ;;  %v1944_v41 = vrot.slane %v8874_v39, 2  ;;  %v2475_v50 = vrot.slane %v8874_v39, 4  ;;  %v3009_v24 = vsel %vm1426_vm3, %v8695_v54, %v3008_v44 }
 0x1ac   :  { %v1465_v18 = vsel %vm1435_vm6, %v1464_v23, %v1463_v45  ;;  %v1931_v26 = vsel %vm1435_vm6, %v1930_v17, %v1929_v16  ;;  %v3011_v48 = vsel %vm1429_vm4, %v3010_v29, %v3009_v24  ;;  %v3014_v2 = vrot.slane %v8874_v39, 5 }
 0x1ad   :  { %v1479_v22 = vsel %vm1435_vm6, %v1478_v42, %v1477_v60  ;;  %v1945_v47 = vsel %vm1435_vm6, %v1944_v41, %v1943_v0  ;;  %v9346_v52 = vrot.slane %v8798_v11, 2  ;;  %v9347_v44 = vrot.slane %v8798_v11, 1 }
 0x1ae   :  { %v9348_v23 = vrot.slane %v8800_v59, 2  ;;  %v1947_v16 = vsel %vm1438_vm7, %v1946_v20, %v1945_v47  ;;  %v9349_v60 = vrot.slane %v8739_v3, 5  ;;  %v2987_v0 = vsel %vm1435_vm6, %v2986_v51, %v2985_v43 }
 0x1af   :  { %v1467_v30 = vsel %vm1438_vm7, %v9346_v52, %v1465_v18  ;;  %v1933_v45 = vsel %vm1438_vm7, %v9347_v44, %v1931_v26  ;;  %v8918_v41 = vpack.c.b16 %v1947_v16, %v8770_v49  ;;  %v7281_v18 = vld [vmem:[#allocation4 + $0x22c] ss:$16 sps:$4 sm:$0xff]   ;;  %v7284_v26 = vld [vmem:[#allocation4 + $0x424] ss:$16 sps:$4 sm:$0xff]   ;;  %v3013_v52 = vsel %vm1432_vm5, %v3012_v21, %v3011_v48 }
 0x1b0   :  { %v1481_v29 = vsel %vm1438_vm7, %v9348_v23, %v1479_v22  ;;  %v2474_v17 = vsel %vm1432_vm5, %v9349_v60, %v2472_v12  ;;  %v8923_v22 = vpack.c.b16 %v1467_v30, %v8758_v40  ;;  %v8926_v20 = vpack.c.b16 %v1933_v45, %v8784_v58  ;;  %v7279_v58 = vld [vmem:[#allocation4 + $0x228] ss:$16 sps:$4 sm:$0xff]   ;;  %v7287_v48 = vld [vmem:[#allocation4 + $0x24c] ss:$16 sps:$4 sm:$0xff]   ;;  %v7288_v23 = vld [vmem:[#allocation4 + $0x440] ss:$16 sps:$4 sm:$0xff]  }
 0x1b1   :  { %v1483_v42 = vpack.c.b16 %v1481_v29, %v8764_v28  ;;  %v2476_v24 = vsel %vm1435_vm6, %v2475_v50, %v2474_v17  ;;  %v9350_v12 = vrot.slane %v8800_v59, 3  ;;  %v3015_v28 = vsel %vm1435_vm6, %v3014_v2, %v3013_v52  ;;  %2304 = vmatprep.mubr.bf16.mxu0 %v8918_v41  ;;  %v7282_v50 = vld [vmem:[#allocation4 + $0x420] ss:$16 sps:$4 sm:$0xff]   ;;  %v7285_v45 = vld [vmem:[#allocation4 + $0x248] ss:$16 sps:$4 sm:$0xff]  }
 0x1b2   :  { %v9351_v21 = vrot.slane %v8646_v25, 4  ;;  %v3017_v40 = vsel %vm1438_vm7, %v3016_v56, %v3015_v28  ;;  %2305 = vmatmul.mubr.bf16.vlgmr.msra.gmra.mrb[40].mxu0 %v8926_v20  ;;  %v3515_v2 = vrot.slane %v8608_v36, 4  ;;  %v3516_v56 = vrot.slane %v8610_v37, 3  ;;  %v7296_v17 = vld [vmem:[#allocation4 + $0x464] ss:$16 sps:$4 sm:$0xff]  }
 0x1b3   :  { %v2478_v43 = vsel %vm1438_vm7, %v9350_v12, %v2476_v24  ;;  %1838 = vmatprep.mubr.bf16.mxu1 %v1483_v42  ;;  %2804 = vmatpush1.bf16.msra.mxu0 %v7276_v1  ;;  %v3518_v47 = vrot.slane %v8625_v63, 2  ;;  %v3520_v44 = vrot.slane %v8657_v38, 1  ;;  %v3523_v29 = vrot.slane %v8617_v53, 7  ;;  %v7294_v52 = vld [vmem:[#allocation4 + $0x460] ss:$16 sps:$4 sm:$0xff]  }
 0x1b4   :  { %v8934_v49 = vpack.c.b16 %v2478_v43, %v8795_v10  ;;  %v2989_v30 = vsel %vm1438_vm7, %v9351_v21, %v2987_v0  ;;  %1839 = vmatmul.mubr.bf16.vlgmr.msra.gmra.mrb[24].mxu1 %v8923_v22  ;;  %v7290_v10 = vld [vmem:[#allocation4 + $0x444] ss:$16 sps:$4 sm:$0xff]   ;;  %2805 = vmatprep.subr.bf16.mxu0 %v7284_v26  ;;  %v3517_v1 = vsel %vm1420_vm1, %v3516_v56, %v3515_v2  ;;  %v3543_v16 = vrot.slane %v8748_v6, 4  ;;  %v7291_v26 = vld [vmem:[#allocation4 + $0x268] ss:$16 sps:$4 sm:$0xff]  }
 0x1b5   :  { %v8942_v51 = vpack.c.b16 %v3017_v40, %v2989_v30  ;;  %1850 = vmatpush1.bf16.msra.mxu1 %v7273_v46  ;;  %1881 = vmatprep.mubr.bf16.mxu1 %v1483_v42  ;;  %v7293_v46 = vld [vmem:[#allocation4 + $0x26c] ss:$16 sps:$4 sm:$0xff]   ;;  %v3544_v60 = vrot.slane %v8682_v15, 3  ;;  %v3519_v0 = vsel %vm1423_vm2, %v3518_v47, %v3517_v1  ;;  %v3525_v42 = vrot.slane %v8705_v8, 6  ;;  %v7302_v56 = vld [vmem:[#allocation4 + $0x484] ss:$16 sps:$4 sm:$0xff]  }
 0x1b6   :  { %2835 = vmatprep.mubr.bf16.mxu0 %v8934_v49  ;;  %1851 = vmatprep.subr.bf16.mxu1 %v7281_v18  ;;  %v3546_v24 = vrot.slane %v8778_v31, 2  ;;  %v3548_v18 = vrot.slane %v8695_v54, 1  ;;  %v3521_v12 = vsel %vm1426_vm3, %v3520_v44, %v3519_v0  ;;  %v3551_v28 = vrot.slane %v8739_v3, 7  ;;  %v7299_v2 = vld [vmem:[#allocation4 + $0x28c] ss:$16 sps:$4 sm:$0xff]  }
 0x1b7   :  { %2806 = vmatpush1.bf16.msra.mxu0 %v7282_v50  ;;  %v3545_v43 = vsel %vm1420_vm1, %v3544_v60, %v3543_v16  ;;  %v3522_v21 = vsel %vm1429_vm4, %v8676_v5, %v3521_v12  ;;  %v3553_v40 = vrot.slane %v8874_v39, 6  ;;  %v3527_v50 = vrot.slane %v8646_v25, 5  ;;  %v7297_v1 = vld [vmem:[#allocation4 + $0x288] ss:$16 sps:$4 sm:$0xff]   ;;  %v7305_v60 = vld [vmem:[#allocation4 + $0x2ac] ss:$16 sps:$4 sm:$0xff]  }
 0x1b8   :  { %2807 = vmatprep.subr.bf16.mxu0 %v7290_v10  ;;  %v3547_v30 = vsel %vm1423_vm2, %v3546_v24, %v3545_v43  ;;  %v3555_v10 = vrot.slane %v8800_v59, 5  ;;  %v7306_v24 = vld [vmem:[#allocation4 + $0x4a0] ss:$16 sps:$4 sm:$0xff]   ;;  %v4057_v12 = vrot.slane %v8625_v63, 3  ;;  %v7309_v43 = vld [vmem:[#allocation4 + $0x2c8] ss:$16 sps:$4 sm:$0xff]  }
 0x1b9   :  { %1852 = vmatpush1.bf16.msra.mxu1 %v7279_v58  ;;  %v3524_v58 = vsel %vm1432_vm5, %v3523_v29, %v3522_v21  ;;  %v4054_v21 = vrot.slane %v8608_v36, 5 }
 0x1ba   :  { %1853 = vmatprep.subr.bf16.mxu1 %v7287_v48  ;;  %v3549_v48 = vsel %vm1426_vm3, %v3548_v18, %v3547_v30  ;;  %v3526_v47 = vsel %vm1435_vm6, %v3525_v42, %v3524_v58  ;;  %v7303_v42 = vld [vmem:[#allocation4 + $0x2a8] ss:$16 sps:$4 sm:$0xff]   ;;  %v4055_v18 = vrot.slane %v8610_v37, 4  ;;  %v4059_v30 = vrot.slane %v8657_v38, 2 }
 0x1bb   :  { %2808 = vmatpush1.bf16.msra.mxu0 %v7288_v23  ;;  %v3550_v44 = vsel %vm1429_vm4, %v8829_v55, %v3549_v48  ;;  %v3528_v16 = vsel %vm1438_vm7, %v3527_v50, %v3526_v47  ;;  %v4082_v50 = vrot.slane %v8748_v6, 5  ;;  %v7317_v48 = vld [vmem:[#allocation4 + $0x2ec] ss:$16 sps:$4 sm:$0xff]  }
 0x1bc   :  { %2809 = vmatprep.subr.bf16.mxu0 %v7296_v17  ;;  %v3552_v23 = vsel %vm1432_vm5, %v3551_v28, %v3550_v44  ;;  %v7308_v17 = vld [vmem:[#allocation4 + $0x4a4] ss:$16 sps:$4 sm:$0xff]   ;;  %v7312_v28 = vld [vmem:[#allocation4 + $0x4c0] ss:$16 sps:$4 sm:$0xff]   ;;  %v4056_v58 = vsel %vm1420_vm1, %v4055_v18, %v4054_v21  ;;  %v4064_v44 = vrot.slane %v8705_v8, 7  ;;  %v4092_v18 = vrot.slane %v8874_v39, 7 }
 0x1bd   :  { %1854 = vmatpush1.bf16.msra.mxu1 %v7285_v45  ;;  %v7300_v45 = vld [vmem:[#allocation4 + $0x480] ss:$16 sps:$4 sm:$0xff]   ;;  %v3554_v29 = vsel %vm1435_vm6, %v3553_v40, %v3552_v23  ;;  %v4061_v40 = vrot.slane %v8676_v5, 1 }
 0x1be   :  { %1855 = vmatprep.subr.bf16.mxu1 %v7293_v46  ;;  %v3556_v46 = vsel %vm1438_vm7, %v3555_v10, %v3554_v29  ;;  %v7320_v10 = vld [vmem:[#allocation4 + $0x4e4] ss:$16 sps:$4 sm:$0xff]   ;;  %v4087_v29 = vrot.slane %v8695_v54, 2 }
 0x1bf   :  { %2810 = vmatpush1.bf16.msra.mxu0 %v7294_v52  ;;  %v8975_v0 = vpack.c.b16 %v3556_v46, %v3528_v16  ;;  %v7314_v52 = vld [vmem:[#allocation4 + $0x4c4] ss:$16 sps:$4 sm:$0xff]   ;;  %v4089_v16 = vrot.slane %v8829_v55, 1  ;;  %v7318_v46 = vld [vmem:[#allocation4 + $0x4e0] ss:$16 sps:$4 sm:$0xff]  }
 0x1c0   :  { %2811 = vmatprep.subr.bf16.mxu0 %v7302_v56  ;;  %v7315_v56 = vld [vmem:[#allocation4 + $0x2e8] ss:$16 sps:$4 sm:$0xff]  }
 0x1c1   :  { %1856 = vmatpush1.bf16.msra.mxu1 %v7291_v26  ;;  %v7311_v26 = vld [vmem:[#allocation4 + $0x2cc] ss:$16 sps:$4 sm:$0xff]  }
 0x1c2   :  { %1857 = vmatprep.subr.bf16.mxu1 %v7299_v2  ;;  %v4058_v2 = vsel %vm1423_vm2, %v4057_v12, %v4056_v58 }
 0x1c3   :  { %2812 = vmatpush1.bf16.msra.mxu0 %v7300_v45  ;;  %v4060_v47 = vsel %vm1426_vm3, %v4059_v30, %v4058_v2  ;;  %v4085_v45 = vrot.slane %v8778_v31, 3 }
 0x1c4   :  { %2813 = vmatprep.subr.bf16.mxu0 %v7308_v17  ;;  %v4062_v23 = vsel %vm1429_vm4, %v4061_v40, %v4060_v47  ;;  %v7323_v17 = vld [vmem:[#allocation4 + $0x30c] ss:$16 sps:$4 sm:$0xff]   ;;  %v7324_v40 = vld [vmem:[#allocation4 + $0x500] ss:$16 sps:$4 sm:$0xff]  }
 0x1c5   :  { %1858 = vmatpush1.bf16.msra.mxu1 %v7297_v1  ;;  %v4083_v1 = vrot.slane %v8682_v15, 4 }
 0x1c6   :  { %1859 = vmatprep.subr.bf16.mxu1 %v7305_v60 }
 0x1c7   :  { %2814 = vmatpush1.bf16.msra.mxu0 %v7306_v24  ;;  %v4084_v60 = vsel %vm1420_vm1, %v4083_v1, %v4082_v50  ;;  %v7329_v50 = vld [vmem:[#allocation4 + $0x32c] ss:$16 sps:$4 sm:$0xff]   ;;  %v7327_v1 = vld [vmem:[#allocation4 + $0x328] ss:$16 sps:$4 sm:$0xff]  }
 0x1c8   :  { %2815 = vmatprep.subr.bf16.mxu0 %v7314_v52  ;;  %v4086_v24 = vsel %vm1423_vm2, %v4085_v45, %v4084_v60  ;;  %v4066_v52 = vrot.slane %v8646_v25, 6  ;;  %v7335_v45 = vld [vmem:[#allocation4 + $0x34c] ss:$16 sps:$4 sm:$0xff]   ;;  %v4596_v60 = vrot.slane %v8625_v63, 4 }
 0x1c9   :  { %1860 = vmatpush1.bf16.msra.mxu1 %v7303_v42  ;;  %v7326_v42 = vld [vmem:[#allocation4 + $0x504] ss:$16 sps:$4 sm:$0xff]   ;;  %v4088_v12 = vsel %vm1426_vm3, %v4087_v29, %v4086_v24  ;;  %v7333_v29 = vld [vmem:[#allocation4 + $0x348] ss:$16 sps:$4 sm:$0xff]   ;;  %v4600_v24 = vrot.slane %v8676_v5, 2 }
 0x1ca   :  { %1861 = vmatprep.subr.bf16.mxu1 %v7311_v26  ;;  %v4063_v26 = vsel %vm1432_vm5, %v8617_v53, %v4062_v23  ;;  %v4090_v30 = vsel %vm1429_vm4, %v4089_v16, %v4088_v12  ;;  %v7338_v23 = vld [vmem:[#allocation4 + $0x544] ss:$16 sps:$4 sm:$0xff]   ;;  %v4593_v16 = vrot.slane %v8608_v36, 6 }
 0x1cb   :  { %2816 = vmatpush1.bf16.msra.mxu0 %v7312_v28  ;;  %v7321_v28 = vld [vmem:[#allocation4 + $0x308] ss:$16 sps:$4 sm:$0xff]   ;;  %v4065_v21 = vsel %vm1435_vm6, %v4064_v44, %v4063_v26  ;;  %v4091_v58 = vsel %vm1432_vm5, %v8739_v3, %v4090_v30  ;;  %v4621_v26 = vrot.slane %v8748_v6, 6  ;;  %v7344_v12 = vld [vmem:[#allocation4 + $0x564] ss:$16 sps:$4 sm:$0xff]  }
 0x1cc   :  { %2817 = vmatprep.subr.bf16.mxu0 %v7320_v10  ;;  %v4093_v10 = vsel %vm1435_vm6, %v4092_v18, %v4091_v58  ;;  %v4067_v2 = vsel %vm1438_vm7, %v4066_v52, %v4065_v21  ;;  %v7341_v52 = vld [vmem:[#allocation4 + $0x36c] ss:$16 sps:$4 sm:$0xff]   ;;  %v7342_v21 = vld [vmem:[#allocation4 + $0x560] ss:$16 sps:$4 sm:$0xff]   ;;  %v4622_v58 = vrot.slane %v8682_v15, 5 }
 0x1cd   :  { %1862 = vmatpush1.bf16.msra.mxu1 %v7309_v43  ;;  %v4094_v43 = vrot.slane %v8800_v59, 6 }
 0x1ce   :  { %1863 = vmatprep.subr.bf16.mxu1 %v7317_v48  ;;  %v7332_v48 = vld [vmem:[#allocation4 + $0x524] ss:$16 sps:$4 sm:$0xff]  }
 0x1cf   :  { %2818 = vmatpush1.bf16.msra.mxu0 %v7318_v46  ;;  %v4095_v47 = vsel %vm1438_vm7, %v4094_v43, %v4093_v10  ;;  %v4594_v46 = vrot.slane %v8610_v37, 5 }
 0x1d0   :  { %2819 = vmatprep.subr.bf16.mxu0 %v7326_v42  ;;  %v9007_v44 = vpack.c.b16 %v4095_v47, %v4067_v2  ;;  %v4598_v42 = vrot.slane %v8657_v38, 3  ;;  %v4626_v2 = vrot.slane %v8695_v54, 3  ;;  %v4628_v47 = vrot.slane %v8829_v55, 2 }
 0x1d1   :  { %1864 = vmatpush1.bf16.msra.mxu1 %v7315_v56  ;;  %v7330_v56 = vld [vmem:[#allocation4 + $0x520] ss:$16 sps:$4 sm:$0xff]   ;;  %v4595_v18 = vsel %vm1420_vm1, %v4594_v46, %v4593_v16  ;;  %v7350_v16 = vld [vmem:[#allocation4 + $0x584] ss:$16 sps:$4 sm:$0xff]  }
 0x1d2   :  { %1865 = vmatprep.subr.bf16.mxu1 %v7323_v17  ;;  %v7336_v17 = vld [vmem:[#allocation4 + $0x540] ss:$16 sps:$4 sm:$0xff]   ;;  %v4597_v43 = vsel %vm1423_vm2, %v4596_v60, %v4595_v18 }
 0x1d3   :  { %2820 = vmatpush1.bf16.msra.mxu0 %v7324_v40  ;;  %v4599_v30 = vsel %vm1426_vm3, %v4598_v42, %v4597_v43  ;;  %v4602_v40 = vrot.slane %v8617_v53, 1  ;;  %v4605_v42 = vrot.slane %v8646_v25, 7  ;;  %v7348_v18 = vld [vmem:[#allocation4 + $0x580] ss:$16 sps:$4 sm:$0xff]  }
 0x1d4   :  { %2821 = vmatprep.subr.bf16.mxu0 %v7332_v48  ;;  %v2452_v48 = vrot.slane %v8680_v14, 1  ;;  %v4601_v10 = vsel %vm1429_vm4, %v4600_v24, %v4599_v30  ;;  %v2455_v30 = vrot.slane %v8713_v19, 7 }
 0x1d5   :  { %1866 = vmatpush1.bf16.msra.mxu1 %v7321_v28  ;;  %v7339_v28 = vld [vmem:[#allocation4 + $0x368] ss:$16 sps:$4 sm:$0xff]   ;;  %v4603_v60 = vsel %vm1432_vm5, %v4602_v40, %v4601_v10  ;;  %v2423_v10 = vrot.slane %v8604_v32, 2 }
 0x1d6   :  { %1867 = vmatprep.subr.bf16.mxu1 %v7329_v50  ;;  %v4624_v50 = vrot.slane %v8778_v31, 4 }
 0x1d7   :  { %2822 = vmatpush1.bf16.msra.mxu0 %v7330_v56  ;;  %v4623_v56 = vsel %vm1420_vm1, %v4622_v58, %v4621_v26  ;;  %v4604_v26 = vsel %vm1435_vm6, %v8705_v8, %v4603_v60  ;;  %v7353_v58 = vld [vmem:[#allocation4 + $0x3ac] ss:$16 sps:$4 sm:$0xff]  }
 0x1d8   :  { %2823 = vmatprep.subr.bf16.mxu0 %v7338_v23  ;;  %v7347_v23 = vld [vmem:[#allocation4 + $0x38c] ss:$16 sps:$4 sm:$0xff]   ;;  %v4625_v46 = vsel %vm1423_vm2, %v4624_v50, %v4623_v56  ;;  %v7356_v50 = vld [vmem:[#allocation4 + $0x5a4] ss:$16 sps:$4 sm:$0xff]  }
 0x1d9   :  { %1868 = vmatpush1.bf16.msra.mxu1 %v7327_v1  ;;  %v2451_v1 = vrot.slane %v8746_v27, 2  ;;  %v4627_v24 = vsel %vm1426_vm3, %v4626_v2, %v4625_v46  ;;  %v2429_v46 = vrot.slane %v8674_v4, 6 }
 0x1da   :  { %1869 = vmatprep.subr.bf16.mxu1 %v7335_v45  ;;  %v4630_v45 = vrot.slane %v8739_v3, 1 }
 0x1db   :  { %2824 = vmatpush1.bf16.msra.mxu0 %v7336_v17  ;;  %v7345_v17 = vld [vmem:[#allocation4 + $0x388] ss:$16 sps:$4 sm:$0xff]   ;;  %v2453_v43 = vsel %vm1420_vm1, %v2452_v48, %v2451_v1  ;;  %v7354_v48 = vld [vmem:[#allocation4 + $0x5a0] ss:$16 sps:$4 sm:$0xff]   ;;  %v4606_v1 = vsel %vm1438_vm7, %v4605_v42, %v4604_v26  ;;  %v7362_v42 = vld [vmem:[#allocation4 + $0x5c4] ss:$16 sps:$4 sm:$0xff]  }
 0x1dc   :  { %2825 = vmatprep.subr.bf16.mxu0 %v7344_v12  ;;  %v2424_v12 = vrot.slane %v8606_v33, 1  ;;  %v2454_v2 = vsel %vm1423_vm2, %v8773_v9, %v2453_v43  ;;  %v2431_v26 = vrot.slane %v8623_v61, 5  ;;  %v7360_v43 = vld [vmem:[#allocation4 + $0x5c0] ss:$16 sps:$4 sm:$0xff]  }
 0x1dd   :  { %1870 = vmatpush1.bf16.msra.mxu1 %v7333_v29  ;;  %v4633_v29 = vrot.slane %v8800_v59, 7  ;;  %v2456_v60 = vsel %vm1426_vm3, %v2455_v30, %v2454_v2  ;;  %v5133_v30 = vrot.slane %v8610_v37, 6  ;;  %v9352_v2 = vld [vmem:[#allocation17_spill] sm:$0xff]  ;;  %v5160_v37 = vrot.slane %v8748_v6, 7 }
 0x1de   :  { %1871 = vmatprep.subr.bf16.mxu1 %v7341_v52  ;;  %v4629_v52 = vsel %vm1429_vm4, %v4628_v47, %v4627_v24  ;;  %v7351_v47 = vld [vmem:[#allocation4 + $0x3a8] ss:$16 sps:$4 sm:$0xff]   ;;  %v5132_v24 = vrot.slane %v8608_v36, 7  ;;  %v5135_v36 = vrot.slane %v8625_v63, 5  ;;  %v5161_v63 = vrot.slane %v8682_v15, 6 }
 0x1df   :  { %2826 = vmatpush1.bf16.msra.mxu0 %v7342_v21  ;;  %v4631_v40 = vsel %vm1432_vm5, %v4630_v45, %v4629_v52  ;;  %v2427_v45 = vrot.slane %v8655_v35, 7  ;;  %v7359_v52 = vld [vmem:[#allocation4 + $0x3cc] ss:$16 sps:$4 sm:$0xff]   ;;  %v5143_v6 = vrot.slane %v8705_v8, 1  ;;  %v5163_v15 = vrot.slane %v8778_v31, 5 }
 0x1e0   :  { %2827 = vmatprep.subr.bf16.mxu0 %v7350_v16  ;;  %v4632_v21 = vsel %vm1435_vm6, %v8874_v39, %v4631_v40  ;;  %v2425_v16 = vsel %vm1420_vm1, %v2424_v12, %v2423_v10  ;;  %v7357_v12 = vld [vmem:[#allocation4 + $0x3c8] ss:$16 sps:$4 sm:$0xff]   ;;  %v2461_v40 = vrot.slane %v8869_v34, 4  ;;  %v2433_v10 = vrot.slane %v8701_v62, 4 }
 0x1e1   :  { %1872 = vmatpush1.bf16.msra.mxu1 %v7339_v28  ;;  %v2457_v28 = vrot.slane %v8824_v13, 6  ;;  %v4634_v56 = vsel %vm1438_vm7, %v4633_v29, %v4632_v21  ;;  %v2426_v29 = vsel %vm1423_vm2, %v8621_v57, %v2425_v16  ;;  %v2435_v21 = vrot.slane %v9352_v2, 3 }
 0x1e2   :  { %1873 = vmatprep.subr.bf16.mxu1 %v7347_v23  ;;  %v9049_v23 = vpack.c.b16 %v4634_v56, %v4606_v1  ;;  %v5134_v56 = vsel %vm1420_vm1, %v5133_v30, %v5132_v24  ;;  %v5169_v8 = vrot.slane %v8739_v3, 2  ;;  %v5171_v31 = vrot.slane %v8874_v39, 1  ;;  %v7371_v30 = vld [vmem:[#allocation4 + $0xc] ss:$16 sps:$4 sm:$0xff]   ;;  %v7369_v39 = vld [vmem:[#allocation4 + $0x8] ss:$16 sps:$4 sm:$0xff]  }
 0x1e3   :  { %2828 = vmatpush1.bf16.msra.mxu0 %v7348_v18  ;;  %v2459_v18 = vrot.slane %v8753_v7, 5 }
 0x1e4   :  { %2829 = vmatprep.subr.bf16.mxu0 %v7356_v50  ;;  %v2428_v50 = vsel %vm1426_vm3, %v2427_v45, %v2426_v29  ;;  %v7368_v45 = vld [vmem:[#allocation4 + $0x5e4] ss:$16 sps:$4 sm:$0xff]   ;;  %v5167_v29 = vrot.slane %v8829_v55, 3 }
 0x1e5   :  { %1874 = vmatpush1.bf16.msra.mxu1 %v7345_v17  ;;  %v2458_v17 = vsel %vm1429_vm4, %v2457_v28, %v2456_v60  ;;  %v5139_v28 = vrot.slane %v8676_v5, 3  ;;  %v2430_v1 = vsel %vm1429_vm4, %v2429_v46, %v2428_v50  ;;  %v2463_v60 = vrot.slane %v8798_v11, 3 }
 0x1e6   :  { %1875 = vmatprep.subr.bf16.mxu1 %v7353_v58  ;;  %v5137_v58 = vrot.slane %v8657_v38, 4  ;;  %v7365_v38 = vld [vmem:[#allocation4 + $0x3ec] ss:$16 sps:$4 sm:$0xff]   ;;  %v2460_v16 = vsel %vm1432_vm5, %v2459_v18, %v2458_v17  ;;  %v5136_v5 = vsel %vm1423_vm2, %v5135_v36, %v5134_v56  ;;  %v7363_v17 = vld [vmem:[#allocation4 + $0x3e8] ss:$16 sps:$4 sm:$0xff]   ;;  %v2432_v18 = vsel %vm1432_vm5, %v2431_v26, %v2430_v1 }
 0x1e7   :  { %2830 = vmatpush1.bf16.msra.mxu0 %v7354_v48  ;;  %v2462_v48 = vsel %vm1435_vm6, %v2461_v40, %v2460_v16  ;;  %v2434_v36 = vsel %vm1435_vm6, %v2433_v10, %v2432_v18  ;;  %v7372_v1 = vld [vmem:[#allocation4 + $0x600] ss:$16 sps:$4 sm:$0xff]   ;;  %v7410_v18 = vld [vmem:[#allocation4 + $0x6c4] ss:$16 sps:$4 sm:$0xff]  }
 0x1e8   :  { %2831 = vmatprep.subr.bf16.mxu0 %v7362_v42  ;;  %v5138_v46 = vsel %vm1426_vm3, %v5137_v58, %v5136_v5  ;;  %v5165_v42 = vrot.slane %v8695_v54, 4  ;;  %v7374_v54 = vld [vmem:[#allocation4 + $0x604] ss:$16 sps:$4 sm:$0xff]   ;;  %v2436_v50 = vsel %vm1438_vm7, %v2435_v21, %v2434_v36  ;;  %v7375_v21 = vld [vmem:[#allocation4 + $0x28] ss:$16 sps:$4 sm:$0xff]  }
 0x1e9   :  { %1876 = vmatpush1.bf16.msra.mxu1 %v7351_v47  ;;  %v5141_v47 = vrot.slane %v8617_v53, 2  ;;  %v5140_v24 = vsel %vm1429_vm4, %v5139_v28, %v5138_v46  ;;  %v7366_v53 = vld [vmem:[#allocation4 + $0x5e0] ss:$16 sps:$4 sm:$0xff]   ;;  %v7395_v46 = vld [vmem:[#allocation4 + $0x8c] ss:$16 sps:$4 sm:$0xff]  }
 0x1ea   :  { %1877 = vmatprep.subr.bf16.mxu1 %v7359_v52  ;;  %v5162_v52 = vsel %vm1420_vm1, %v5161_v63, %v5160_v37  ;;  %v7377_v63 = vld [vmem:[#allocation4 + $0x2c] ss:$16 sps:$4 sm:$0xff]   ;;  %v7378_v16 = vld [vmem:[#allocation4 + $0x620] ss:$16 sps:$4 sm:$0xff]   ;;  %v7411_v36 = vld [vmem:[#allocation4 + $0xe8] ss:$16 sps:$4 sm:$0xff]  }
 0x1eb   :  { %2832 = vmatpush1.bf16.msra.mxu0 %v7360_v43  ;;  %v5164_v40 = vsel %vm1423_vm2, %v5163_v15, %v5162_v52  ;;  %v5142_v55 = vsel %vm1432_vm5, %v5141_v47, %v5140_v24  ;;  %v2464_v43 = vsel %vm1438_vm7, %v2463_v60, %v2462_v48  ;;  %v7381_v60 = vld [vmem:[#allocation4 + $0x48] ss:$16 sps:$4 sm:$0xff]   ;;  %v7384_v5 = vld [vmem:[#allocation4 + $0x640] ss:$16 sps:$4 sm:$0xff]   ;;  %v7392_v47 = vld [vmem:[#allocation4 + $0x664] ss:$16 sps:$4 sm:$0xff]  }
 0x1ec   :  { %2833 = vmatprep.subr.bf16.mxu0 %v7368_v45  ;;  %v5144_v26 = vsel %vm1435_vm6, %v5143_v6, %v5142_v55  ;;  %v9097_v28 = vpack.c.b16 %v2464_v43, %v2436_v50  ;;  %v7387_v48 = vld [vmem:[#allocation4 + $0x68] ss:$16 sps:$4 sm:$0xff]   ;;  %v7398_v6 = vld [vmem:[#allocation4 + $0x684] ss:$16 sps:$4 sm:$0xff]   ;;  %v7396_v24 = vld [vmem:[#allocation4 + $0x680] ss:$16 sps:$4 sm:$0xff]  }
 0x1ed   :  { %1878 = vmatpush1.bf16.msra.mxu1 %v7357_v12  ;;  %v5166_v12 = vsel %vm1426_vm3, %v5165_v42, %v5164_v40  ;;  %v5145_v56 = vsel %vm1438_vm7, %v8646_v25, %v5144_v26  ;;  %v7383_v25 = vld [vmem:[#allocation4 + $0x4c] ss:$16 sps:$4 sm:$0xff]   ;;  %v7393_v15 = vld [vmem:[#allocation4 + $0x88] ss:$16 sps:$4 sm:$0xff]   ;;  %v7404_v42 = vld [vmem:[#allocation4 + $0x6a4] ss:$16 sps:$4 sm:$0xff]  }
 0x1ee   :  { %1879 = vmatprep.subr.bf16.mxu1 %v7365_v38  ;;  %v5168_v58 = vsel %vm1429_vm4, %v5167_v29, %v5166_v12  ;;  %v7380_v38 = vld [vmem:[#allocation4 + $0x624] ss:$16 sps:$4 sm:$0xff]   ;;  %v7401_v52 = vld [vmem:[#allocation4 + $0xac] ss:$16 sps:$4 sm:$0xff]   ;;  %v7399_v29 = vld [vmem:[#allocation4 + $0xa8] ss:$16 sps:$4 sm:$0xff]  }
 0x1ef   :  { %v5170_v3 = vsel %vm1432_vm5, %v5169_v8, %v5168_v58  ;;  %2834 = vmatpush1.bf16.msra.mxu0 %v7366_v53  ;;  %v7407_v53 = vld [vmem:[#allocation4 + $0xcc] ss:$16 sps:$4 sm:$0xff]   ;;  %v7405_v40 = vld [vmem:[#allocation4 + $0xc8] ss:$16 sps:$4 sm:$0xff]   ;;  %v7408_v8 = vld [vmem:[#allocation4 + $0x6c0] ss:$16 sps:$4 sm:$0xff]  }
 0x1f0   :  { %v5172_v10 = vsel %vm1435_vm6, %v5171_v31, %v5170_v3  ;;  %3342 = vmatprep.subr.bf16.mxu0 %v7374_v54  ;;  %v7413_v31 = vld [vmem:[#allocation4 + $0xec] ss:$16 sps:$4 sm:$0xff]   ;;  %v7414_v54 = vld [vmem:[#allocation4 + $0x6e0] ss:$16 sps:$4 sm:$0xff]   ;;  %v7422_v12 = vld [vmem:[#allocation4 + $0x704] ss:$16 sps:$4 sm:$0xff]  }
 0x1f1   :  { %1880 = vmatpush1.bf16.msra.mxu1 %v7363_v17  ;;  %v5173_v37 = vsel %vm1438_vm7, %v8800_v59, %v5172_v10  ;;  %v7386_v59 = vld [vmem:[#allocation4 + $0x644] ss:$16 sps:$4 sm:$0xff]   ;;  %v7402_v17 = vld [vmem:[#allocation4 + $0x6a0] ss:$16 sps:$4 sm:$0xff]   ;;  %v7419_v55 = vld [vmem:[#allocation4 + $0x10c] ss:$16 sps:$4 sm:$0xff]  }
 0x1f2   :  { %2315 = vmatprep.subr.bf16.mxu1 %v7371_v30  ;;  %v9103_v45 = vpack.c.b16 %v5173_v37, %v5145_v56  ;;  %2836 = vmatmul.mubr.bf16.vlgmr.msra.gmra.mrb[40].mxu0 %v9097_v28  ;;  %v7416_v30 = vld [vmem:[#allocation4 + $0x6e4] ss:$16 sps:$4 sm:$0xff]   ;;  %v7417_v43 = vld [vmem:[#allocation4 + $0x108] ss:$16 sps:$4 sm:$0xff]   ;;  %v7420_v26 = vld [vmem:[#allocation4 + $0x700] ss:$16 sps:$4 sm:$0xff]  }
 0x1f3   :  { %3343 = vmatpush1.bf16.msra.mxu0 %v7372_v1  ;;  %3374 = vmatprep.mubr.bf16.mxu0 %v8942_v51  ;;  %v7425_v58 = vld [vmem:[#allocation4 + $0x12c] ss:$16 sps:$4 sm:$0xff]   ;;  %v7428_v3 = vld [vmem:[#allocation4 + $0x724] ss:$16 sps:$4 sm:$0xff]   ;;  %v7426_v50 = vld [vmem:[#allocation4 + $0x720] ss:$16 sps:$4 sm:$0xff]  }
 0x1f4   :  { %1882 = vmatmul.mubr.bf16.vlgmr.msra.gmra.mrb[28].mxu1 %v8923_v22  ;;  %3344 = vmatprep.subr.bf16.mxu0 %v7380_v38  ;;  %v7389_v22 = vld [vmem:[#allocation4 + $0x6c] ss:$16 sps:$4 sm:$0xff]   ;;  %v7434_v1 = vld [vmem:[#allocation4 + $0x744] ss:$16 sps:$4 sm:$0xff]   ;;  %v7429_v56 = vld [vmem:[#allocation4 + $0x148] ss:$16 sps:$4 sm:$0xff]  }
 0x1f5   :  { %2316 = vmatpush1.bf16.msra.mxu1 %v7369_v39  ;;  %2347 = vmatprep.mubr.bf16.mxu1 %v8918_v41  ;;  %v7390_v41 = vld [vmem:[#allocation4 + $0x660] ss:$16 sps:$4 sm:$0xff]   ;;  %v7423_v39 = vld [vmem:[#allocation4 + $0x128] ss:$16 sps:$4 sm:$0xff]   ;;  %v7431_v10 = vld [vmem:[#allocation4 + $0x14c] ss:$16 sps:$4 sm:$0xff]  }
 0x1f6   :  { %2317 = vmatprep.subr.bf16.mxu1 %v7377_v63  ;;  %v7432_v37 = vld [vmem:[#allocation4 + $0x740] ss:$16 sps:$4 sm:$0xff]   ;;  %v7437_v63 = vld [vmem:[#allocation4 + $0x16c] ss:$16 sps:$4 sm:$0xff]   ;;  %v7440_v38 = vld [vmem:[#allocation4 + $0x764] ss:$16 sps:$4 sm:$0xff]  }
 0x1f7   :  { %3345 = vmatpush1.bf16.msra.mxu0 %v7378_v16  ;;  %v7438_v16 = vld [vmem:[#allocation4 + $0x760] ss:$16 sps:$4 sm:$0xff]  }
 0x1f8   :  { %3346 = vmatprep.subr.bf16.mxu0 %v7386_v59  ;;  %v7446_v59 = vld [vmem:[#allocation4 + $0x784] ss:$16 sps:$4 sm:$0xff]  }
 0x1f9   :  { %2318 = vmatpush1.bf16.msra.mxu1 %v7375_v21  ;;  %v7435_v21 = vld [vmem:[#allocation4 + $0x168] ss:$16 sps:$4 sm:$0xff]  }
 0x1fa   :  { %2319 = vmatprep.subr.bf16.mxu1 %v7383_v25  ;;  %v7443_v25 = vld [vmem:[#allocation4 + $0x18c] ss:$16 sps:$4 sm:$0xff]  }
 0x1fb   :  { %3347 = vmatpush1.bf16.msra.mxu0 %v7384_v5  ;;  %v2991_v5 = vrot.slane %v8680_v14, 2 }
 0x1fc   :  { %3348 = vmatprep.subr.bf16.mxu0 %v7392_v47  ;;  %v2993_v47 = vrot.slane %v8773_v9, 1 }
 0x1fd   :  { %2320 = vmatpush1.bf16.msra.mxu1 %v7381_v60  ;;  %v2990_v60 = vrot.slane %v8746_v27, 3 }
 0x1fe   :  { %2321 = vmatprep.subr.bf16.mxu1 %v7389_v22  ;;  %v7441_v22 = vld [vmem:[#allocation4 + $0x188] ss:$16 sps:$4 sm:$0xff]  }
 0x1ff   :  { %3349 = vmatpush1.bf16.msra.mxu0 %v7390_v41  ;;  %v7449_v41 = vld [vmem:[#allocation4 + $0x1ac] ss:$16 sps:$4 sm:$0xff]  }
 0x200   :  { %3350 = vmatprep.subr.bf16.mxu0 %v7398_v6  ;;  %v2963_v6 = vrot.slane %v8606_v33, 2 }
 0x201   :  { %2322 = vmatpush1.bf16.msra.mxu1 %v7387_v48  ;;  %v7444_v48 = vld [vmem:[#allocation4 + $0x780] ss:$16 sps:$4 sm:$0xff]  }
 0x202   :  { %2323 = vmatprep.subr.bf16.mxu1 %v7395_v46  ;;  %v7452_v46 = vld [vmem:[#allocation4 + $0x7a4] ss:$16 sps:$4 sm:$0xff]  }
 0x203   :  { %3351 = vmatpush1.bf16.msra.mxu0 %v7396_v24  ;;  %v7447_v24 = vld [vmem:[#allocation4 + $0x1a8] ss:$16 sps:$4 sm:$0xff]  }
 0x204   :  { %3352 = vmatprep.subr.bf16.mxu0 %v7404_v42 }
 0x205   :  { %2324 = vmatpush1.bf16.msra.mxu1 %v7393_v15  ;;  %v2992_v15 = vsel %vm1420_vm1, %v2991_v5, %v2990_v60  ;;  %v7470_v5 = vld [vmem:[#allocation4 + $0x804] ss:$16 sps:$4 sm:$0xff]  }
 0x206   :  { %2325 = vmatprep.subr.bf16.mxu1 %v7401_v52  ;;  %v2965_v52 = vrot.slane %v8621_v57, 1  ;;  %v2994_v42 = vsel %vm1423_vm2, %v2993_v47, %v2992_v15  ;;  %v7465_v47 = vld [vmem:[#allocation4 + $0x408] ss:$16 sps:$4 sm:$0xff]   ;;  %v7476_v15 = vld [vmem:[#allocation4 + $0x824] ss:$16 sps:$4 sm:$0xff]  }
 0x207   :  { %3353 = vmatpush1.bf16.msra.mxu0 %v7402_v17  ;;  %v7450_v17 = vld [vmem:[#allocation4 + $0x7a0] ss:$16 sps:$4 sm:$0xff]  }
 0x208   :  { %3354 = vmatprep.subr.bf16.mxu0 %v7410_v18  ;;  %v2962_v18 = vrot.slane %v8604_v32, 3 }
 0x209   :  { %2326 = vmatpush1.bf16.msra.mxu1 %v7399_v29  ;;  %v2996_v29 = vrot.slane %v8824_v13, 7 }
 0x20a   :  { %2327 = vmatprep.subr.bf16.mxu1 %v7407_v53  ;;  %v7455_v53 = vld [vmem:[#allocation4 + $0x1cc] ss:$16 sps:$4 sm:$0xff]  }
 0x20b   :  { %3355 = vmatpush1.bf16.msra.mxu0 %v7408_v8  ;;  %v2968_v8 = vrot.slane %v8674_v4, 7 }
 0x20c   :  { %3356 = vmatprep.subr.bf16.mxu0 %v7416_v30  ;;  %v2995_v30 = vsel %vm1426_vm3, %v8713_v19, %v2994_v42  ;;  %v7479_v42 = vld [vmem:[#allocation4 + $0x44c] ss:$16 sps:$4 sm:$0xff]  }
 0x20d   :  { %2328 = vmatpush1.bf16.msra.mxu1 %v7405_v40  ;;  %v7458_v40 = vld [vmem:[#allocation4 + $0x7c4] ss:$16 sps:$4 sm:$0xff]  }
 0x20e   :  { %2329 = vmatprep.subr.bf16.mxu1 %v7413_v31  ;;  %v2964_v31 = vsel %vm1420_vm1, %v2963_v6, %v2962_v18  ;;  %v7473_v6 = vld [vmem:[#allocation4 + $0x42c] ss:$16 sps:$4 sm:$0xff]   ;;  %v7488_v18 = vld [vmem:[#allocation4 + $0x864] ss:$16 sps:$4 sm:$0xff]  }
 0x20f   :  { %3357 = vmatpush1.bf16.msra.mxu0 %v7414_v54  ;;  %v7453_v54 = vld [vmem:[#allocation4 + $0x1c8] ss:$16 sps:$4 sm:$0xff]  }
 0x210   :  { %3358 = vmatprep.subr.bf16.mxu0 %v7422_v12  ;;  %v2997_v12 = vsel %vm1429_vm4, %v2996_v29, %v2995_v30  ;;  %v7482_v29 = vld [vmem:[#allocation4 + $0x844] ss:$16 sps:$4 sm:$0xff]   ;;  %v7489_v30 = vld [vmem:[#allocation4 + $0x488] ss:$16 sps:$4 sm:$0xff]  }
 0x211   :  { %2330 = vmatpush1.bf16.msra.mxu1 %v7411_v36  ;;  %v2998_v36 = vrot.slane %v8753_v7, 6 }
 0x212   :  { %2331 = vmatprep.subr.bf16.mxu1 %v7419_v55  ;;  %v2966_v55 = vsel %vm1423_vm2, %v2965_v52, %v2964_v31  ;;  %v7474_v52 = vld [vmem:[#allocation4 + $0x820] ss:$16 sps:$4 sm:$0xff]   ;;  %v7494_v31 = vld [vmem:[#allocation4 + $0x884] ss:$16 sps:$4 sm:$0xff]  }
 0x213   :  { %3359 = vmatpush1.bf16.msra.mxu0 %v7420_v26  ;;  %v7456_v26 = vld [vmem:[#allocation4 + $0x7c0] ss:$16 sps:$4 sm:$0xff]  }
 0x214   :  { %3360 = vmatprep.subr.bf16.mxu0 %v7428_v3  ;;  %v2967_v3 = vsel %vm1426_vm3, %v8655_v35, %v2966_v55  ;;  %v7500_v55 = vld [vmem:[#allocation4 + $0x8a4] ss:$16 sps:$4 sm:$0xff]  }
 0x215   :  { %2332 = vmatpush1.bf16.msra.mxu1 %v7417_v43  ;;  %v3000_v43 = vrot.slane %v8869_v34, 5 }
 0x216   :  { %2333 = vmatprep.subr.bf16.mxu1 %v7425_v58  ;;  %v7461_v58 = vld [vmem:[#allocation4 + $0x1ec] ss:$16 sps:$4 sm:$0xff]  }
 0x217   :  { %3361 = vmatpush1.bf16.msra.mxu0 %v7426_v50  ;;  %v7464_v50 = vld [vmem:[#allocation4 + $0x7e4] ss:$16 sps:$4 sm:$0xff]  }
 0x218   :  { %3362 = vmatprep.subr.bf16.mxu0 %v7434_v1  ;;  %v2972_v1 = vrot.slane %v8701_v62, 5 }
 0x219   :  { %2334 = vmatpush1.bf16.msra.mxu1 %v7423_v39  ;;  %v2970_v39 = vrot.slane %v8623_v61, 6 }
 0x21a   :  { %2335 = vmatprep.subr.bf16.mxu1 %v7431_v10  ;;  %v2969_v10 = vsel %vm1429_vm4, %v2968_v8, %v2967_v3  ;;  %v7491_v8 = vld [vmem:[#allocation4 + $0x48c] ss:$16 sps:$4 sm:$0xff]   ;;  %v7501_v3 = vld [vmem:[#allocation4 + $0x4c8] ss:$16 sps:$4 sm:$0xff]  }
 0x21b   :  { %3363 = vmatpush1.bf16.msra.mxu0 %v7432_v37  ;;  %v3002_v37 = vrot.slane %v8798_v11, 4 }
 0x21c   :  { %3364 = vmatprep.subr.bf16.mxu0 %v7440_v38 }
 0x21d   :  { %2336 = vmatpush1.bf16.msra.mxu1 %v7429_v56  ;;  %v2999_v56 = vsel %vm1432_vm5, %v2998_v36, %v2997_v12  ;;  %v7492_v36 = vld [vmem:[#allocation4 + $0x880] ss:$16 sps:$4 sm:$0xff]   ;;  %v7495_v12 = vld [vmem:[#allocation4 + $0x4a8] ss:$16 sps:$4 sm:$0xff]  }
 0x21e   :  { %2337 = vmatprep.subr.bf16.mxu1 %v7437_v63  ;;  %v7459_v63 = vld [vmem:[#allocation4 + $0x1e8] ss:$16 sps:$4 sm:$0xff]   ;;  %v3001_v38 = vsel %vm1435_vm6, %v3000_v43, %v2999_v56  ;;  %v7498_v43 = vld [vmem:[#allocation4 + $0x8a0] ss:$16 sps:$4 sm:$0xff]  }
 0x21f   :  { %3365 = vmatpush1.bf16.msra.mxu0 %v7438_v16  ;;  %v7467_v16 = vld [vmem:[#allocation4 + $0x40c] ss:$16 sps:$4 sm:$0xff]   ;;  %v7510_v56 = vld [vmem:[#allocation4 + $0x8e0] ss:$16 sps:$4 sm:$0xff]  }
 0x220   :  { %3366 = vmatprep.subr.bf16.mxu0 %v7446_v59  ;;  %v2974_v59 = vrot.slane %v9352_v2, 4 }
 0x221   :  { %2338 = vmatpush1.bf16.msra.mxu1 %v7435_v21  ;;  %v7462_v21 = vld [vmem:[#allocation4 + $0x7e0] ss:$16 sps:$4 sm:$0xff]  }
 0x222   :  { %2339 = vmatprep.subr.bf16.mxu1 %v7443_v25  ;;  %v2971_v25 = vsel %vm1432_vm5, %v2970_v39, %v2969_v10  ;;  %v7504_v39 = vld [vmem:[#allocation4 + $0x8c0] ss:$16 sps:$4 sm:$0xff]   ;;  %v7512_v10 = vld [vmem:[#allocation4 + $0x8e4] ss:$16 sps:$4 sm:$0xff]  }
 0x223   :  { %3367 = vmatpush1.bf16.msra.mxu0 %v7444_v48  ;;  %v2973_v60 = vsel %vm1435_vm6, %v2972_v1, %v2971_v25  ;;  %v7507_v1 = vld [vmem:[#allocation4 + $0x4e8] ss:$16 sps:$4 sm:$0xff]   ;;  %v7524_v25 = vld [vmem:[#allocation4 + $0x924] ss:$16 sps:$4 sm:$0xff]  }
 0x224   :  { %3368 = vmatprep.subr.bf16.mxu0 %v7452_v46  ;;  %v2975_v48 = vsel %vm1438_vm7, %v2974_v59, %v2973_v60  ;;  %v7519_v59 = vld [vmem:[#allocation4 + $0x528] ss:$16 sps:$4 sm:$0xff]   ;;  %v7522_v60 = vld [vmem:[#allocation4 + $0x920] ss:$16 sps:$4 sm:$0xff]  }
 0x225   :  { %2340 = vmatpush1.bf16.msra.mxu1 %v7441_v22  ;;  %v3003_v22 = vsel %vm1438_vm7, %v3002_v37, %v3001_v38  ;;  %v7515_v37 = vld [vmem:[#allocation4 + $0x50c] ss:$16 sps:$4 sm:$0xff]   ;;  %v7513_v38 = vld [vmem:[#allocation4 + $0x508] ss:$16 sps:$4 sm:$0xff]  }
 0x226   :  { %2341 = vmatprep.subr.bf16.mxu1 %v7449_v41  ;;  %v7468_v41 = vld [vmem:[#allocation4 + $0x800] ss:$16 sps:$4 sm:$0xff]   ;;  %v9139_v46 = vpack.c.b16 %v3003_v22, %v2975_v48  ;;  %v7530_v22 = vld [vmem:[#allocation4 + $0x944] ss:$16 sps:$4 sm:$0xff]  }
 0x227   :  { %3369 = vmatpush1.bf16.msra.mxu0 %v7450_v17  ;;  %v7477_v17 = vld [vmem:[#allocation4 + $0x448] ss:$16 sps:$4 sm:$0xff]   ;;  %v7528_v48 = vld [vmem:[#allocation4 + $0x940] ss:$16 sps:$4 sm:$0xff]  }
 0x228   :  { %3370 = vmatprep.subr.bf16.mxu0 %v7458_v40  ;;  %v7483_v40 = vld [vmem:[#allocation4 + $0x468] ss:$16 sps:$4 sm:$0xff]  }
 0x229   :  { %2342 = vmatpush1.bf16.msra.mxu1 %v7447_v24  ;;  %v7471_v24 = vld [vmem:[#allocation4 + $0x428] ss:$16 sps:$4 sm:$0xff]  }
 0x22a   :  { %2343 = vmatprep.subr.bf16.mxu1 %v7455_v53  ;;  %v7485_v53 = vld [vmem:[#allocation4 + $0x46c] ss:$16 sps:$4 sm:$0xff]  }
 0x22b   :  { %3371 = vmatpush1.bf16.msra.mxu0 %v7456_v26  ;;  %v7503_v26 = vld [vmem:[#allocation4 + $0x4cc] ss:$16 sps:$4 sm:$0xff]  }
 0x22c   :  { %3372 = vmatprep.subr.bf16.mxu0 %v7464_v50  ;;  %v7509_v50 = vld [vmem:[#allocation4 + $0x4ec] ss:$16 sps:$4 sm:$0xff]  }
 0x22d   :  { %2344 = vmatpush1.bf16.msra.mxu1 %v7453_v54  ;;  %v7497_v54 = vld [vmem:[#allocation4 + $0x4ac] ss:$16 sps:$4 sm:$0xff]  }
 0x22e   :  { %2345 = vmatprep.subr.bf16.mxu1 %v7461_v58  ;;  %v7506_v58 = vld [vmem:[#allocation4 + $0x8c4] ss:$16 sps:$4 sm:$0xff]  }
 0x22f   :  { %3373 = vmatpush1.bf16.msra.mxu0 %v7462_v21  ;;  %v7516_v21 = vld [vmem:[#allocation4 + $0x900] ss:$16 sps:$4 sm:$0xff]  }
 0x230   :  { %3881 = vmatprep.subr.bf16.mxu0 %v7470_v5  ;;  %v7527_v5 = vld [vmem:[#allocation4 + $0x54c] ss:$16 sps:$4 sm:$0xff]  }
 0x231   :  { %2346 = vmatpush1.bf16.msra.mxu1 %v7459_v63  ;;  %v7518_v63 = vld [vmem:[#allocation4 + $0x904] ss:$16 sps:$4 sm:$0xff]  }
 0x232   :  { %2846 = vmatprep.subr.bf16.mxu1 %v7467_v16  ;;  %3375 = vmatmul.mubr.bf16.vlgmr.msra.gmra.mrb[40].mxu0 %v9139_v46  ;;  %v7521_v16 = vld [vmem:[#allocation4 + $0x52c] ss:$16 sps:$4 sm:$0xff]  }
 0x233   :  { %3882 = vmatpush1.bf16.msra.mxu0 %v7468_v41  ;;  %3913 = vmatprep.mubr.bf16.mxu0 %v8975_v0  ;;  %v7533_v41 = vld [vmem:[#allocation4 + $0x56c] ss:$16 sps:$4 sm:$0xff]  }
 0x234   :  { %2348 = vmatmul.mubr.bf16.vlgmr.msra.gmra.mrb[28].mxu1 %v8926_v20  ;;  %3883 = vmatprep.subr.bf16.mxu0 %v7476_v15  ;;  %v7480_v20 = vld [vmem:[#allocation4 + $0x840] ss:$16 sps:$4 sm:$0xff]   ;;  %v7531_v15 = vld [vmem:[#allocation4 + $0x568] ss:$16 sps:$4 sm:$0xff]  }
 0x235   :  { %2847 = vmatpush1.bf16.msra.mxu1 %v7465_v47  ;;  %2878 = vmatprep.mubr.bf16.mxu1 %v8934_v49  ;;  %v7486_v49 = vld [vmem:[#allocation4 + $0x860] ss:$16 sps:$4 sm:$0xff]   ;;  %v7525_v47 = vld [vmem:[#allocation4 + $0x548] ss:$16 sps:$4 sm:$0xff]  }
 0x236   :  { %2848 = vmatprep.subr.bf16.mxu1 %v7473_v6  ;;  %v7536_v6 = vld [vmem:[#allocation4 + $0x964] ss:$16 sps:$4 sm:$0xff]  }
 0x237   :  { %3884 = vmatpush1.bf16.msra.mxu0 %v7474_v52  ;;  %v7539_v52 = vld [vmem:[#allocation4 + $0x58c] ss:$16 sps:$4 sm:$0xff]  }
 0x238   :  { %3885 = vmatprep.subr.bf16.mxu0 %v7482_v29  ;;  %v3529_v29 = vrot.slane %v8746_v27, 4 }
 0x239   :  { %2849 = vmatpush1.bf16.msra.mxu1 %v7471_v24  ;;  %v7534_v24 = vld [vmem:[#allocation4 + $0x960] ss:$16 sps:$4 sm:$0xff]  }
 0x23a   :  { %2850 = vmatprep.subr.bf16.mxu1 %v7479_v42  ;;  %v7542_v42 = vld [vmem:[#allocation4 + $0x984] ss:$16 sps:$4 sm:$0xff]  }
 0x23b   :  { %3886 = vmatpush1.bf16.msra.mxu0 %v7480_v20  ;;  %v7537_v20 = vld [vmem:[#allocation4 + $0x588] ss:$16 sps:$4 sm:$0xff]  }
 0x23c   :  { %3887 = vmatprep.subr.bf16.mxu0 %v7488_v18  ;;  %v7540_v18 = vld [vmem:[#allocation4 + $0x980] ss:$16 sps:$4 sm:$0xff]  }
 0x23d   :  { %2851 = vmatpush1.bf16.msra.mxu1 %v7477_v17  ;;  %v3530_v17 = vrot.slane %v8680_v14, 3 }
 0x23e   :  { %2852 = vmatprep.subr.bf16.mxu1 %v7485_v53  ;;  %v3532_v53 = vrot.slane %v8773_v9, 2 }
 0x23f   :  { %3888 = vmatpush1.bf16.msra.mxu0 %v7486_v49  ;;  %v7548_v49 = vld [vmem:[#allocation4 + $0x9a4] ss:$16 sps:$4 sm:$0xff]  }
 0x240   :  { %3889 = vmatprep.subr.bf16.mxu0 %v7494_v31  ;;  %v3531_v31 = vsel %vm1420_vm1, %v3530_v17, %v3529_v29  ;;  %v7566_v29 = vld [vmem:[#allocation4 + $0xa04] ss:$16 sps:$4 sm:$0xff]  }
 0x241   :  { %2853 = vmatpush1.bf16.msra.mxu1 %v7483_v40  ;;  %v7545_v40 = vld [vmem:[#allocation4 + $0x5ac] ss:$16 sps:$4 sm:$0xff]  }
 0x242   :  { %2854 = vmatprep.subr.bf16.mxu1 %v7491_v8  ;;  %v3502_v8 = vrot.slane %v8606_v33, 3 }
 0x243   :  { %3890 = vmatpush1.bf16.msra.mxu0 %v7492_v36  ;;  %v7543_v36 = vld [vmem:[#allocation4 + $0x5a8] ss:$16 sps:$4 sm:$0xff]  }
 0x244   :  { %3891 = vmatprep.subr.bf16.mxu0 %v7500_v55  ;;  %v3533_v55 = vsel %vm1423_vm2, %v3532_v53, %v3531_v31  ;;  %v7567_v31 = vld [vmem:[#allocation4 + $0x628] ss:$16 sps:$4 sm:$0xff]  }
 0x245   :  { %2855 = vmatpush1.bf16.msra.mxu1 %v7489_v30  ;;  %v3534_v30 = vrot.slane %v8713_v19, 1 }
 0x246   :  { %2856 = vmatprep.subr.bf16.mxu1 %v7497_v54  ;;  %v3504_v54 = vrot.slane %v8621_v57, 2 }
 0x247   :  { %3892 = vmatpush1.bf16.msra.mxu0 %v7498_v43  ;;  %v7551_v43 = vld [vmem:[#allocation4 + $0x5cc] ss:$16 sps:$4 sm:$0xff]  }
 0x248   :  { %3893 = vmatprep.subr.bf16.mxu0 %v7506_v58  ;;  %v3506_v58 = vrot.slane %v8655_v35, 1 }
 0x249   :  { %2857 = vmatpush1.bf16.msra.mxu1 %v7495_v12  ;;  %v7546_v12 = vld [vmem:[#allocation4 + $0x9a0] ss:$16 sps:$4 sm:$0xff]  }
 0x24a   :  { %2858 = vmatprep.subr.bf16.mxu1 %v7503_v26  ;;  %v3501_v26 = vrot.slane %v8604_v32, 4 }
 0x24b   :  { %3894 = vmatpush1.bf16.msra.mxu0 %v7504_v39 }
 0x24c   :  { %3895 = vmatprep.subr.bf16.mxu0 %v7512_v10  ;;  %v3503_v39 = vsel %vm1420_vm1, %v3502_v8, %v3501_v26  ;;  %v3537_v10 = vrot.slane %v8753_v7, 7  ;;  %v7572_v8 = vld [vmem:[#allocation4 + $0xa24] ss:$16 sps:$4 sm:$0xff]   ;;  %v7579_v26 = vld [vmem:[#allocation4 + $0x668] ss:$16 sps:$4 sm:$0xff]  }
 0x24d   :  { %2859 = vmatpush1.bf16.msra.mxu1 %v7501_v3  ;;  %v7554_v3 = vld [vmem:[#allocation4 + $0x9c4] ss:$16 sps:$4 sm:$0xff]  }
 0x24e   :  { %2860 = vmatprep.subr.bf16.mxu1 %v7509_v50  ;;  %v3535_v50 = vsel %vm1426_vm3, %v3534_v30, %v3533_v55  ;;  %v7570_v30 = vld [vmem:[#allocation4 + $0xa20] ss:$16 sps:$4 sm:$0xff]   ;;  %v7573_v55 = vld [vmem:[#allocation4 + $0x648] ss:$16 sps:$4 sm:$0xff]  }
 0x24f   :  { %3896 = vmatpush1.bf16.msra.mxu0 %v7510_v56  ;;  %v3505_v56 = vsel %vm1423_vm2, %v3504_v54, %v3503_v39  ;;  %v7578_v54 = vld [vmem:[#allocation4 + $0xa44] ss:$16 sps:$4 sm:$0xff]   ;;  %v7585_v39 = vld [vmem:[#allocation4 + $0x688] ss:$16 sps:$4 sm:$0xff]  }
 0x250   :  { %3897 = vmatprep.subr.bf16.mxu0 %v7518_v63  ;;  %v3539_v63 = vrot.slane %v8869_v34, 6 }
 0x251   :  { %2861 = vmatpush1.bf16.msra.mxu1 %v7507_v1  ;;  %v7549_v1 = vld [vmem:[#allocation4 + $0x5c8] ss:$16 sps:$4 sm:$0xff]  }
 0x252   :  { %2862 = vmatprep.subr.bf16.mxu1 %v7515_v37  ;;  %v3536_v37 = vsel %vm1429_vm4, %v8824_v13, %v3535_v50  ;;  %v7588_v50 = vld [vmem:[#allocation4 + $0xa80] ss:$16 sps:$4 sm:$0xff]  }
 0x253   :  { %3898 = vmatpush1.bf16.msra.mxu0 %v7516_v21  ;;  %v7557_v21 = vld [vmem:[#allocation4 + $0x5ec] ss:$16 sps:$4 sm:$0xff]  }
 0x254   :  { %3899 = vmatprep.subr.bf16.mxu0 %v7524_v25  ;;  %v3509_v25 = vrot.slane %v8623_v61, 7 }
 0x255   :  { %2863 = vmatpush1.bf16.msra.mxu1 %v7513_v38  ;;  %v7552_v38 = vld [vmem:[#allocation4 + $0x9c0] ss:$16 sps:$4 sm:$0xff]  }
 0x256   :  { %2864 = vmatprep.subr.bf16.mxu1 %v7521_v16  ;;  %v3507_v16 = vsel %vm1426_vm3, %v3506_v58, %v3505_v56  ;;  %v7587_v58 = vld [vmem:[#allocation4 + $0x68c] ss:$16 sps:$4 sm:$0xff]   ;;  %v7591_v56 = vld [vmem:[#allocation4 + $0x6a8] ss:$16 sps:$4 sm:$0xff]  }
 0x257   :  { %3900 = vmatpush1.bf16.msra.mxu0 %v7522_v60  ;;  %v3508_v60 = vsel %vm1429_vm4, %v8674_v4, %v3507_v16 }
 0x258   :  { %3901 = vmatprep.subr.bf16.mxu0 %v7530_v22  ;;  %v3538_v22 = vsel %vm1432_vm5, %v3537_v10, %v3536_v37  ;;  %v7593_v10 = vld [vmem:[#allocation4 + $0x6ac] ss:$16 sps:$4 sm:$0xff]   ;;  %v7594_v37 = vld [vmem:[#allocation4 + $0xaa0] ss:$16 sps:$4 sm:$0xff]  }
 0x259   :  { %2865 = vmatpush1.bf16.msra.mxu1 %v7519_v59  ;;  %v7560_v59 = vld [vmem:[#allocation4 + $0x9e4] ss:$16 sps:$4 sm:$0xff]  }
 0x25a   :  { %2866 = vmatprep.subr.bf16.mxu1 %v7527_v5  ;;  %v3511_v5 = vrot.slane %v8701_v62, 6 }
 0x25b   :  { %3902 = vmatpush1.bf16.msra.mxu0 %v7528_v48  ;;  %v7555_v48 = vld [vmem:[#allocation4 + $0x5e8] ss:$16 sps:$4 sm:$0xff]  }
 0x25c   :  { %3903 = vmatprep.subr.bf16.mxu0 %v7536_v6  ;;  %v7558_v6 = vld [vmem:[#allocation4 + $0x9e0] ss:$16 sps:$4 sm:$0xff]  }
 0x25d   :  { %2867 = vmatpush1.bf16.msra.mxu1 %v7525_v47  ;;  %v3541_v47 = vrot.slane %v8798_v11, 5 }
 0x25e   :  { %2868 = vmatprep.subr.bf16.mxu1 %v7533_v41  ;;  %v3540_v41 = vsel %vm1435_vm6, %v3539_v63, %v3538_v22  ;;  %v7599_v63 = vld [vmem:[#allocation4 + $0x6cc] ss:$16 sps:$4 sm:$0xff]  }
 0x25f   :  { %3904 = vmatpush1.bf16.msra.mxu0 %v7534_v24  ;;  %v3510_v24 = vsel %vm1432_vm5, %v3509_v25, %v3508_v60  ;;  %v3542_v17 = vsel %vm1438_vm7, %v3541_v47, %v3540_v41  ;;  %v7605_v22 = vld [vmem:[#allocation4 + $0x6ec] ss:$16 sps:$4 sm:$0xff]   ;;  %v7608_v47 = vld [vmem:[#allocation4 + $0xae4] ss:$16 sps:$4 sm:$0xff]   ;;  %v7606_v41 = vld [vmem:[#allocation4 + $0xae0] ss:$16 sps:$4 sm:$0xff]  }
 0x260   :  { %3905 = vmatprep.subr.bf16.mxu0 %v7542_v42  ;;  %v3512_v42 = vsel %vm1435_vm6, %v3511_v5, %v3510_v24  ;;  %v7600_v5 = vld [vmem:[#allocation4 + $0xac0] ss:$16 sps:$4 sm:$0xff]   ;;  %v7609_v24 = vld [vmem:[#allocation4 + $0x708] ss:$16 sps:$4 sm:$0xff]  }
 0x261   :  { %2869 = vmatpush1.bf16.msra.mxu1 %v7531_v15  ;;  %v7563_v15 = vld [vmem:[#allocation4 + $0x60c] ss:$16 sps:$4 sm:$0xff]  }
 0x262   :  { %2870 = vmatprep.subr.bf16.mxu1 %v7539_v52  ;;  %v3513_v52 = vrot.slane %v9352_v2, 5 }
 0x263   :  { %3906 = vmatpush1.bf16.msra.mxu0 %v7540_v18  ;;  %v7564_v18 = vld [vmem:[#allocation4 + $0xa00] ss:$16 sps:$4 sm:$0xff]  }
 0x264   :  { %3907 = vmatprep.subr.bf16.mxu0 %v7548_v49  ;;  %v3514_v53 = vsel %vm1438_vm7, %v3513_v52, %v3512_v42  ;;  %v7569_v49 = vld [vmem:[#allocation4 + $0x62c] ss:$16 sps:$4 sm:$0xff]   ;;  %v7612_v52 = vld [vmem:[#allocation4 + $0xb00] ss:$16 sps:$4 sm:$0xff]  }
 0x265   :  { %2871 = vmatpush1.bf16.msra.mxu1 %v7537_v20  ;;  %v7561_v20 = vld [vmem:[#allocation4 + $0x608] ss:$16 sps:$4 sm:$0xff]   ;;  %v7617_v42 = vld [vmem:[#allocation4 + $0x72c] ss:$16 sps:$4 sm:$0xff]  }
 0x266   :  { %2872 = vmatprep.subr.bf16.mxu1 %v7545_v40  ;;  %v9175_v40 = vpack.c.b16 %v3542_v17, %v3514_v53  ;;  %v7615_v17 = vld [vmem:[#allocation4 + $0x728] ss:$16 sps:$4 sm:$0xff]   ;;  %v7623_v53 = vld [vmem:[#allocation4 + $0x74c] ss:$16 sps:$4 sm:$0xff]  }
 0x267   :  { %3908 = vmatpush1.bf16.msra.mxu0 %v7546_v12  ;;  %v7581_v12 = vld [vmem:[#allocation4 + $0x66c] ss:$16 sps:$4 sm:$0xff]  }
 0x268   :  { %3909 = vmatprep.subr.bf16.mxu0 %v7554_v3  ;;  %v7590_v3 = vld [vmem:[#allocation4 + $0xa84] ss:$16 sps:$4 sm:$0xff]  }
 0x269   :  { %2873 = vmatpush1.bf16.msra.mxu1 %v7543_v36  ;;  %v7575_v36 = vld [vmem:[#allocation4 + $0x64c] ss:$16 sps:$4 sm:$0xff]  }
 0x26a   :  { %2874 = vmatprep.subr.bf16.mxu1 %v7551_v43  ;;  %v7584_v43 = vld [vmem:[#allocation4 + $0xa64] ss:$16 sps:$4 sm:$0xff]  }
 0x26b   :  { %3910 = vmatpush1.bf16.msra.mxu0 %v7552_v38 }
 0x26c   :  { %3911 = vmatprep.subr.bf16.mxu0 %v7560_v59  ;;  %v7597_v59 = vld [vmem:[#allocation4 + $0x6c8] ss:$16 sps:$4 sm:$0xff]  }
 0x26d   :  { %2875 = vmatpush1.bf16.msra.mxu1 %v7549_v1  ;;  %v7596_v1 = vld [vmem:[#allocation4 + $0xaa4] ss:$16 sps:$4 sm:$0xff]  }
 0x26e   :  { %2876 = vmatprep.subr.bf16.mxu1 %v7557_v21  ;;  %v7602_v21 = vld [vmem:[#allocation4 + $0xac4] ss:$16 sps:$4 sm:$0xff]  }
 0x26f   :  { %3912 = vmatpush1.bf16.msra.mxu0 %v7558_v6  ;;  %v7611_v6 = vld [vmem:[#allocation4 + $0x70c] ss:$16 sps:$4 sm:$0xff]  }
 0x270   :  { %4420 = vmatprep.subr.bf16.mxu0 %v7566_v29  ;;  %v7620_v29 = vld [vmem:[#allocation4 + $0xb24] ss:$16 sps:$4 sm:$0xff]  }
 0x271   :  { %2877 = vmatpush1.bf16.msra.mxu1 %v7555_v48  ;;  %v7603_v48 = vld [vmem:[#allocation4 + $0x6e8] ss:$16 sps:$4 sm:$0xff]  }
 0x272   :  { %3385 = vmatprep.subr.bf16.mxu1 %v7563_v15  ;;  %3914 = vmatmul.mubr.bf16.vlgmr.msra.gmra.mrb[40].mxu0 %v9175_v40  ;;  %v7614_v15 = vld [vmem:[#allocation4 + $0xb04] ss:$16 sps:$4 sm:$0xff]  }
 0x273   :  { %4421 = vmatpush1.bf16.msra.mxu0 %v7564_v18  ;;  %4452 = vmatprep.mubr.bf16.mxu0 %v9007_v44  ;;  %v7626_v18 = vld [vmem:[#allocation4 + $0xb44] ss:$16 sps:$4 sm:$0xff]  }
 0x274   :  { %2879 = vmatmul.mubr.bf16.vlgmr.msra.gmra.mrb[28].mxu1 %v9097_v28  ;;  %4422 = vmatprep.subr.bf16.mxu0 %v7572_v8  ;;  %v7576_v28 = vld [vmem:[#allocation4 + $0xa40] ss:$16 sps:$4 sm:$0xff]  }
 0x275   :  { %3386 = vmatpush1.bf16.msra.mxu1 %v7561_v20  ;;  %3417 = vmatprep.mubr.bf16.mxu1 %v8942_v51  ;;  %v7582_v51 = vld [vmem:[#allocation4 + $0xa60] ss:$16 sps:$4 sm:$0xff]  }
 0x276   :  { %3387 = vmatprep.subr.bf16.mxu1 %v7569_v49  ;;  %v7618_v20 = vld [vmem:[#allocation4 + $0xb20] ss:$16 sps:$4 sm:$0xff]   ;;  %v7621_v49 = vld [vmem:[#allocation4 + $0x748] ss:$16 sps:$4 sm:$0xff]  }
 0x277   :  { %4423 = vmatpush1.bf16.msra.mxu0 %v7570_v30  ;;  %v7624_v8 = vld [vmem:[#allocation4 + $0xb40] ss:$16 sps:$4 sm:$0xff]   ;;  %v7632_v30 = vld [vmem:[#allocation4 + $0xb64] ss:$16 sps:$4 sm:$0xff]  }
 0x278   :  { %4424 = vmatprep.subr.bf16.mxu0 %v7578_v54  ;;  %v7630_v54 = vld [vmem:[#allocation4 + $0xb60] ss:$16 sps:$4 sm:$0xff]  }
 0x279   :  { %3388 = vmatpush1.bf16.msra.mxu1 %v7567_v31  ;;  %v7629_v31 = vld [vmem:[#allocation4 + $0x76c] ss:$16 sps:$4 sm:$0xff]  }
 0x27a   :  { %3389 = vmatprep.subr.bf16.mxu1 %v7575_v36  ;;  %v7627_v36 = vld [vmem:[#allocation4 + $0x768] ss:$16 sps:$4 sm:$0xff]  }
 0x27b   :  { %4425 = vmatpush1.bf16.msra.mxu0 %v7576_v28  ;;  %v7638_v28 = vld [vmem:[#allocation4 + $0xb84] ss:$16 sps:$4 sm:$0xff]  }
 0x27c   :  { %4426 = vmatprep.subr.bf16.mxu0 %v7584_v43  ;;  %v4069_v43 = vrot.slane %v8680_v14, 4 }
 0x27d   :  { %3390 = vmatpush1.bf16.msra.mxu1 %v7573_v55  ;;  %v7635_v55 = vld [vmem:[#allocation4 + $0x78c] ss:$16 sps:$4 sm:$0xff]  }
 0x27e   :  { %3391 = vmatprep.subr.bf16.mxu1 %v7581_v12  ;;  %v4068_v12 = vrot.slane %v8746_v27, 5 }
 0x27f   :  { %4427 = vmatpush1.bf16.msra.mxu0 %v7582_v51  ;;  %v4071_v51 = vrot.slane %v8773_v9, 3 }
 0x280   :  { %4428 = vmatprep.subr.bf16.mxu0 %v7590_v3  ;;  %v7641_v3 = vld [vmem:[#allocation4 + $0x7ac] ss:$16 sps:$4 sm:$0xff]  }
 0x281   :  { %3392 = vmatpush1.bf16.msra.mxu1 %v7579_v26  ;;  %v7633_v26 = vld [vmem:[#allocation4 + $0x788] ss:$16 sps:$4 sm:$0xff]  }
 0x282   :  { %3393 = vmatprep.subr.bf16.mxu1 %v7587_v58  ;;  %v7636_v58 = vld [vmem:[#allocation4 + $0xb80] ss:$16 sps:$4 sm:$0xff]  }
 0x283   :  { %4429 = vmatpush1.bf16.msra.mxu0 %v7588_v50  ;;  %v4041_v50 = vrot.slane %v8606_v33, 4 }
 0x284   :  { %4430 = vmatprep.subr.bf16.mxu0 %v7596_v1  ;;  %v4073_v1 = vrot.slane %v8713_v19, 2 }
 0x285   :  { %3394 = vmatpush1.bf16.msra.mxu1 %v7585_v39  ;;  %v7644_v39 = vld [vmem:[#allocation4 + $0xba4] ss:$16 sps:$4 sm:$0xff]  }
 0x286   :  { %3395 = vmatprep.subr.bf16.mxu1 %v7593_v10  ;;  %v4070_v10 = vsel %vm1420_vm1, %v4069_v43, %v4068_v12  ;;  %v4052_v43 = vrot.slane %v9352_v2, 6 }
 0x287   :  { %v9181_v38 = vpop.f32.mrb[24].mxu1  ;;  %4431 = vmatpush1.bf16.msra.mxu0 %v7594_v37  ;;  %v4043_v37 = vrot.slane %v8621_v57, 3 }
 0x288   :  { %v9183_v16 = vpop.f32.mrb[25].mxu1  ;;  %4432 = vmatprep.subr.bf16.mxu0 %v7602_v21  ;;  %v4075_v21 = vrot.slane %v8824_v13, 1 }
 0x289   :  { %3396 = vmatpush1.bf16.msra.mxu1 %v7591_v56  ;;  %v9185_v25 = vpop.f32.mrb[26].mxu1  ;;  %v7639_v56 = vld [vmem:[#allocation4 + $0x7a8] ss:$16 sps:$4 sm:$0xff]  }
 0x28a   :  { %v9187_v60 = vpop.f32.mrb[27].mxu1  ;;  %3397 = vmatprep.subr.bf16.mxu1 %v7599_v63  ;;  %v4072_v63 = vsel %vm1423_vm2, %v4071_v51, %v4070_v10  ;;  %v7662_v51 = vld [vmem:[#allocation4 + $0xc04] ss:$16 sps:$4 sm:$0xff]  }
 0x28b   :  { %4433 = vmatpush1.bf16.msra.mxu0 %v7600_v5  ;;  %v7647_v5 = vld [vmem:[#allocation4 + $0x7cc] ss:$16 sps:$4 sm:$0xff]  }
 0x28c   :  { %4434 = vmatprep.subr.bf16.mxu0 %v7608_v47  ;;  %v4045_v47 = vrot.slane %v8655_v35, 2 }
 0x28d   :  { %3398 = vmatpush1.bf16.msra.mxu1 %v7597_v59  ;;  %v7642_v59 = vld [vmem:[#allocation4 + $0xba0] ss:$16 sps:$4 sm:$0xff]  }
 0x28e   :  { %3399 = vmatprep.subr.bf16.mxu1 %v7605_v22  ;;  %v4040_v22 = vrot.slane %v8604_v32, 5 }
 0x28f   :  { %4435 = vmatpush1.bf16.msra.mxu0 %v7606_v41  ;;  %v4047_v41 = vrot.slane %v8674_v4, 1 }
 0x290   :  { %4436 = vmatprep.subr.bf16.mxu0 %v7614_v15  ;;  %v4074_v15 = vsel %vm1426_vm3, %v4073_v1, %v4072_v63  ;;  %v7665_v1 = vld [vmem:[#allocation4 + $0x82c] ss:$16 sps:$4 sm:$0xff]   ;;  %v7666_v63 = vld [vmem:[#allocation4 + $0xc20] ss:$16 sps:$4 sm:$0xff]  }
 0x291   :  { %3400 = vmatpush1.bf16.msra.mxu1 %v7603_v48  ;;  %v7650_v48 = vld [vmem:[#allocation4 + $0xbc4] ss:$16 sps:$4 sm:$0xff]  }
 0x292   :  { %3401 = vmatprep.subr.bf16.mxu1 %v7611_v6  ;;  %v4042_v6 = vsel %vm1420_vm1, %v4041_v50, %v4040_v22  ;;  %v7660_v50 = vld [vmem:[#allocation4 + $0xc00] ss:$16 sps:$4 sm:$0xff]   ;;  %v7677_v22 = vld [vmem:[#allocation4 + $0x86c] ss:$16 sps:$4 sm:$0xff]  }
 0x293   :  { %4437 = vmatpush1.bf16.msra.mxu0 %v7612_v52  ;;  %v4044_v52 = vsel %vm1423_vm2, %v4043_v37, %v4042_v6  ;;  %v7663_v37 = vld [vmem:[#allocation4 + $0x828] ss:$16 sps:$4 sm:$0xff]   ;;  %v7686_v6 = vld [vmem:[#allocation4 + $0xc84] ss:$16 sps:$4 sm:$0xff]  }
 0x294   :  { %4438 = vmatprep.subr.bf16.mxu0 %v7620_v29  ;;  %v4078_v29 = vrot.slane %v8869_v34, 7 }
 0x295   :  { %3402 = vmatpush1.bf16.msra.mxu1 %v7609_v24  ;;  %v7645_v24 = vld [vmem:[#allocation4 + $0x7c8] ss:$16 sps:$4 sm:$0xff]  }
 0x296   :  { %3403 = vmatprep.subr.bf16.mxu1 %v7617_v42  ;;  %v4076_v42 = vsel %vm1429_vm4, %v4075_v21, %v4074_v15  ;;  %v7671_v21 = vld [vmem:[#allocation4 + $0x84c] ss:$16 sps:$4 sm:$0xff]   ;;  %v7681_v15 = vld [vmem:[#allocation4 + $0x888] ss:$16 sps:$4 sm:$0xff]  }
 0x297   :  { %4439 = vmatpush1.bf16.msra.mxu0 %v7618_v20  ;;  %v7653_v20 = vld [vmem:[#allocation4 + $0x7ec] ss:$16 sps:$4 sm:$0xff]  }
 0x298   :  { %4440 = vmatprep.subr.bf16.mxu0 %v7626_v18  ;;  %v7656_v18 = vld [vmem:[#allocation4 + $0xbe4] ss:$16 sps:$4 sm:$0xff]  }
 0x299   :  { %3404 = vmatpush1.bf16.msra.mxu1 %v7615_v17  ;;  %v7648_v17 = vld [vmem:[#allocation4 + $0xbc0] ss:$16 sps:$4 sm:$0xff]  }
 0x29a   :  { %3405 = vmatprep.subr.bf16.mxu1 %v7623_v53  ;;  %v4046_v53 = vsel %vm1426_vm3, %v4045_v47, %v4044_v52  ;;  %v7680_v47 = vld [vmem:[#allocation4 + $0xc64] ss:$16 sps:$4 sm:$0xff]   ;;  %v7689_v52 = vld [vmem:[#allocation4 + $0x8ac] ss:$16 sps:$4 sm:$0xff]  }
 0x29b   :  { %4441 = vmatpush1.bf16.msra.mxu0 %v7624_v8  ;;  %v4050_v8 = vrot.slane %v8701_v62, 7 }
 0x29c   :  { %4442 = vmatprep.subr.bf16.mxu0 %v7632_v30  ;;  %v4080_v30 = vrot.slane %v8798_v11, 6 }
 0x29d   :  { %3406 = vmatpush1.bf16.msra.mxu1 %v7621_v49  ;;  %v4048_v49 = vsel %vm1429_vm4, %v4047_v41, %v4046_v53  ;;  %v7683_v41 = vld [vmem:[#allocation4 + $0x88c] ss:$16 sps:$4 sm:$0xff]   ;;  %v7698_v53 = vld [vmem:[#allocation4 + $0xcc4] ss:$16 sps:$4 sm:$0xff]  }
 0x29e   :  { %3407 = vmatprep.subr.bf16.mxu1 %v7629_v31  ;;  %v4077_v31 = vsel %vm1432_vm5, %v8753_v7, %v4076_v42  ;;  %v4049_v12 = vsel %vm1432_vm5, %v8623_v61, %v4048_v49  ;;  %v7692_v42 = vld [vmem:[#allocation4 + $0xca4] ss:$16 sps:$4 sm:$0xff]   ;;  %v7696_v49 = vld [vmem:[#allocation4 + $0xcc0] ss:$16 sps:$4 sm:$0xff]  }
 0x29f   :  { %4443 = vmatpush1.bf16.msra.mxu0 %v7630_v54  ;;  %v4079_v54 = vsel %vm1435_vm6, %v4078_v29, %v4077_v31  ;;  %v7687_v29 = vld [vmem:[#allocation4 + $0x8a8] ss:$16 sps:$4 sm:$0xff]   ;;  %v7704_v31 = vld [vmem:[#allocation4 + $0xce4] ss:$16 sps:$4 sm:$0xff]  }
 0x2a0   :  { %4444 = vmatprep.subr.bf16.mxu0 %v7638_v28  ;;  %v7659_v28 = vld [vmem:[#allocation4 + $0x80c] ss:$16 sps:$4 sm:$0xff]  }
 0x2a1   :  { %3408 = vmatpush1.bf16.msra.mxu1 %v7627_v36  ;;  %v7651_v36 = vld [vmem:[#allocation4 + $0x7e8] ss:$16 sps:$4 sm:$0xff]  }
 0x2a2   :  { %3409 = vmatprep.subr.bf16.mxu1 %v7635_v55  ;;  %v7654_v55 = vld [vmem:[#allocation4 + $0xbe0] ss:$16 sps:$4 sm:$0xff]  }
 0x2a3   :  { %4445 = vmatpush1.bf16.msra.mxu0 %v7636_v58  ;;  %v4081_v58 = vsel %vm1438_vm7, %v4080_v30, %v4079_v54  ;;  %v7699_v30 = vld [vmem:[#allocation4 + $0x8e8] ss:$16 sps:$4 sm:$0xff]   ;;  %v7707_v54 = vld [vmem:[#allocation4 + $0x90c] ss:$16 sps:$4 sm:$0xff]  }
 0x2a4   :  { %4446 = vmatprep.subr.bf16.mxu0 %v7644_v39 }
 0x2a5   :  { %3410 = vmatpush1.bf16.msra.mxu1 %v7633_v26  ;;  %v4051_v26 = vsel %vm1435_vm6, %v4050_v8, %v4049_v12  ;;  %v7701_v8 = vld [vmem:[#allocation4 + $0x8ec] ss:$16 sps:$4 sm:$0xff]   ;;  %v7708_v12 = vld [vmem:[#allocation4 + $0xd00] ss:$16 sps:$4 sm:$0xff]  }
 0x2a6   :  { %3411 = vmatprep.subr.bf16.mxu1 %v7641_v3  ;;  %v7657_v3 = vld [vmem:[#allocation4 + $0x808] ss:$16 sps:$4 sm:$0xff]   ;;  %v4053_v39 = vsel %vm1438_vm7, %v4052_v43, %v4051_v26  ;;  %v7713_v43 = vld [vmem:[#allocation4 + $0x92c] ss:$16 sps:$4 sm:$0xff]   ;;  %v7716_v26 = vld [vmem:[#allocation4 + $0xd24] ss:$16 sps:$4 sm:$0xff]  }
 0x2a7   :  { %4447 = vmatpush1.bf16.msra.mxu0 %v7642_v59  ;;  %v9219_v10 = vpack.c.b16 %v4081_v58, %v4053_v39  ;;  %v7674_v59 = vld [vmem:[#allocation4 + $0xc44] ss:$16 sps:$4 sm:$0xff]   ;;  %v7714_v58 = vld [vmem:[#allocation4 + $0xd20] ss:$16 sps:$4 sm:$0xff]  }
 0x2a8   :  { %4448 = vmatprep.subr.bf16.mxu0 %v7650_v48  ;;  %v7675_v48 = vld [vmem:[#allocation4 + $0x868] ss:$16 sps:$4 sm:$0xff]   ;;  %v7722_v39 = vld [vmem:[#allocation4 + $0xd44] ss:$16 sps:$4 sm:$0xff]  }
 0x2a9   :  { %3412 = vmatpush1.bf16.msra.mxu1 %v7639_v56  ;;  %v7668_v56 = vld [vmem:[#allocation4 + $0xc24] ss:$16 sps:$4 sm:$0xff]  }
 0x2aa   :  { %3413 = vmatprep.subr.bf16.mxu1 %v7647_v5  ;;  %v7669_v5 = vld [vmem:[#allocation4 + $0x848] ss:$16 sps:$4 sm:$0xff]  }
 0x2ab   :  { %4449 = vmatpush1.bf16.msra.mxu0 %v7648_v17  ;;  %v7690_v17 = vld [vmem:[#allocation4 + $0xca0] ss:$16 sps:$4 sm:$0xff]  }
 0x2ac   :  { %4450 = vmatprep.subr.bf16.mxu0 %v7656_v18  ;;  %v7693_v18 = vld [vmem:[#allocation4 + $0x8c8] ss:$16 sps:$4 sm:$0xff]  }
 0x2ad   :  { %3414 = vmatpush1.bf16.msra.mxu1 %v7645_v24  ;;  %v7684_v24 = vld [vmem:[#allocation4 + $0xc80] ss:$16 sps:$4 sm:$0xff]  }
 0x2ae   :  { %3415 = vmatprep.subr.bf16.mxu1 %v7653_v20  ;;  %v7695_v20 = vld [vmem:[#allocation4 + $0x8cc] ss:$16 sps:$4 sm:$0xff]  }
 0x2af   :  { %4451 = vmatpush1.bf16.msra.mxu0 %v7654_v55  ;;  %v7710_v55 = vld [vmem:[#allocation4 + $0xd04] ss:$16 sps:$4 sm:$0xff]  }
 0x2b0   :  { %4959 = vmatprep.subr.bf16.mxu0 %v7662_v51  ;;  %v7711_v51 = vld [vmem:[#allocation4 + $0x928] ss:$16 sps:$4 sm:$0xff]  }
 0x2b1   :  { %3416 = vmatpush1.bf16.msra.mxu1 %v7651_v36  ;;  %v7702_v36 = vld [vmem:[#allocation4 + $0xce0] ss:$16 sps:$4 sm:$0xff]  }
 0x2b2   :  { %3924 = vmatprep.subr.bf16.mxu1 %v7659_v28  ;;  %4453 = vmatmul.mubr.bf16.vlgmr.msra.gmra.mrb[40].mxu0 %v9219_v10  ;;  %v7705_v28 = vld [vmem:[#allocation4 + $0x908] ss:$16 sps:$4 sm:$0xff]  }
 0x2b3   :  { %4960 = vmatpush1.bf16.msra.mxu0 %v7660_v50  ;;  %4991 = vmatprep.mubr.bf16.mxu0 %v9049_v23  ;;  %v7717_v50 = vld [vmem:[#allocation4 + $0x948] ss:$16 sps:$4 sm:$0xff]  }
 0x2b4   :  { %3418 = vmatmul.mubr.bf16.vlgmr.msra.gmra.mrb[28].mxu1 %v9139_v46  ;;  %4961 = vmatprep.subr.bf16.mxu0 %v7668_v56  ;;  %v7672_v46 = vld [vmem:[#allocation4 + $0xc40] ss:$16 sps:$4 sm:$0xff]   ;;  %v7725_v56 = vld [vmem:[#allocation4 + $0x96c] ss:$16 sps:$4 sm:$0xff]  }
 0x2b5   :  { %3925 = vmatpush1.bf16.msra.mxu1 %v7657_v3  ;;  %3956 = vmatprep.mubr.bf16.mxu1 %v8975_v0  ;;  %v7678_v0 = vld [vmem:[#allocation4 + $0xc60] ss:$16 sps:$4 sm:$0xff]   ;;  %v7719_v3 = vld [vmem:[#allocation4 + $0x94c] ss:$16 sps:$4 sm:$0xff]  }
 0x2b6   :  { %3926 = vmatprep.subr.bf16.mxu1 %v7665_v1  ;;  %v7720_v1 = vld [vmem:[#allocation4 + $0xd40] ss:$16 sps:$4 sm:$0xff]  }
 0x2b7   :  { %4962 = vmatpush1.bf16.msra.mxu0 %v7666_v63  ;;  %v7723_v63 = vld [vmem:[#allocation4 + $0x968] ss:$16 sps:$4 sm:$0xff]  }
 0x2b8   :  { %4963 = vmatprep.subr.bf16.mxu0 %v7674_v59  ;;  %v7731_v59 = vld [vmem:[#allocation4 + $0x98c] ss:$16 sps:$4 sm:$0xff]  }
 0x2b9   :  { %3927 = vmatpush1.bf16.msra.mxu1 %v7663_v37  ;;  %v7728_v37 = vld [vmem:[#allocation4 + $0xd64] ss:$16 sps:$4 sm:$0xff]  }
 0x2ba   :  { %3928 = vmatprep.subr.bf16.mxu1 %v7671_v21  ;;  %v7726_v21 = vld [vmem:[#allocation4 + $0xd60] ss:$16 sps:$4 sm:$0xff]  }
 0x2bb   :  { %4964 = vmatpush1.bf16.msra.mxu0 %v7672_v46  ;;  %v4607_v46 = vrot.slane %v8746_v27, 6 }
 0x2bc   :  { %4965 = vmatprep.subr.bf16.mxu0 %v7680_v47  ;;  %v7729_v47 = vld [vmem:[#allocation4 + $0x988] ss:$16 sps:$4 sm:$0xff]  }
 0x2bd   :  { %3929 = vmatpush1.bf16.msra.mxu1 %v7669_v5  ;;  %v7734_v5 = vld [vmem:[#allocation4 + $0xd84] ss:$16 sps:$4 sm:$0xff]  }
 0x2be   :  { %3930 = vmatprep.subr.bf16.mxu1 %v7677_v22  ;;  %v4608_v22 = vrot.slane %v8680_v14, 5 }
 0x2bf   :  { %4966 = vmatpush1.bf16.msra.mxu0 %v7678_v0  ;;  %v7732_v0 = vld [vmem:[#allocation4 + $0xd80] ss:$16 sps:$4 sm:$0xff]  }
 0x2c0   :  { %4967 = vmatprep.subr.bf16.mxu0 %v7686_v6  ;;  %v7740_v6 = vld [vmem:[#allocation4 + $0xda4] ss:$16 sps:$4 sm:$0xff]  }
 0x2c1   :  { %3931 = vmatpush1.bf16.msra.mxu1 %v7675_v48  ;;  %v4610_v48 = vrot.slane %v8773_v9, 4 }
 0x2c2   :  { %3932 = vmatprep.subr.bf16.mxu1 %v7683_v41  ;;  %v7737_v41 = vld [vmem:[#allocation4 + $0x9ac] ss:$16 sps:$4 sm:$0xff]  }
 0x2c3   :  { %4968 = vmatpush1.bf16.msra.mxu0 %v7684_v24  ;;  %v4609_v24 = vsel %vm1420_vm1, %v4608_v22, %v4607_v46  ;;  %v4591_v46 = vrot.slane %v9352_v2, 7 }
 0x2c4   :  { %4969 = vmatprep.subr.bf16.mxu0 %v7692_v42  ;;  %v7735_v42 = vld [vmem:[#allocation4 + $0x9a8] ss:$16 sps:$4 sm:$0xff]  }
 0x2c5   :  { %3933 = vmatpush1.bf16.msra.mxu1 %v7681_v15  ;;  %v4580_v15 = vrot.slane %v8606_v33, 5 }
 0x2c6   :  { %3934 = vmatprep.subr.bf16.mxu1 %v7689_v52  ;;  %v4612_v52 = vrot.slane %v8713_v19, 3 }
 0x2c7   :  { %4970 = vmatpush1.bf16.msra.mxu0 %v7690_v17  ;;  %v4611_v17 = vsel %vm1423_vm2, %v4610_v48, %v4609_v24  ;;  %v7761_v24 = vld [vmem:[#allocation4 + $0xa2c] ss:$16 sps:$4 sm:$0xff]  }
 0x2c8   :  { %4971 = vmatprep.subr.bf16.mxu0 %v7698_v53  ;;  %v7738_v53 = vld [vmem:[#allocation4 + $0xda0] ss:$16 sps:$4 sm:$0xff]  }
 0x2c9   :  { %3935 = vmatpush1.bf16.msra.mxu1 %v7687_v29  ;;  %v4582_v29 = vrot.slane %v8621_v57, 4 }
 0x2ca   :  { %3936 = vmatprep.subr.bf16.mxu1 %v7695_v20  ;;  %v4614_v20 = vrot.slane %v8824_v13, 2 }
 0x2cb   :  { %4972 = vmatpush1.bf16.msra.mxu0 %v7696_v49  ;;  %v4579_v49 = vrot.slane %v8604_v32, 6 }
 0x2cc   :  { %4973 = vmatprep.subr.bf16.mxu0 %v7704_v31  ;;  %v7746_v31 = vld [vmem:[#allocation4 + $0xdc4] ss:$16 sps:$4 sm:$0xff]  }
 0x2cd   :  { %3937 = vmatpush1.bf16.msra.mxu1 %v7693_v18  ;;  %v7743_v18 = vld [vmem:[#allocation4 + $0x9cc] ss:$16 sps:$4 sm:$0xff]  }
 0x2ce   :  { %3938 = vmatprep.subr.bf16.mxu1 %v7701_v8  ;;  %v4584_v8 = vrot.slane %v8655_v35, 3 }
 0x2cf   :  { %4974 = vmatpush1.bf16.msra.mxu0 %v7702_v36  ;;  %v4581_v36 = vsel %vm1420_vm1, %v4580_v15, %v4579_v49  ;;  %v7776_v49 = vld [vmem:[#allocation4 + $0xe64] ss:$16 sps:$4 sm:$0xff]  }
 0x2d0   :  { %4975 = vmatprep.subr.bf16.mxu0 %v7710_v55  ;;  %v4616_v55 = vrot.slane %v8753_v7, 1 }
 0x2d1   :  { %3939 = vmatpush1.bf16.msra.mxu1 %v7699_v30  ;;  %v4586_v30 = vrot.slane %v8674_v4, 2 }
 0x2d2   :  { %3940 = vmatprep.subr.bf16.mxu1 %v7707_v54  ;;  %v4613_v54 = vsel %vm1426_vm3, %v4612_v52, %v4611_v17  ;;  %v7764_v52 = vld [vmem:[#allocation4 + $0xe24] ss:$16 sps:$4 sm:$0xff]   ;;  %v7767_v17 = vld [vmem:[#allocation4 + $0xa4c] ss:$16 sps:$4 sm:$0xff]  }
 0x2d3   :  { %4976 = vmatpush1.bf16.msra.mxu0 %v7708_v12  ;;  %v4583_v12 = vsel %vm1423_vm2, %v4582_v29, %v4581_v36  ;;  %v7762_v29 = vld [vmem:[#allocation4 + $0xe20] ss:$16 sps:$4 sm:$0xff]   ;;  %v7777_v36 = vld [vmem:[#allocation4 + $0xa88] ss:$16 sps:$4 sm:$0xff]  }
 0x2d4   :  { %4977 = vmatprep.subr.bf16.mxu0 %v7716_v26  ;;  %v7744_v26 = vld [vmem:[#allocation4 + $0xdc0] ss:$16 sps:$4 sm:$0xff]  }
 0x2d5   :  { %3941 = vmatpush1.bf16.msra.mxu1 %v7705_v28  ;;  %v7741_v28 = vld [vmem:[#allocation4 + $0x9c8] ss:$16 sps:$4 sm:$0xff]  }
 0x2d6   :  { %3942 = vmatprep.subr.bf16.mxu1 %v7713_v43  ;;  %v4615_v43 = vsel %vm1429_vm4, %v4614_v20, %v4613_v54  ;;  %v7770_v20 = vld [vmem:[#allocation4 + $0xe44] ss:$16 sps:$4 sm:$0xff]   ;;  %v7780_v54 = vld [vmem:[#allocation4 + $0xe80] ss:$16 sps:$4 sm:$0xff]  }
 0x2d7   :  { %4978 = vmatpush1.bf16.msra.mxu0 %v7714_v58  ;;  %v4585_v58 = vsel %vm1426_vm3, %v4584_v8, %v4583_v12  ;;  %v7771_v8 = vld [vmem:[#allocation4 + $0xa68] ss:$16 sps:$4 sm:$0xff]  }
 0x2d8   :  { %4979 = vmatprep.subr.bf16.mxu0 %v7722_v39  ;;  %v7752_v39 = vld [vmem:[#allocation4 + $0xde4] ss:$16 sps:$4 sm:$0xff]   ;;  %v7783_v12 = vld [vmem:[#allocation4 + $0xaa8] ss:$16 sps:$4 sm:$0xff]  }
 0x2d9   :  { %3943 = vmatpush1.bf16.msra.mxu1 %v7711_v51  ;;  %v7749_v51 = vld [vmem:[#allocation4 + $0x9ec] ss:$16 sps:$4 sm:$0xff]  }
 0x2da   :  { %3944 = vmatprep.subr.bf16.mxu1 %v7719_v3  ;;  %v4588_v3 = vrot.slane %v8623_v61, 1 }
 0x2db   :  { %4980 = vmatpush1.bf16.msra.mxu0 %v7720_v1  ;;  %v4617_v1 = vsel %vm1432_vm5, %v4616_v55, %v4615_v43  ;;  %v7785_v55 = vld [vmem:[#allocation4 + $0xaac] ss:$16 sps:$4 sm:$0xff]   ;;  %v7786_v43 = vld [vmem:[#allocation4 + $0xea0] ss:$16 sps:$4 sm:$0xff]  }
 0x2dc   :  { %4981 = vmatprep.subr.bf16.mxu0 %v7728_v37  ;;  %v7747_v37 = vld [vmem:[#allocation4 + $0x9e8] ss:$16 sps:$4 sm:$0xff]  }
 0x2dd   :  { %3945 = vmatpush1.bf16.msra.mxu1 %v7717_v50  ;;  %v4587_v50 = vsel %vm1429_vm4, %v4586_v30, %v4585_v58  ;;  %v7782_v30 = vld [vmem:[#allocation4 + $0xe84] ss:$16 sps:$4 sm:$0xff]   ;;  %v7789_v58 = vld [vmem:[#allocation4 + $0xac8] ss:$16 sps:$4 sm:$0xff]  }
 0x2de   :  { %3946 = vmatprep.subr.bf16.mxu1 %v7725_v56  ;;  %v4619_v56 = vrot.slane %v8798_v11, 7 }
 0x2df   :  { %4982 = vmatpush1.bf16.msra.mxu0 %v7726_v21  ;;  %v7750_v21 = vld [vmem:[#allocation4 + $0xde0] ss:$16 sps:$4 sm:$0xff]  }
 0x2e0   :  { %4983 = vmatprep.subr.bf16.mxu0 %v7734_v5  ;;  %v4589_v5 = vsel %vm1432_vm5, %v4588_v3, %v4587_v50  ;;  %v7792_v3 = vld [vmem:[#allocation4 + $0xec0] ss:$16 sps:$4 sm:$0xff]   ;;  %v7800_v50 = vld [vmem:[#allocation4 + $0xee4] ss:$16 sps:$4 sm:$0xff]  }
 0x2e1   :  { %3947 = vmatpush1.bf16.msra.mxu1 %v7723_v63  ;;  %v4618_v63 = vsel %vm1435_vm6, %v8869_v34, %v4617_v1  ;;  %v4590_v22 = vsel %vm1435_vm6, %v8701_v62, %v4589_v5  ;;  %v7795_v1 = vld [vmem:[#allocation4 + $0xae8] ss:$16 sps:$4 sm:$0xff]   ;;  %v7809_v5 = vld [vmem:[#allocation4 + $0xb2c] ss:$16 sps:$4 sm:$0xff]  }
 0x2e2   :  { %3948 = vmatprep.subr.bf16.mxu1 %v7731_v59  ;;  %v7755_v59 = vld [vmem:[#allocation4 + $0xa0c] ss:$16 sps:$4 sm:$0xff]   ;;  %v4620_v48 = vsel %vm1438_vm7, %v4619_v56, %v4618_v63  ;;  %v7798_v56 = vld [vmem:[#allocation4 + $0xee0] ss:$16 sps:$4 sm:$0xff]   ;;  %v7806_v63 = vld [vmem:[#allocation4 + $0xf04] ss:$16 sps:$4 sm:$0xff]  }
 0x2e3   :  { %4984 = vmatpush1.bf16.msra.mxu0 %v7732_v0  ;;  %v7753_v0 = vld [vmem:[#allocation4 + $0xa08] ss:$16 sps:$4 sm:$0xff]  }
 0x2e4   :  { %4985 = vmatprep.subr.bf16.mxu0 %v7740_v6  ;;  %v7756_v6 = vld [vmem:[#allocation4 + $0xe00] ss:$16 sps:$4 sm:$0xff]  }
 0x2e5   :  { %3949 = vmatpush1.bf16.msra.mxu1 %v7729_v47  ;;  %v7758_v47 = vld [vmem:[#allocation4 + $0xe04] ss:$16 sps:$4 sm:$0xff]  }
 0x2e6   :  { %3950 = vmatprep.subr.bf16.mxu1 %v7737_v41  ;;  %v4592_v41 = vsel %vm1438_vm7, %v4591_v46, %v4590_v22  ;;  %v7812_v46 = vld [vmem:[#allocation4 + $0xf24] ss:$16 sps:$4 sm:$0xff]   ;;  %v7807_v22 = vld [vmem:[#allocation4 + $0xb28] ss:$16 sps:$4 sm:$0xff]  }
 0x2e7   :  { %4986 = vmatpush1.bf16.msra.mxu0 %v7738_v53  ;;  %v9255_v15 = vpack.c.b16 %v4620_v48, %v4592_v41  ;;  %v7765_v53 = vld [vmem:[#allocation4 + $0xa48] ss:$16 sps:$4 sm:$0xff]   ;;  %v7815_v48 = vld [vmem:[#allocation4 + $0xb4c] ss:$16 sps:$4 sm:$0xff]  }
 0x2e8   :  { %4987 = vmatprep.subr.bf16.mxu0 %v7746_v31  ;;  %v7779_v31 = vld [vmem:[#allocation4 + $0xa8c] ss:$16 sps:$4 sm:$0xff]   ;;  %v7813_v41 = vld [vmem:[#allocation4 + $0xb48] ss:$16 sps:$4 sm:$0xff]  }
 0x2e9   :  { %3951 = vmatpush1.bf16.msra.mxu1 %v7735_v42  ;;  %v7759_v42 = vld [vmem:[#allocation4 + $0xa28] ss:$16 sps:$4 sm:$0xff]  }
 0x2ea   :  { %3952 = vmatprep.subr.bf16.mxu1 %v7743_v18  ;;  %v7773_v18 = vld [vmem:[#allocation4 + $0xa6c] ss:$16 sps:$4 sm:$0xff]  }
 0x2eb   :  { %4988 = vmatpush1.bf16.msra.mxu0 %v7744_v26  ;;  %v7791_v26 = vld [vmem:[#allocation4 + $0xacc] ss:$16 sps:$4 sm:$0xff]  }
 0x2ec   :  { %4989 = vmatprep.subr.bf16.mxu0 %v7752_v39  ;;  %v7797_v39 = vld [vmem:[#allocation4 + $0xaec] ss:$16 sps:$4 sm:$0xff]  }
 0x2ed   :  { %3953 = vmatpush1.bf16.msra.mxu1 %v7741_v28  ;;  %v7788_v28 = vld [vmem:[#allocation4 + $0xea4] ss:$16 sps:$4 sm:$0xff]  }
 0x2ee   :  { %3954 = vmatprep.subr.bf16.mxu1 %v7749_v51  ;;  %v7794_v51 = vld [vmem:[#allocation4 + $0xec4] ss:$16 sps:$4 sm:$0xff]  }
 0x2ef   :  { %4990 = vmatpush1.bf16.msra.mxu0 %v7750_v21  ;;  %v7801_v21 = vld [vmem:[#allocation4 + $0xb08] ss:$16 sps:$4 sm:$0xff]  }
 0x2f0   :  { %5498 = vmatprep.subr.bf16.mxu0 %v7758_v47  ;;  %v7810_v47 = vld [vmem:[#allocation4 + $0xf20] ss:$16 sps:$4 sm:$0xff]  }
 0x2f1   :  { %3955 = vmatpush1.bf16.msra.mxu1 %v7747_v37  ;;  %v7803_v37 = vld [vmem:[#allocation4 + $0xb0c] ss:$16 sps:$4 sm:$0xff]  }
 0x2f2   :  { %4463 = vmatprep.subr.bf16.mxu1 %v7755_v59  ;;  %4992 = vmatmul.mubr.bf16.vlgmr.msra.gmra.mrb[40].mxu0 %v9255_v15  ;;  %v7804_v59 = vld [vmem:[#allocation4 + $0xf00] ss:$16 sps:$4 sm:$0xff]  }
 0x2f3   :  { %5499 = vmatpush1.bf16.msra.mxu0 %v7756_v6  ;;  %5530 = vmatprep.mubr.bf16.mxu0 %v9103_v45  ;;  %v7816_v6 = vld [vmem:[#allocation4 + $0xf40] ss:$16 sps:$4 sm:$0xff]  }
 0x2f4   :  { %3957 = vmatmul.mubr.bf16.vlgmr.msra.gmra.mrb[28].mxu1 %v9175_v40  ;;  %5500 = vmatprep.subr.bf16.mxu0 %v7764_v52  ;;  %v7768_v40 = vld [vmem:[#allocation4 + $0xe40] ss:$16 sps:$4 sm:$0xff]   ;;  %v7824_v52 = vld [vmem:[#allocation4 + $0xf64] ss:$16 sps:$4 sm:$0xff]  }
 0x2f5   :  { %4464 = vmatpush1.bf16.msra.mxu1 %v7753_v0  ;;  %4495 = vmatprep.mubr.bf16.mxu1 %v9007_v44  ;;  %v7774_v44 = vld [vmem:[#allocation4 + $0xe60] ss:$16 sps:$4 sm:$0xff]   ;;  %v7818_v0 = vld [vmem:[#allocation4 + $0xf44] ss:$16 sps:$4 sm:$0xff]  }
 0x2f6   :  { %4465 = vmatprep.subr.bf16.mxu1 %v7761_v24  ;;  %v7821_v24 = vld [vmem:[#allocation4 + $0xb6c] ss:$16 sps:$4 sm:$0xff]  }
 0x2f7   :  { %5501 = vmatpush1.bf16.msra.mxu0 %v7762_v29  ;;  %v7822_v29 = vld [vmem:[#allocation4 + $0xf60] ss:$16 sps:$4 sm:$0xff]  }
 0x2f8   :  { %5502 = vmatprep.subr.bf16.mxu0 %v7770_v20  ;;  %v7830_v20 = vld [vmem:[#allocation4 + $0xf84] ss:$16 sps:$4 sm:$0xff]  }
 0x2f9   :  { %4466 = vmatpush1.bf16.msra.mxu1 %v7759_v42  ;;  %v7819_v42 = vld [vmem:[#allocation4 + $0xb68] ss:$16 sps:$4 sm:$0xff]  }
 0x2fa   :  { %4467 = vmatprep.subr.bf16.mxu1 %v7767_v17  ;;  %v7827_v17 = vld [vmem:[#allocation4 + $0xb8c] ss:$16 sps:$4 sm:$0xff]  }
 0x2fb   :  { %5503 = vmatpush1.bf16.msra.mxu0 %v7768_v40  ;;  %v5147_v40 = vrot.slane %v8680_v14, 6  ;;  %v5121_v14 = vrot.slane %v8621_v57, 5 }
 0x2fc   :  { %5504 = vmatprep.subr.bf16.mxu0 %v7776_v49  ;;  %v5149_v49 = vrot.slane %v8773_v9, 5  ;;  %v5153_v9 = vrot.slane %v8824_v13, 3  ;;  %v7837_v13 = vld [vmem:[#allocation4 + $0xbc8] ss:$16 sps:$4 sm:$0xff]  }
 0x2fd   :  { %4468 = vmatpush1.bf16.msra.mxu1 %v7765_v53  ;;  %v5146_v53 = vrot.slane %v8746_v27, 7  ;;  %v7831_v27 = vld [vmem:[#allocation4 + $0xba8] ss:$16 sps:$4 sm:$0xff]  }
 0x2fe   :  { %4469 = vmatprep.subr.bf16.mxu1 %v7773_v18  ;;  %v7825_v18 = vld [vmem:[#allocation4 + $0xb88] ss:$16 sps:$4 sm:$0xff]  }
 0x2ff   :  { %5505 = vmatpush1.bf16.msra.mxu0 %v7774_v44  ;;  %v7833_v44 = vld [vmem:[#allocation4 + $0xbac] ss:$16 sps:$4 sm:$0xff]  }
 0x300   :  { %5506 = vmatprep.subr.bf16.mxu0 %v7782_v30  ;;  %v5119_v30 = vrot.slane %v8606_v33, 6  ;;  %v5123_v33 = vrot.slane %v8655_v35, 4  ;;  %v7840_v35 = vld [vmem:[#allocation4 + $0xfc0] ss:$16 sps:$4 sm:$0xff]  }
 0x301   :  { %4470 = vmatpush1.bf16.msra.mxu1 %v7771_v8  ;;  %v7828_v8 = vld [vmem:[#allocation4 + $0xf80] ss:$16 sps:$4 sm:$0xff]  }
 0x302   :  { %4471 = vmatprep.subr.bf16.mxu1 %v7779_v31  ;;  %v7836_v31 = vld [vmem:[#allocation4 + $0xfa4] ss:$16 sps:$4 sm:$0xff]  }
 0x303   :  { %5507 = vmatpush1.bf16.msra.mxu0 %v7780_v54  ;;  %v5151_v54 = vrot.slane %v8713_v19, 4  ;;  %v5125_v19 = vrot.slane %v8674_v4, 3 }
 0x304   :  { %5508 = vmatprep.subr.bf16.mxu0 %v7788_v28  ;;  %v7834_v28 = vld [vmem:[#allocation4 + $0xfa0] ss:$16 sps:$4 sm:$0xff]  }
 0x305   :  { %4472 = vmatpush1.bf16.msra.mxu1 %v7777_v36  ;;  %v5148_v36 = vsel %vm1420_vm1, %v5147_v40, %v5146_v53  ;;  %v7956_v53 = vld [vmem:[#allocation7 + $0x34] ss:$8 sps:$4 sm:$0xff]   ;;  %v7863_v40 = vld [vmem:[#allocation4 + $0xc8c] ss:$16 sps:$4 sm:$0xff]  }
 0x306   :  { %4473 = vmatprep.subr.bf16.mxu1 %v7785_v55  ;;  %v5150_v55 = vsel %vm1423_vm2, %v5149_v49, %v5148_v36  ;;  %v7959_v49 = vld [vmem:[#allocation7 + $0x44] ss:$8 sps:$4 sm:$0xff]   ;;  %v7869_v36 = vld [vmem:[#allocation4 + $0xccc] ss:$16 sps:$4 sm:$0xff]  }
 0x307   :  { %5509 = vmatpush1.bf16.msra.mxu0 %v7786_v43  ;;  %v5118_v43 = vrot.slane %v8604_v32, 7  ;;  %v5152_v57 = vsel %vm1426_vm3, %v5151_v54, %v5150_v55  ;;  %v5157_v32 = vrot.slane %v8869_v34, 1  ;;  %v7960_v54 = vld [vmem:[#allocation7 + $0x50] ss:$8 sps:$4 sm:$0xff]  }
 0x308   :  { %5510 = vmatprep.subr.bf16.mxu0 %v7794_v51  ;;  %v7872_v55 = vld [vmem:[#allocation4 + $0xcec] ss:$16 sps:$4 sm:$0xff]  }
 0x309   :  { %4474 = vmatpush1.bf16.msra.mxu1 %v7783_v12  ;;  %v7839_v12 = vld [vmem:[#allocation4 + $0xbcc] ss:$16 sps:$4 sm:$0xff]   ;;  %v5120_v51 = vsel %vm1420_vm1, %v5119_v30, %v5118_v43  ;;  %v7962_v30 = vld [vmem:[#allocation7 + $0x54] ss:$8 sps:$4 sm:$0xff]  }
 0x30a   :  { %4475 = vmatprep.subr.bf16.mxu1 %v7791_v26  ;;  %v7842_v26 = vld [vmem:[#allocation4 + $0xfc4] ss:$16 sps:$4 sm:$0xff]   ;;  %v7875_v43 = vld [vmem:[#allocation4 + $0xd0c] ss:$16 sps:$4 sm:$0xff]  }
 0x30b   :  { %5511 = vmatpush1.bf16.msra.mxu0 %v7792_v3  ;;  %v5122_v3 = vsel %vm1423_vm2, %v5121_v14, %v5120_v51  ;;  %v7965_v14 = vld [vmem:[#allocation7 + $0x64] ss:$8 sps:$4 sm:$0xff]   ;;  %v7878_v51 = vld [vmem:[#allocation4 + $0xd2c] ss:$16 sps:$4 sm:$0xff]  }
 0x30c   :  { %5512 = vmatprep.subr.bf16.mxu0 %v7800_v50  ;;  %v7845_v50 = vld [vmem:[#allocation4 + $0xbec] ss:$16 sps:$4 sm:$0xff]   ;;  %v5124_v4 = vsel %vm1426_vm3, %v5123_v33, %v5122_v3 }
 0x30d   :  { %4476 = vmatpush1.bf16.msra.mxu1 %v7789_v58  ;;  %v5155_v58 = vrot.slane %v8753_v7, 2  ;;  %v5126_v7 = vsel %vm1429_vm4, %v5125_v19, %v5124_v4  ;;  %v7966_v33 = vld [vmem:[#allocation7 + $0x70] ss:$8 sps:$4 sm:$0xff]   ;;  %v7971_v19 = vld [vmem:[#allocation7 + $0x84] ss:$8 sps:$4 sm:$0xff]  }
 0x30e   :  { %4477 = vmatprep.subr.bf16.mxu1 %v7797_v39  ;;  %v5154_v39 = vsel %vm1429_vm4, %v5153_v9, %v5152_v57  ;;  %v7963_v9 = vld [vmem:[#allocation7 + $0x60] ss:$8 sps:$4 sm:$0xff]  }
 0x30f   :  { %5513 = vmatpush1.bf16.msra.mxu0 %v7798_v56  ;;  %v7848_v56 = vld [vmem:[#allocation4 + $0xfe4] ss:$16 sps:$4 sm:$0xff]   ;;  %v7881_v3 = vld [vmem:[#allocation4 + $0xd4c] ss:$16 sps:$4 sm:$0xff]  }
 0x310   :  { %5514 = vmatprep.subr.bf16.mxu0 %v7806_v63  ;;  %v5156_v63 = vsel %vm1432_vm5, %v5155_v58, %v5154_v39  ;;  %v7969_v57 = vld [vmem:[#allocation7 + $0x80] ss:$8 sps:$4 sm:$0xff]   ;;  %v7876_v58 = vld [vmem:[#allocation4 + $0xd28] ss:$16 sps:$4 sm:$0xff]   ;;  %v7972_v39 = vld [vmem:[#allocation7 + $0x90] ss:$8 sps:$4 sm:$0xff]  }
 0x311   :  { %4478 = vmatpush1.bf16.msra.mxu1 %v7795_v1  ;;  %v5127_v1 = vrot.slane %v8623_v61, 2  ;;  %v5158_v34 = vsel %vm1435_vm6, %v5157_v32, %v5156_v63  ;;  %v7879_v32 = vld [vmem:[#allocation4 + $0xd48] ss:$16 sps:$4 sm:$0xff]   ;;  %v7975_v4 = vld [vmem:[#allocation7 + $0xa0] ss:$8 sps:$4 sm:$0xff]  }
 0x312   :  { %4479 = vmatprep.subr.bf16.mxu1 %v7803_v37  ;;  %v5129_v37 = vrot.slane %v8701_v62, 1  ;;  %v7849_v62 = vld [vmem:[#allocation4 + $0xc08] ss:$16 sps:$4 sm:$0xff]  }
 0x313   :  { %5515 = vmatpush1.bf16.msra.mxu0 %v7804_v59  ;;  %v7846_v59 = vld [vmem:[#allocation4 + $0xfe0] ss:$16 sps:$4 sm:$0xff]   ;;  %v7885_v63 = vld [vmem:[#allocation4 + $0xd88] ss:$16 sps:$4 sm:$0xff]  }
 0x314   :  { %5516 = vmatprep.subr.bf16.mxu0 %v7812_v46  ;;  %v5128_v46 = vsel %vm1432_vm5, %v5127_v1, %v5126_v7  ;;  %v7882_v1 = vld [vmem:[#allocation4 + $0xd68] ss:$16 sps:$4 sm:$0xff]   ;;  %v7887_v7 = vld [vmem:[#allocation4 + $0xd8c] ss:$16 sps:$4 sm:$0xff]  }
 0x315   :  { %4480 = vmatpush1.bf16.msra.mxu1 %v7801_v21  ;;  %v7843_v21 = vld [vmem:[#allocation4 + $0xbe8] ss:$16 sps:$4 sm:$0xff]   ;;  %v5130_v61 = vsel %vm1435_vm6, %v5129_v37, %v5128_v46  ;;  %v7978_v37 = vld [vmem:[#allocation7 + $0xb0] ss:$8 sps:$4 sm:$0xff]  }
 0x316   :  { %4481 = vmatprep.subr.bf16.mxu1 %v7809_v5  ;;  %v7851_v5 = vld [vmem:[#allocation4 + $0xc0c] ss:$16 sps:$4 sm:$0xff]  }
 0x317   :  { %5517 = vmatpush1.bf16.msra.mxu0 %v7810_v47  ;;  %v5131_v47 = vsel %vm1438_vm7, %v9352_v2, %v5130_v61  ;;  %v7855_v2 = vld [vmem:[#allocation4 + $0xc48] ss:$16 sps:$4 sm:$0xff]   ;;  %v7893_v46 = vld [vmem:[#allocation4 + $0xdcc] ss:$16 sps:$4 sm:$0xff]  }
 0x318   :  { %5518 = vmatprep.subr.bf16.mxu0 %v7818_v0  ;;  %v7891_v61 = vld [vmem:[#allocation4 + $0xdc8] ss:$16 sps:$4 sm:$0xff]  }
 0x319   :  { %4482 = vmatpush1.bf16.msra.mxu1 %v7807_v22  ;;  %v5159_v22 = vsel %vm1438_vm7, %v8798_v11, %v5158_v34  ;;  %v7857_v11 = vld [vmem:[#allocation4 + $0xc4c] ss:$16 sps:$4 sm:$0xff]  }
 0x31a   :  { %4483 = vmatprep.subr.bf16.mxu1 %v7815_v48  ;;  %v7854_v48 = vld [vmem:[#allocation4 + $0xc2c] ss:$16 sps:$4 sm:$0xff]   ;;  %v9291_v0 = vpack.c.b16 %v5159_v22, %v5131_v47 }
 0x31b   :  { %5519 = vmatpush1.bf16.msra.mxu0 %v7816_v6  ;;  %v7947_v6 = vld [vmem:[#allocation7 + $0x4] ss:$8 sps:$4 sm:$0xff]   ;;  %v7890_v34 = vld [vmem:[#allocation4 + $0xdac] ss:$16 sps:$4 sm:$0xff]  }
 0x31c   :  { %5520 = vmatprep.subr.bf16.mxu0 %v7824_v52  ;;  %v7950_v52 = vld [vmem:[#allocation7 + $0x14] ss:$8 sps:$4 sm:$0xff]   ;;  %v7896_v22 = vld [vmem:[#allocation4 + $0xdec] ss:$16 sps:$4 sm:$0xff]  }
 0x31d   :  { %4484 = vmatpush1.bf16.msra.mxu1 %v7813_v41  ;;  %v7945_v41 = vld [vmem:[#allocation7] ss:$8 sps:$4 sm:$0xff]  }
 0x31e   :  { %4485 = vmatprep.subr.bf16.mxu1 %v7821_v24  ;;  %v7852_v24 = vld [vmem:[#allocation4 + $0xc28] ss:$16 sps:$4 sm:$0xff]   ;;  %v7899_v47 = vld [vmem:[#allocation4 + $0xe0c] ss:$16 sps:$4 sm:$0xff]  }
 0x31f   :  { %5521 = vmatpush1.bf16.msra.mxu0 %v7822_v29  ;;  %v7953_v29 = vld [vmem:[#allocation7 + $0x24] ss:$8 sps:$4 sm:$0xff]  }
 0x320   :  { %5522 = vmatprep.subr.bf16.mxu0 %v7830_v20  ;;  %v7858_v20 = vld [vmem:[#allocation4 + $0xc68] ss:$16 sps:$4 sm:$0xff]  }
 0x321   :  { %4486 = vmatpush1.bf16.msra.mxu1 %v7819_v42  ;;  %v7948_v42 = vld [vmem:[#allocation7 + $0x10] ss:$8 sps:$4 sm:$0xff]  }
 0x322   :  { %4487 = vmatprep.subr.bf16.mxu1 %v7827_v17  ;;  %v7951_v17 = vld [vmem:[#allocation7 + $0x20] ss:$8 sps:$4 sm:$0xff]  }
 0x323   :  { %5523 = vmatpush1.bf16.msra.mxu0 %v7828_v8  ;;  %v7866_v8 = vld [vmem:[#allocation4 + $0xcac] ss:$16 sps:$4 sm:$0xff]  }
 0x324   :  { %5524 = vmatprep.subr.bf16.mxu0 %v7836_v31  ;;  %v7864_v31 = vld [vmem:[#allocation4 + $0xca8] ss:$16 sps:$4 sm:$0xff]  }
 0x325   :  { %4488 = vmatpush1.bf16.msra.mxu1 %v7825_v18  ;;  %v7861_v18 = vld [vmem:[#allocation4 + $0xc88] ss:$16 sps:$4 sm:$0xff]  }
 0x326   :  { %4489 = vmatprep.subr.bf16.mxu1 %v7833_v44  ;;  %v7957_v44 = vld [vmem:[#allocation7 + $0x40] ss:$8 sps:$4 sm:$0xff]  }
 0x327   :  { %5525 = vmatpush1.bf16.msra.mxu0 %v7834_v28  ;;  %v7870_v28 = vld [vmem:[#allocation4 + $0xce8] ss:$16 sps:$4 sm:$0xff]  }
 0x328   :  { %5526 = vmatprep.subr.bf16.mxu0 %v7842_v26  ;;  %v7873_v26 = vld [vmem:[#allocation4 + $0xd08] ss:$16 sps:$4 sm:$0xff]  }
 0x329   :  { %4490 = vmatpush1.bf16.msra.mxu1 %v7831_v27  ;;  %v7867_v27 = vld [vmem:[#allocation4 + $0xcc8] ss:$16 sps:$4 sm:$0xff]  }
 0x32a   :  { %4491 = vmatprep.subr.bf16.mxu1 %v7839_v12  ;;  %v7968_v12 = vld [vmem:[#allocation7 + $0x74] ss:$8 sps:$4 sm:$0xff]  }
 0x32b   :  { %5527 = vmatpush1.bf16.msra.mxu0 %v7840_v35  ;;  %v7977_v35 = vld [vmem:[#allocation7 + $0xa4] ss:$8 sps:$4 sm:$0xff]  }
 0x32c   :  { %5528 = vmatprep.subr.bf16.mxu0 %v7848_v56  ;;  %v7980_v56 = vld [vmem:[#allocation7 + $0xb4] ss:$8 sps:$4 sm:$0xff]  }
 0x32d   :  { %4492 = vmatpush1.bf16.msra.mxu1 %v7837_v13  ;;  %v7974_v13 = vld [vmem:[#allocation7 + $0x94] ss:$8 sps:$4 sm:$0xff]  }
 0x32e   :  { %4493 = vmatprep.subr.bf16.mxu1 %v7845_v50  ;;  %v7884_v50 = vld [vmem:[#allocation4 + $0xd6c] ss:$16 sps:$4 sm:$0xff]  }
 0x32f   :  { %5529 = vmatpush1.bf16.msra.mxu0 %v7846_v59  ;;  %v7981_v59 = vld [vmem:[#allocation7 + $0xc0] ss:$8 sps:$4 sm:$0xff]  }
 0x330   :  { %6030 = vmatprep.subr.bf16.mxu0 %v7947_v6  ;;  %v7900_v6 = vld [vmem:[#allocation4 + $0xe28] ss:$16 sps:$4 sm:$0xff]  }
 0x331   :  { %4494 = vmatpush1.bf16.msra.mxu1 %v7843_v21  ;;  %v7983_v21 = vld [vmem:[#allocation7 + $0xc4] ss:$8 sps:$4 sm:$0xff]  }
 0x332   :  { %5002 = vmatprep.subr.bf16.mxu1 %v7851_v5  ;;  %5531 = vmatmul.mubr.bf16.vlgmr.msra.gmra.mrb[40].mxu0 %v9291_v0  ;;  %v7888_v5 = vld [vmem:[#allocation4 + $0xda8] ss:$16 sps:$4 sm:$0xff]  }
 0x333   :  { %6031 = vmatpush1.bf16.msra.mxu0 %v7945_v41  ;;  %v7902_v41 = vld [vmem:[#allocation4 + $0xe2c] ss:$16 sps:$4 sm:$0xff]  }
 0x334   :  { %4496 = vmatmul.mubr.bf16.vlgmr.msra.gmra.mrb[28].mxu1 %v9219_v10  ;;  %6032 = vmatprep.subr.bf16.mxu0 %v7950_v52  ;;  %v7860_v10 = vld [vmem:[#allocation4 + $0xc6c] ss:$16 sps:$4 sm:$0xff]   ;;  %v7903_v52 = vld [vmem:[#allocation4 + $0xe48] ss:$16 sps:$4 sm:$0xff]  }
 0x335   :  { %5003 = vmatpush1.bf16.msra.mxu1 %v7849_v62  ;;  %5034 = vmatprep.mubr.bf16.mxu1 %v9049_v23  ;;  %v7954_v23 = vld [vmem:[#allocation7 + $0x30] ss:$8 sps:$4 sm:$0xff]   ;;  %v7894_v62 = vld [vmem:[#allocation4 + $0xde8] ss:$16 sps:$4 sm:$0xff]  }
 0x336   :  { %5004 = vmatprep.subr.bf16.mxu1 %v7854_v48  ;;  %v7897_v48 = vld [vmem:[#allocation4 + $0xe08] ss:$16 sps:$4 sm:$0xff]  }
 0x337   :  { %6033 = vmatpush1.bf16.msra.mxu0 %v7948_v42  ;;  %v7906_v42 = vld [vmem:[#allocation4 + $0xe68] ss:$16 sps:$4 sm:$0xff]  }
 0x338   :  { %6034 = vmatprep.subr.bf16.mxu0 %v7953_v29  ;;  %v7909_v29 = vld [vmem:[#allocation4 + $0xe88] ss:$16 sps:$4 sm:$0xff]  }
 0x339   :  { %5005 = vmatpush1.bf16.msra.mxu1 %v7852_v24  ;;  %v7905_v24 = vld [vmem:[#allocation4 + $0xe4c] ss:$16 sps:$4 sm:$0xff]  }
 0x33a   :  { %5006 = vmatprep.subr.bf16.mxu1 %v7857_v11  ;;  %v7908_v11 = vld [vmem:[#allocation4 + $0xe6c] ss:$16 sps:$4 sm:$0xff]  }
 0x33b   :  { %6035 = vmatpush1.bf16.msra.mxu0 %v7951_v17  ;;  %v7917_v17 = vld [vmem:[#allocation4 + $0xecc] ss:$16 sps:$4 sm:$0xff]  }
 0x33c   :  { %6036 = vmatprep.subr.bf16.mxu0 %v7956_v53  ;;  %v7918_v53 = vld [vmem:[#allocation4 + $0xee8] ss:$16 sps:$4 sm:$0xff]  }
 0x33d   :  { %5007 = vmatpush1.bf16.msra.mxu1 %v7855_v2  ;;  %v7911_v2 = vld [vmem:[#allocation4 + $0xe8c] ss:$16 sps:$4 sm:$0xff]  }
 0x33e   :  { %5008 = vmatprep.subr.bf16.mxu1 %v7860_v10  ;;  %v7914_v10 = vld [vmem:[#allocation4 + $0xeac] ss:$16 sps:$4 sm:$0xff]  }
 0x33f   :  { %6037 = vmatpush1.bf16.msra.mxu0 %v7954_v23  ;;  %v7984_v23 = vld [vmem:[#allocation7 + $0xd0] ss:$8 sps:$4 sm:$0xff]  }
 0x340   :  { %6038 = vmatprep.subr.bf16.mxu0 %v7959_v49  ;;  %v7921_v49 = vld [vmem:[#allocation4 + $0xf08] ss:$16 sps:$4 sm:$0xff]  }
 0x341   :  { %5009 = vmatpush1.bf16.msra.mxu1 %v7858_v20  ;;  %v7920_v20 = vld [vmem:[#allocation4 + $0xeec] ss:$16 sps:$4 sm:$0xff]  }
 0x342   :  { %5010 = vmatprep.subr.bf16.mxu1 %v7863_v40  ;;  %v7923_v40 = vld [vmem:[#allocation4 + $0xf0c] ss:$16 sps:$4 sm:$0xff]  }
 0x343   :  { %6039 = vmatpush1.bf16.msra.mxu0 %v7957_v44  ;;  %v7989_v44 = vld [vmem:[#allocation7 + $0xe4] ss:$8 sps:$4 sm:$0xff]  }
 0x344   :  { %6040 = vmatprep.subr.bf16.mxu0 %v7962_v30  ;;  %v7992_v30 = vld [vmem:[#allocation7 + $0xf4] ss:$8 sps:$4 sm:$0xff]  }
 0x345   :  { %5011 = vmatpush1.bf16.msra.mxu1 %v7861_v18  ;;  %v7986_v18 = vld [vmem:[#allocation7 + $0xd4] ss:$8 sps:$4 sm:$0xff]  }
 0x346   :  { %5012 = vmatprep.subr.bf16.mxu1 %v7866_v8  ;;  %v7987_v8 = vld [vmem:[#allocation7 + $0xe0] ss:$8 sps:$4 sm:$0xff]  }
 0x347   :  { %6041 = vmatpush1.bf16.msra.mxu0 %v7960_v54  ;;  %v7990_v54 = vld [vmem:[#allocation7 + $0xf0] ss:$8 sps:$4 sm:$0xff]  }
 0x348   :  { %6042 = vmatprep.subr.bf16.mxu0 %v7965_v14  ;;  %v7995_v14 = vld [vmem:[#allocation7 + $0x104] ss:$8 sps:$4 sm:$0xff]  }
 0x349   :  { %5013 = vmatpush1.bf16.msra.mxu1 %v7864_v31  ;;  %v7926_v31 = vld [vmem:[#allocation4 + $0xf2c] ss:$16 sps:$4 sm:$0xff]  }
 0x34a   :  { %5014 = vmatprep.subr.bf16.mxu1 %v7869_v36  ;;  %v7924_v36 = vld [vmem:[#allocation4 + $0xf28] ss:$16 sps:$4 sm:$0xff]  }
 0x34b   :  { %6043 = vmatpush1.bf16.msra.mxu0 %v7963_v9  ;;  %v7932_v9 = vld [vmem:[#allocation4 + $0xf6c] ss:$16 sps:$4 sm:$0xff]  }
 0x34c   :  { %6044 = vmatprep.subr.bf16.mxu0 %v7968_v12  ;;  %v7935_v12 = vld [vmem:[#allocation4 + $0xf8c] ss:$16 sps:$4 sm:$0xff]  }
 0x34d   :  { %5015 = vmatpush1.bf16.msra.mxu1 %v7867_v27  ;;  %v7929_v27 = vld [vmem:[#allocation4 + $0xf4c] ss:$16 sps:$4 sm:$0xff]  }
 0x34e   :  { %5016 = vmatprep.subr.bf16.mxu1 %v7872_v55  ;;  %v7927_v55 = vld [vmem:[#allocation4 + $0xf48] ss:$16 sps:$4 sm:$0xff]  }
 0x34f   :  { %6045 = vmatpush1.bf16.msra.mxu0 %v7966_v33  ;;  %v7938_v33 = vld [vmem:[#allocation4 + $0xfac] ss:$16 sps:$4 sm:$0xff]  }
 0x350   :  { %6046 = vmatprep.subr.bf16.mxu0 %v7971_v19  ;;  %v7941_v19 = vld [vmem:[#allocation4 + $0xfcc] ss:$16 sps:$4 sm:$0xff]  }
 0x351   :  { %5017 = vmatpush1.bf16.msra.mxu1 %v7870_v28  ;;  %v7930_v28 = vld [vmem:[#allocation4 + $0xf68] ss:$16 sps:$4 sm:$0xff]  }
 0x352   :  { %5018 = vmatprep.subr.bf16.mxu1 %v7875_v43  ;;  %v7933_v43 = vld [vmem:[#allocation4 + $0xf88] ss:$16 sps:$4 sm:$0xff]  }
 0x353   :  { %6047 = vmatpush1.bf16.msra.mxu0 %v7969_v57  ;;  %v7944_v57 = vld [vmem:[#allocation4 + $0xfec] ss:$16 sps:$4 sm:$0xff]  }
 0x354   :  { %6048 = vmatprep.subr.bf16.mxu0 %v7974_v13  ;;  %v5594_v13 = vlaneseq }
 0x355   :  { %5019 = vmatpush1.bf16.msra.mxu1 %v7873_v26  ;;  %v7936_v26 = vld [vmem:[#allocation4 + $0xfa8] ss:$16 sps:$4 sm:$0xff]  }
 0x356   :  { %5020 = vmatprep.subr.bf16.mxu1 %v7878_v51  ;;  %v7939_v51 = vld [vmem:[#allocation4 + $0xfc8] ss:$16 sps:$4 sm:$0xff]  }
 0x357   :  { %6049 = vmatpush1.bf16.msra.mxu0 %v7972_v39 }
 0x358   :  { %6050 = vmatprep.subr.bf16.mxu0 %v7977_v35 }
 0x359   :  { %5021 = vmatpush1.bf16.msra.mxu1 %v7876_v58  ;;  %v7942_v58 = vld [vmem:[#allocation4 + $0xfe8] ss:$16 sps:$4 sm:$0xff]  }
 0x35a   :  { %5022 = vmatprep.subr.bf16.mxu1 %v7881_v3  ;;  %v9299_v3 = vshrl.u32 %v5594_v13, 7  ;;  %v8035_v13 = vld [vmem:[#allocation7 + $0x1e0] ss:$8 sps:$4 sm:$0xff]  }
 0x35b   :  { %6051 = vmatpush1.bf16.msra.mxu0 %v7975_v4 }
 0x35c   :  { %6052 = vmatprep.subr.bf16.mxu0 %v7980_v56  ;;  %v5596_v39 = vsub.s32 0, %v9299_v3  ;;  %v5600_v35 = vsub.s32 1, %v9299_v3 }
 0x35d   :  { %5023 = vmatpush1.bf16.msra.mxu1 %v7879_v32  ;;  %v9302_v32 = vld [vmem:[#allocation6] sm:$0xf] }
 0x35e   :  { %5024 = vmatprep.subr.bf16.mxu1 %v7884_v50  ;;  %v5597_v50 = vrot.slane %v9302_v32, %v5596_v39 }
 0x35f   :  { %6053 = vmatpush1.bf16.msra.mxu0 %v7978_v37 }
 0x360   :  { %6054 = vmatprep.subr.bf16.mxu0 %v7983_v21 }
 0x361   :  { %5025 = vmatpush1.bf16.msra.mxu1 %v7882_v1  ;;  %v5601_v1 = vrot.slane %v9302_v32, %v5600_v35 }
 0x362   :  { %5026 = vmatprep.subr.bf16.mxu1 %v7887_v7 }
 0x363   :  { %6055 = vmatpush1.bf16.msra.mxu0 %v7981_v59 }
 0x364   :  { %6056 = vmatprep.subr.bf16.mxu0 %v7986_v18  ;;  %v8005_v18 = vld [vmem:[#allocation7 + $0x140] ss:$8 sps:$4 sm:$0xff]  }
 0x365   :  { %5027 = vmatpush1.bf16.msra.mxu1 %v7885_v63 }
 0x366   :  { %5028 = vmatprep.subr.bf16.mxu1 %v7890_v34 }
 0x367   :  { %6057 = vmatpush1.bf16.msra.mxu0 %v7984_v23  ;;  %v8050_v23 = vld [vmem:[#allocation10 + $0x20] sm:$0xff]  }
 0x368   :  { %6058 = vmatprep.subr.bf16.mxu0 %v7989_v44  ;;  %v8008_v44 = vld [vmem:[#allocation7 + $0x150] ss:$8 sps:$4 sm:$0xff]  }
 0x369   :  { %5029 = vmatpush1.bf16.msra.mxu1 %v7888_v5 }
 0x36a   :  { %5030 = vmatprep.subr.bf16.mxu1 %v7893_v46 }
 0x36b   :  { %6059 = vmatpush1.bf16.msra.mxu0 %v7987_v8  ;;  %v8010_v8 = vld [vmem:[#allocation7 + $0x154] ss:$8 sps:$4 sm:$0xff]  }
 0x36c   :  { %6060 = vmatprep.subr.bf16.mxu0 %v7992_v30  ;;  %v8011_v30 = vld [vmem:[#allocation7 + $0x160] ss:$8 sps:$4 sm:$0xff]  }
 0x36d   :  { %5031 = vmatpush1.bf16.msra.mxu1 %v7891_v61 }
 0x36e   :  { %5032 = vmatprep.subr.bf16.mxu1 %v7896_v22 }
 0x36f   :  { %6061 = vmatpush1.bf16.msra.mxu0 %v7990_v54  ;;  %v8014_v54 = vld [vmem:[#allocation7 + $0x170] ss:$8 sps:$4 sm:$0xff]  }
 0x370   :  { %6073 = vmatprep.subr.bf16.mxu0 %v7995_v14  ;;  %v8017_v14 = vld [vmem:[#allocation7 + $0x180] ss:$8 sps:$4 sm:$0xff]  }
 0x371   :  { %5033 = vmatpush1.bf16.msra.mxu1 %v7894_v62 }
 0x372   :  { %5541 = vmatprep.subr.bf16.mxu1 %v7899_v47 }
 0x374   :  { %5035 = vmatmul.mubr.bf16.vlgmr.msra.gmra.mrb[28].mxu1 %v9255_v15  ;;  %v7912_v15 = vld [vmem:[#allocation4 + $0xea8] ss:$16 sps:$4 sm:$0xff]  }
 0x375   :  { %5542 = vmatpush1.bf16.msra.mxu1 %v7897_v48  ;;  %5573 = vmatprep.mubr.bf16.mxu1 %v9103_v45  ;;  %v7915_v45 = vld [vmem:[#allocation4 + $0xec8] ss:$16 sps:$4 sm:$0xff]  }
 0x376   :  { %5543 = vmatprep.subr.bf16.mxu1 %v7902_v41 }
 0x379   :  { %5544 = vmatpush1.bf16.msra.mxu1 %v7900_v6  ;;  %v7993_v6 = vld [vmem:[#allocation7 + $0x100] ss:$8 sps:$4 sm:$0xff]  }
 0x37a   :  { %5545 = vmatprep.subr.bf16.mxu1 %v7905_v24  ;;  %v8041_v24 = vld [vmem:[#allocation10 + $0x40] sm:$0xff]  }
 0x37d   :  { %5546 = vmatpush1.bf16.msra.mxu1 %v7903_v52  ;;  %v8042_v52 = vld [vmem:[#allocation10] sm:$0xff]  }
 0x37e   :  { %5547 = vmatprep.subr.bf16.mxu1 %v7908_v11  ;;  %v7998_v11 = vld [vmem:[#allocation7 + $0x114] ss:$8 sps:$4 sm:$0xff]  }
 0x381   :  { %5548 = vmatpush1.bf16.msra.mxu1 %v7906_v42  ;;  %v8045_v42 = vld [vmem:[#allocation10 + $0x50] sm:$0xff]  }
 0x382   :  { %5549 = vmatprep.subr.bf16.mxu1 %v7911_v2  ;;  %v8001_v2 = vld [vmem:[#allocation7 + $0x124] ss:$8 sps:$4 sm:$0xff]  }
 0x385   :  { %5550 = vmatpush1.bf16.msra.mxu1 %v7909_v29  ;;  %v8046_v29 = vld [vmem:[#allocation10 + $0x10] sm:$0xff]  }
 0x386   :  { %5551 = vmatprep.subr.bf16.mxu1 %v7914_v10  ;;  %v7999_v10 = vld [vmem:[#allocation7 + $0x120] ss:$8 sps:$4 sm:$0xff]  }
 0x389   :  { %5552 = vmatpush1.bf16.msra.mxu1 %v7912_v15  ;;  %v8047_v15 = vld [vmem:[#allocation10 + $0x58] sm:$0xff]  }
 0x38a   :  { %5553 = vmatprep.subr.bf16.mxu1 %v7917_v17  ;;  %v8004_v17 = vld [vmem:[#allocation7 + $0x134] ss:$8 sps:$4 sm:$0xff]  }
 0x38d   :  { %5554 = vmatpush1.bf16.msra.mxu1 %v7915_v45  ;;  %v8048_v45 = vld [vmem:[#allocation10 + $0x18] sm:$0xff]  }
 0x38e   :  { %5555 = vmatprep.subr.bf16.mxu1 %v7920_v20  ;;  %v8002_v20 = vld [vmem:[#allocation7 + $0x130] ss:$8 sps:$4 sm:$0xff]  }
 0x391   :  { %5556 = vmatpush1.bf16.msra.mxu1 %v7918_v53  ;;  %v8049_v53 = vld [vmem:[#allocation10 + $0x60] sm:$0xff]  }
 0x392   :  { %5557 = vmatprep.subr.bf16.mxu1 %v7923_v40  ;;  %v8007_v40 = vld [vmem:[#allocation7 + $0x144] ss:$8 sps:$4 sm:$0xff]  }
 0x395   :  { %5558 = vmatpush1.bf16.msra.mxu1 %v7921_v49  ;;  %v8051_v49 = vld [vmem:[#allocation10 + $0x68] sm:$0xff]  }
 0x396   :  { %5559 = vmatprep.subr.bf16.mxu1 %v7926_v31  ;;  %v8013_v31 = vld [vmem:[#allocation7 + $0x164] ss:$8 sps:$4 sm:$0xff]  }
 0x399   :  { %5560 = vmatpush1.bf16.msra.mxu1 %v7924_v36  ;;  %v8016_v36 = vld [vmem:[#allocation7 + $0x174] ss:$8 sps:$4 sm:$0xff]  }
 0x39a   :  { %5561 = vmatprep.subr.bf16.mxu1 %v7929_v27  ;;  %v8019_v27 = vld [vmem:[#allocation7 + $0x184] ss:$8 sps:$4 sm:$0xff]  }
 0x39d   :  { %5562 = vmatpush1.bf16.msra.mxu1 %v7927_v55  ;;  %v8022_v55 = vld [vmem:[#allocation7 + $0x194] ss:$8 sps:$4 sm:$0xff]  }
 0x39e   :  { %5563 = vmatprep.subr.bf16.mxu1 %v7932_v9  ;;  %v8020_v9 = vld [vmem:[#allocation7 + $0x190] ss:$8 sps:$4 sm:$0xff]  }
 0x3a1   :  { %5564 = vmatpush1.bf16.msra.mxu1 %v7930_v28  ;;  %v8025_v28 = vld [vmem:[#allocation7 + $0x1a4] ss:$8 sps:$4 sm:$0xff]  }
 0x3a2   :  { %5565 = vmatprep.subr.bf16.mxu1 %v7935_v12  ;;  %v8023_v12 = vld [vmem:[#allocation7 + $0x1a0] ss:$8 sps:$4 sm:$0xff]  }
 0x3a5   :  { %5566 = vmatpush1.bf16.msra.mxu1 %v7933_v43  ;;  %v8028_v43 = vld [vmem:[#allocation7 + $0x1b4] ss:$8 sps:$4 sm:$0xff]  }
 0x3a6   :  { %5567 = vmatprep.subr.bf16.mxu1 %v7938_v33  ;;  %v8026_v33 = vld [vmem:[#allocation7 + $0x1b0] ss:$8 sps:$4 sm:$0xff]  }
 0x3a9   :  { %5568 = vmatpush1.bf16.msra.mxu1 %v7936_v26  ;;  %v8031_v26 = vld [vmem:[#allocation7 + $0x1c4] ss:$8 sps:$4 sm:$0xff]  }
 0x3aa   :  { %5569 = vmatprep.subr.bf16.mxu1 %v7941_v19  ;;  %v8029_v19 = vld [vmem:[#allocation7 + $0x1c0] ss:$8 sps:$4 sm:$0xff]  }
 0x3ad   :  { %5570 = vmatpush1.bf16.msra.mxu1 %v7939_v51  ;;  %v8034_v51 = vld [vmem:[#allocation7 + $0x1d4] ss:$8 sps:$4 sm:$0xff]  }
 0x3ae   :  { %5571 = vmatprep.subr.bf16.mxu1 %v7944_v57  ;;  %v8032_v57 = vld [vmem:[#allocation7 + $0x1d0] ss:$8 sps:$4 sm:$0xff]  }
 0x3b1   :  { %5572 = vmatpush1.bf16.msra.mxu1 %v7942_v58  ;;  %v8037_v58 = vld [vmem:[#allocation7 + $0x1e4] ss:$8 sps:$4 sm:$0xff]  }
 0x3b2   :  { %6981 = vmatprep.subr.bf16.mxu1 %v8041_v24  ;;  %v8053_v24 = vld [vmem:[#allocation10 + $0x70] sm:$0xff]  }
 0x3b4   :  { %5574 = vmatmul.mubr.bf16.vlgmr.msra.gmra.mrb[28].mxu1 %v9291_v0 }
 0x3b5   :  { %6982 = vmatpush3.bf16.msra.mxu1 %v8042_v52  ;;  %v8055_v52 = vld [vmem:[#allocation10 + $0x78] sm:$0xff]  }
 0x405   :  { %v5532_v4 = vpop.f32.mrb[40].mxu0 }
 0x406   :  { %v7003_v0 = vadd.f32 %v5532_v4, %v9181_v38  ;;  %v5534_v56 = vpop.f32.mrb[41].mxu0  ;;  %v8038_v4 = vld [vmem:[#allocation7 + $0x1f0] ss:$8 sps:$4 sm:$0xff]  }
 0x407   :  { %v7004_v7 = vadd.f32 %v5534_v56, %v9183_v16  ;;  %v5536_v37 = vpop.f32.mrb[42].mxu0  ;;  %v8043_v16 = vld [vmem:[#allocation10 + $0x48] sm:$0xff]  }
 0x408   :  { %v5614_v63 = vadd.f32 %v7003_v0, %v5597_v50  ;;  %v7005_v21 = vadd.f32 %v5536_v37, %v9185_v25  ;;  %v5538_v34 = vpop.f32.mrb[43].mxu0  ;;  %v8044_v25 = vld [vmem:[#allocation10 + $0x8] sm:$0xff]   ;;  %6983 = vmatprep.subr.bf16.mxu1 %v8043_v16  ;;  %v5608_v0 = vsub.s32 3, %v9299_v3  ;;  %v8056_v16 = vld [vmem:[#allocation10 + $0x38] sm:$0xff]  }
 0x409   :  { %v5615_v59 = vadd.f32 %v7004_v7, %v5601_v1  ;;  %v7006_v5 = vadd.f32 %v5538_v34, %v9187_v60  ;;  %v7996_v60 = vld [vmem:[#allocation7 + $0x110] ss:$8 sps:$4 sm:$0xff]   ;;  %6984 = vmatpush3.bf16.msra.mxu1 %v8044_v25 }
 0x40a   :  { %v5618_v46 = vadd.f32 %v7005_v21, %v5597_v50  ;;  %v5622_v22 = vmax.f32 %v5614_v63, 0.0  ;;  %6985 = vmatprep.subr.bf16.mxu1 %v8045_v42  ;;  %v8040_v50 = vld [vmem:[#allocation7 + $0x1f4] ss:$8 sps:$4 sm:$0xff]   ;;  %v5609_v7 = vrot.slane %v9302_v32, %v5608_v0 }
 0x40b   :  { %v5619_v61 = vadd.f32 %v7006_v5, %v5601_v1  ;;  %v5623_v47 = vmax.f32 %v5615_v59, 0.0  ;;  %v5604_v1 = vsub.s32 2, %v9299_v3 }
 0x40c   :  { %v5626_v62 = vmax.f32 %v5618_v46, 0.0 }
 0x40d   :  { %v5627_v48 = vmax.f32 %v5619_v61, 0.0  ;;  %6986 = vmatpush3.bf16.msra.mxu1 %v8046_v29  ;;  %v5605_v56 = vrot.slane %v9302_v32, %v5604_v1  ;;  %v8054_v32 = vld [vmem:[#allocation10 + $0x30] sm:$0xff]  }
 0x40e   :  { %v5630_v41 = vpack.c.bf16 %v5626_v62, %v5622_v22  ;;  %6987 = vmatprep.subr.bf16.mxu1 %v8047_v15 }
 0x40f   :  { %v5631_v38 = vpack.c.bf16 %v5627_v48, %v5623_v47 }
 0x411   :  { %6062 = vmatprep.mubr.bf16.mxu0 %v5631_v38  ;;  %6988 = vmatpush3.bf16.msra.mxu1 %v8048_v45  ;;  %v8052_v38 = vld [vmem:[#allocation10 + $0x28] sm:$0xff]  }
 0x412   :  { %6063 = vmatmul.mubr.bf16.vlgmr.msra.gmra.mrb[44].mxu0 %v5630_v41  ;;  %6989 = vmatprep.subr.bf16.mxu1 %v8049_v53 }
 0x413   :  { %6074 = vmatpush1.bf16.msra.mxu0 %v7993_v6 }
 0x414   :  { %6075 = vmatprep.subr.bf16.mxu0 %v7998_v11  ;;  %v5698_v11 = vld [vmem:[#allocation9] sm:$0x3] }
 0x415   :  { %6990 = vmatpush3.bf16.msra.mxu1 %v8050_v23  ;;  %v5703_v25 = vrot.slane %v5698_v11, %v5596_v39 }
 0x416   :  { %6991 = vmatprep.subr.bf16.mxu1 %v8051_v49 }
 0x417   :  { %6076 = vmatpush1.bf16.msra.mxu0 %v7996_v60  ;;  %v5707_v60 = vrot.slane %v5698_v11, %v5600_v35 }
 0x418   :  { %6077 = vmatprep.subr.bf16.mxu0 %v8001_v2 }
 0x419   :  { %6992 = vmatpush3.bf16.msra.mxu1 %v8052_v38 }
 0x41a   :  { %6993 = vmatprep.subr.bf16.mxu1 %v8053_v24 }
 0x41b   :  { %6078 = vmatpush1.bf16.msra.mxu0 %v7999_v10 }
 0x41c   :  { %6079 = vmatprep.subr.bf16.mxu0 %v8004_v17 }
 0x41d   :  { %6994 = vmatpush3.bf16.msra.mxu1 %v8054_v32 }
 0x41e   :  { %6995 = vmatprep.subr.bf16.mxu1 %v8055_v52 }
 0x41f   :  { %6080 = vmatpush1.bf16.msra.mxu0 %v8002_v20 }
 0x420   :  { %6081 = vmatprep.subr.bf16.mxu0 %v8007_v40 }
 0x421   :  { %6996 = vmatpush3.bf16.msra.mxu1 %v8056_v16 }
 0x423   :  { %6082 = vmatpush1.bf16.msra.mxu0 %v8005_v18 }
 0x424   :  { %6083 = vmatprep.subr.bf16.mxu0 %v8010_v8 }
 0x427   :  { %6084 = vmatpush1.bf16.msra.mxu0 %v8008_v44  ;;  %v6964_v44 = vld [vmem:[#allocation12] ss:$0 sm:$0xff] }
 0x428   :  { %6085 = vmatprep.subr.bf16.mxu0 %v8013_v31 }
 0x42b   :  { %6086 = vmatpush1.bf16.msra.mxu0 %v8011_v30 }
 0x42c   :  { %6087 = vmatprep.subr.bf16.mxu0 %v8016_v36 }
 0x42f   :  { %6088 = vmatpush1.bf16.msra.mxu0 %v8014_v54 }
 0x430   :  { %6089 = vmatprep.subr.bf16.mxu0 %v8019_v27 }
 0x433   :  { %6090 = vmatpush1.bf16.msra.mxu0 %v8017_v14 }
 0x434   :  { %6091 = vmatprep.subr.bf16.mxu0 %v8022_v55 }
 0x437   :  { %6092 = vmatpush1.bf16.msra.mxu0 %v8020_v9 }
 0x438   :  { %6093 = vmatprep.subr.bf16.mxu0 %v8025_v28 }
 0x43b   :  { %6094 = vmatpush1.bf16.msra.mxu0 %v8023_v12 }
 0x43c   :  { %6095 = vmatprep.subr.bf16.mxu0 %v8028_v43 }
 0x43f   :  { %6096 = vmatpush1.bf16.msra.mxu0 %v8026_v33 }
 0x440   :  { %6097 = vmatprep.subr.bf16.mxu0 %v8031_v26 }
 0x443   :  { %6098 = vmatpush1.bf16.msra.mxu0 %v8029_v19 }
 0x444   :  { %6099 = vmatprep.subr.bf16.mxu0 %v8034_v51 }
 0x447   :  { %6100 = vmatpush1.bf16.msra.mxu0 %v8032_v57 }
 0x448   :  { %6101 = vmatprep.subr.bf16.mxu0 %v8037_v58 }
 0x44b   :  { %6102 = vmatpush1.bf16.msra.mxu0 %v8035_v13 }
 0x44c   :  { %6103 = vmatprep.subr.bf16.mxu0 %v8040_v50 }
 0x44f   :  { %6104 = vmatpush1.bf16.msra.mxu0 %v8038_v4 }
 0x487   :  { %v5575_v37 = vpop.f32.mrb[28].mxu1 }
 0x488   :  { %v5616_v63 = vadd.f32 %v5605_v56, %v5575_v37  ;;  %v5577_v21 = vpop.f32.mrb[29].mxu1 }
 0x489   :  { %v5617_v34 = vadd.f32 %v5609_v7, %v5577_v21  ;;  %v5579_v59 = vpop.f32.mrb[30].mxu1 }
 0x48a   :  { %v5620_v5 = vadd.f32 %v5605_v56, %v5579_v59  ;;  %v5581_v46 = vpop.f32.mrb[31].mxu1  ;;  %v5624_v22 = vmax.f32 %v5616_v63, 0.0 }
 0x48b   :  { %v5621_v61 = vadd.f32 %v5609_v7, %v5581_v46  ;;  %v5625_v47 = vmax.f32 %v5617_v34, 0.0 }
 0x48c   :  { %v5628_v62 = vmax.f32 %v5620_v5, 0.0 }
 0x48d   :  { %v5629_v48 = vmax.f32 %v5621_v61, 0.0 }
 0x48e   :  { %v5632_v41 = vpack.c.bf16 %v5628_v62, %v5624_v22 }
 0x48f   :  { %v5633_v6 = vpack.c.bf16 %v5629_v48, %v5625_v47 }
 0x491   :  { %6105 = vmatprep.mubr.bf16.mxu0 %v5633_v6 }
 0x492   :  { %6106 = vmatmul.mubr.bf16.vlgmr.msra.gmra.mrb[44].mxu0 %v5632_v41 }
 0x565   :  { %v6107_v42 = vpop.f32.mrb[44].mxu0 }
 0x566   :  { %v7007_v2 = vadd.f32 %v6107_v42, %v5703_v25  ;;  %v6109_v29 = vpop.f32.mrb[45].mxu0 }
 0x567   :  { %v7008_v10 = vadd.f32 %v6109_v29, %v5707_v60  ;;  %v6111_v15 = vpop.f32.mrb[46].mxu0 }
 0x568   :  { %v7009_v17 = vadd.f32 %v6111_v15, %v5703_v25  ;;  %v6113_v45 = vpop.f32.mrb[47].mxu0  ;;  %v6116_v53 = vmax.f32 %v7007_v2, 0.0 }
 0x569   :  { %v7010_v20 = vadd.f32 %v6113_v45, %v5707_v60  ;;  %v6117_v23 = vmax.f32 %v7008_v10, 0.0 }
 0x56a   :  { %v6118_v40 = vmax.f32 %v7009_v17, 0.0 }
 0x56b   :  { %v6119_v18 = vmax.f32 %v7010_v20, 0.0 }
 0x56c   :  { %v6120_v49 = vpack.c.bf16 %v6118_v40, %v6116_v53 }
 0x56d   :  { %v6121_v8 = vpack.c.bf16 %v6119_v18, %v6117_v23 }
 0x56f   :  { %6289 = vmatprep.mubr.bf16.mxu1 %v6121_v8 }
 0x570   :  { %6290 = vmatmul.mubr.bf16.vlgmr.msra.gmra.mrb[32].mxu1 %v6120_v49 }
 0x643   :  { %v6997_v39 = vpop.f32.mrb[32].mxu1 }
 0x644   :  { %v6998_v3 = vpop.f32.mrb[33].mxu1 }
 0x645   :  { %v6999_v35 = vadd.f32 %v6998_v3, %v6997_v39  ;;  %v7000_v31 = vpop.f32.mrb[34].mxu1 }
 0x646   :  { %v7001_v30 = vpop.f32.mrb[35].mxu1 }
 0x647   :  { %v6292_v36 = vadd.f32 %v6999_v35, %v6964_v44  ;;  %v7002_v54 = vadd.f32 %v7001_v30, %v7000_v31 }
 0x649   :  { %6298 = vst [vmem:[%s9337_s8] sm:$0xff] %v6292_v36  ;;  %v6295_v27 = vadd.f32 %v7002_v54, %v6964_v44 }
 0x64b   :  { %6299 = vst [vmem:[%s9337_s8 + $0x8] sm:$0xff] %v6295_v27 }
 0x64c   :  { %6304 = vsyncpa [#allocation3], 1 }
 0x64d   :  { %6305 = vsyncpa [#allocation5], 1 }
 0x64e   :  { %6306 = vsyncpa [#allocation8], 1 }
 0x64f   :  { %6307 = vsyncpa [#allocation11], 1 }

</bundles_post_ra>
